<compile_context>
chip_gen: v6e
topology: v6e:2x2x1
jax: 0.10.0
libtpu: 0.0.40
codegen_flags: <defaults>
</compile_context>

<pallas_src>
import math

import jax
import jax.numpy as jnp
from jax import lax
from jax.experimental import pallas as pl
from jax.experimental.pallas import tpu as pltpu


# ---------------------------------------------------------------------------
# Fused kernel builder
# ---------------------------------------------------------------------------
def _make_ghost_kernel(TH, W, Cin, Cinit, oup, use_mxu):
    def kernel(x_mid_ref, x_top_ref, x_bot_ref, w1_ref, wdw_ref,
               s1_ref, b1_ref, s2_ref, b2_ref, o_ref, x1pad_ref):
        t = pl.program_id(1)
        n_strips = pl.num_programs(1)

        # hoist small parameter rows once per grid step
        s1 = s1_ref[0]                      # (Cinit,)
        b1 = b1_ref[0]
        s2 = s2_ref[0]
        b2 = b2_ref[0]
        wdw = wdw_ref[...]                  # (9, Cinit)

        def conv1x1_bn_relu(x):             # (..., Cin) -> (..., Cinit)
            if use_mxu:
                lead = x.shape[:-1]
                y = jnp.dot(x.reshape(-1, Cin), w1_ref[...],
                            preferred_element_type=jnp.float32)
                y = y.reshape(lead + (Cinit,))
            else:
                # tiny-channel path: Cin broadcast-FMAs on the VPU
                y = x[..., 0:1] * w1_ref[0, :]
                for ci in range(1, Cin):
                    y = y + x[..., ci:ci + 1] * w1_ref[ci, :]
            return jnp.maximum(y * s1 + b1, 0.0)

        # ---- primary 1x1 conv on the strip and on the two halo rows --------
        x1_mid = conv1x1_bn_relu(x_mid_ref[0])          # (TH, W, Cinit)
        x1_top = conv1x1_bn_relu(x_top_ref[0, 0])       # (W, Cinit)
        x1_bot = conv1x1_bn_relu(x_bot_ref[0, 0])       # (W, Cinit)
        # conv zero padding: halo rows outside the image are zero
        x1_top = x1_top * (t > 0).astype(jnp.float32)
        x1_bot = x1_bot * (t < n_strips - 1).astype(jnp.float32)

        # first half of the channel concat goes straight to the output block
        o_ref[0, :, :, 0:Cinit] = x1_mid.astype(o_ref.dtype)

        # ---- assemble zero-padded x1 tile in VMEM (x1 never touches HBM) ---
        zcol = jnp.zeros((TH + 2, 1, Cinit), jnp.float32)
        x1pad_ref[:, 0:1, :] = zcol
        x1pad_ref[:, W + 1:W + 2, :] = zcol
        x1pad_ref[0:1, 1:W + 1, :] = x1_top[None]
        x1pad_ref[1:TH + 1, 1:W + 1, :] = x1_mid
        x1pad_ref[TH + 1:TH + 2, 1:W + 1, :] = x1_bot[None]

        # ---- depthwise 3x3 + BN + ReLU: 9 shifted FMAs (groups == channels)
        xp = x1pad_ref[...]                  # (TH+2, W+2, Cinit)
        acc = jnp.zeros((TH, W, Cinit), jnp.float32)
        for dh in range(3):
            for dw in range(3):
                acc = acc + xp[dh:dh + TH, dw:dw + W, :] * wdw[dh * 3 + dw]
        x2 = jnp.maximum(acc * s2 + b2, 0.0)

        # second half of the channel concat (static slice handles odd oup)
        o_ref[0, :, :, Cinit:oup] = x2[:, :, :oup - Cinit].astype(o_ref.dtype)

    return kernel


# ---------------------------------------------------------------------------
# Wrapper
# ---------------------------------------------------------------------------
def _pick_tile_h(H, W, C, budget_bytes=2 * 1024 * 1024):
    """Largest divisor of H whose strip (rows x W x C x 4B) fits the budget."""
    th = 1
    for cand in range(1, H + 1):
        if H % cand == 0 and cand * W * C * 4 <= budget_bytes:
            th = cand
    return th


def ghost_module_forward(x_nchw, params, oup, tile_h=None, use_mxu=None):
    """GhostModule forward: (N, Cin, H, W) f32 -> (N, oup, H, W) f32."""
    N, Cin, H, W = x_nchw.shape
    Cinit = params["w_primary"].shape[1]
    # ratio == 2 case used by this model (new_channels == init_channels)
    assert Cinit <= oup <= 2 * Cinit, (Cinit, oup)
    if use_mxu is None:
        use_mxu = Cin * Cinit > 1024        # tiny channels -> VPU FMA path
    if tile_h is None:
        tile_h = _pick_tile_h(H, W, max(Cin, oup))
    assert H % tile_h == 0, (H, tile_h)
    TH = tile_h
    nH = H // TH

    # boundary glue only: PyTorch NCHW -> NHWC (channels on the lane axis)
    x = jnp.transpose(x_nchw, (0, 2, 3, 1))

    w1 = params["w_primary"]                          # (Cin, Cinit)
    wdw = params["w_dw"].reshape(9, Cinit)            # (3,3,Cinit) -> (9,Cinit)
    s1 = params["bn1_scale"].reshape(1, Cinit)
    b1 = params["bn1_bias"].reshape(1, Cinit)
    s2 = params["bn2_scale"].reshape(1, Cinit)
    b2 = params["bn2_bias"].reshape(1, Cinit)

    kernel = _make_ghost_kernel(TH, W, Cin, Cinit, oup, use_mxu)

    # row-strip blocks; halo rows are 1-row blocks with a clamped index_map
    # (clamped boundary rows are masked to zero in-kernel == conv zero pad)
    strip_spec = pl.BlockSpec((1, TH, W, Cin), lambda n, t: (n, t, 0, 0))
    top_spec = pl.BlockSpec(
        (1, 1, W, Cin), lambda n, t: (n, jnp.maximum(t * TH - 1, 0), 0, 0))
    bot_spec = pl.BlockSpec(
        (1, 1, W, Cin), lambda n, t: (n, jnp.minimum(t * TH + TH, H - 1), 0, 0))

    def const(shape):
        return pl.BlockSpec(shape, lambda n, t: (0, 0))

    out_nhwc = pl.pallas_call(
        kernel,
        out_shape=jax.ShapeDtypeStruct((N, H, W, oup), jnp.float32),
        grid=(N, nH),
        in_specs=[
            strip_spec, top_spec, bot_spec,
            const((Cin, Cinit)), const((9, Cinit)),
            const((1, Cinit)), const((1, Cinit)),
            const((1, Cinit)), const((1, Cinit)),
        ],
        out_specs=pl.BlockSpec((1, TH, W, oup), lambda n, t: (n, t, 0, 0)),
        scratch_shapes=[pltpu.VMEM((TH + 2, W + 2, Cinit), jnp.float32)],
        compiler_params=pltpu.CompilerParams(
            dimension_semantics=("parallel", "parallel")),
    )(x, x, x, w1, wdw, s1, b1, s2, b2)

    # boundary glue only: NHWC -> NCHW
    return jnp.transpose(out_nhwc, (0, 3, 1, 2))


# ---------------------------------------------------------------------------
# Parameter init (BatchNorm folded, eval style) + pure-JAX reference
# ---------------------------------------------------------------------------
def init_ghost_params(key, inp, oup, ratio=2, dw_size=3):
    init_channels = math.ceil(oup / ratio)
    new_channels = init_channels * (ratio - 1)
    assert new_channels == init_channels  # ratio=2 case used by this model
    eps = 1e-5  # nn.BatchNorm2d default inside GhostModule
    k = jax.random.split(key, 8)
    # primary conv weight: PyTorch (init_ch, inp, 1, 1) -> (inp, init_ch)
    w_primary = (jax.random.normal(k[0], (inp, init_channels), jnp.float32)
                 * (1.0 / math.sqrt(inp)))
    # depthwise weight: PyTorch (new_ch, 1, 3, 3) -> (3, 3, init_ch)
    w_dw = (jax.random.normal(k[1], (dw_size, dw_size, init_channels),
                              jnp.float32) * (1.0 / 3.0))
    g1 = 1.0 + 0.1 * jax.random.normal(k[2], (init_channels,), jnp.float32)
    b1 = 0.1 * jax.random.normal(k[3], (init_channels,), jnp.float32)
    m1 = 0.1 * jax.random.normal(k[4], (init_channels,), jnp.float32)
    v1 = jax.random.uniform(k[5], (init_channels,), jnp.float32, 0.5, 1.5)
    g2 = 1.0 + 0.1 * jax.random.normal(k[6], (new_channels,), jnp.float32)
    b2 = 0.1 * jax.random.normal(k[7], (new_channels,), jnp.float32)
    m2 = jnp.zeros((new_channels,), jnp.float32)
    v2 = jnp.ones((new_channels,), jnp.float32)
    s1 = g1 / jnp.sqrt(v1 + eps)
    s2 = g2 / jnp.sqrt(v2 + eps)
    return {
        "w_primary": w_primary,
        "bn1_scale": s1, "bn1_bias": b1 - m1 * s1,
        "w_dw": w_dw,
        "bn2_scale": s2, "bn2_bias": b2 - m2 * s2,
    }


def ghost_module_reference(x_nchw, params, oup):
    x = jnp.transpose(x_nchw, (0, 2, 3, 1))
    Cin, Cinit = params["w_primary"].shape
    rhs1 = params["w_primary"].reshape(1, 1, Cin, Cinit)
    y1 = lax.conv_general_dilated(
        x, rhs1, (1, 1), "VALID",
        dimension_numbers=("NHWC", "HWIO", "NHWC"))
    x1 = jnp.maximum(y1 * params["bn1_scale"] + params["bn1_bias"], 0.0)
    rhs2 = params["w_dw"][:, :, None, :]  # (3,3,1,Cinit)
    y2 = lax.conv_general_dilated(
        x1, rhs2, (1, 1), ((1, 1), (1, 1)),
        dimension_numbers=("NHWC", "HWIO", "NHWC"),
        feature_group_count=Cinit)
    x2 = jnp.maximum(y2 * params["bn2_scale"] + params["bn2_bias"], 0.0)
    out = jnp.concatenate([x1, x2], axis=-1)[:, :, :, :oup]
    return jnp.transpose(out, (0, 3, 1, 2))


# ---------------------------------------------------------------------------
if __name__ == "__main__":
    # Small shapes consistent with the module (inp = oup_inc*2, oup = out_chann)
    N, Cin, H, W = 2, 4, 16, 16
    oup = 8

    key = jax.random.PRNGKey(0)
    kx, kp = jax.random.split(key)
    x = jax.random.normal(kx, (N, Cin, H, W), jnp.float32)
    params = init_ghost_params(kp, inp=Cin, oup=oup)

    ref = ghost_module_reference(x, params, oup)

    fwd = jax.jit(ghost_module_forward,
                  static_argnames=("oup", "tile_h", "use_mxu"))

    configs = [
        dict(tile_h=None, use_mxu=None),  # auto tile, VPU 1x1 path
        dict(tile_h=4, use_mxu=False),    # 4 strips per image: halo logic
        dict(tile_h=8, use_mxu=True),     # 2 strips: MXU path for the 1x1
    ]
    out = None
    for cfg in configs:
        out = jax.block_until_ready(fwd(x, params, oup=oup, **cfg))
        assert out.shape == (N, oup, H, W), (cfg, out.shape)
        assert jnp.allclose(out, ref, rtol=1e-4, atol=1e-4), (
            cfg, float(jnp.max(jnp.abs(out - ref))))

    print("KERNEL_OK")
</pallas_src>

<mosaic_0001>
module attributes {stable_mosaic.version = 11 : i64} {
  func.func @kernel(%arg0: i32, %arg1: i32, %arg2: memref<1x16x16x4xf32, #tpu.memory_space<vmem>>, %arg3: memref<1x1x16x4xf32, #tpu.memory_space<vmem>>, %arg4: memref<1x1x16x4xf32, #tpu.memory_space<vmem>>, %arg5: memref<4x4xf32, #tpu.memory_space<vmem>>, %arg6: memref<9x4xf32, #tpu.memory_space<vmem>>, %arg7: memref<1x4xf32, #tpu.memory_space<vmem>>, %arg8: memref<1x4xf32, #tpu.memory_space<vmem>>, %arg9: memref<1x4xf32, #tpu.memory_space<vmem>>, %arg10: memref<1x4xf32, #tpu.memory_space<vmem>>, %arg11: memref<1x16x16x8xf32, #tpu.memory_space<vmem>>, %arg12: memref<18x18x4xf32, #tpu.memory_space<vmem>>) attributes {dimension_semantics = [#tpu.dimension_semantics<parallel>, #tpu.dimension_semantics<parallel>], iteration_bounds = array<i64: 2, 1>, scalar_prefetch = 0 : i64, scratch_operands = 1 : i64, tpu.core_type = #tpu.core_type<tc>, window_params = [{transform_indices = @transform_0, window_bounds = array<i64: 1, 16, 16, 4>}, {transform_indices = @transform_1, window_bounds = array<i64: 1, 1, 16, 4>}, {transform_indices = @transform_2, window_bounds = array<i64: 1, 1, 16, 4>}, {pipeline_mode = #tpu.pipeline_mode<synchronous>, transform_indices = @transform_3, window_bounds = array<i64: 4, 4>}, {pipeline_mode = #tpu.pipeline_mode<synchronous>, transform_indices = @transform_4, window_bounds = array<i64: 9, 4>}, {pipeline_mode = #tpu.pipeline_mode<synchronous>, transform_indices = @transform_5, window_bounds = array<i64: 1, 4>}, {pipeline_mode = #tpu.pipeline_mode<synchronous>, transform_indices = @transform_6, window_bounds = array<i64: 1, 4>}, {pipeline_mode = #tpu.pipeline_mode<synchronous>, transform_indices = @transform_7, window_bounds = array<i64: 1, 4>}, {pipeline_mode = #tpu.pipeline_mode<synchronous>, transform_indices = @transform_8, window_bounds = array<i64: 1, 4>}, {transform_indices = @transform_9, window_bounds = array<i64: 1, 16, 16, 8>}]} {
    %c0 = arith.constant 0 : index
    %c0_0 = arith.constant 0 : index
    %0 = vector.load %arg7[%c0, %c0_0] : memref<1x4xf32, #tpu.memory_space<vmem>>, vector<1x4xf32>
    %1 = vector.shape_cast %0 : vector<1x4xf32> to vector<4xf32>
    %c0_1 = arith.constant 0 : index
    %c0_2 = arith.constant 0 : index
    %2 = vector.load %arg8[%c0_1, %c0_2] : memref<1x4xf32, #tpu.memory_space<vmem>>, vector<1x4xf32>
    %3 = vector.shape_cast %2 : vector<1x4xf32> to vector<4xf32>
    %c0_3 = arith.constant 0 : index
    %c0_4 = arith.constant 0 : index
    %4 = vector.load %arg9[%c0_3, %c0_4] : memref<1x4xf32, #tpu.memory_space<vmem>>, vector<1x4xf32>
    %5 = vector.shape_cast %4 : vector<1x4xf32> to vector<4xf32>
    %c0_5 = arith.constant 0 : index
    %c0_6 = arith.constant 0 : index
    %6 = vector.load %arg10[%c0_5, %c0_6] : memref<1x4xf32, #tpu.memory_space<vmem>>, vector<1x4xf32>
    %7 = vector.shape_cast %6 : vector<1x4xf32> to vector<4xf32>
    %c0_7 = arith.constant 0 : index
    %c0_8 = arith.constant 0 : index
    %8 = vector.load %arg6[%c0_7, %c0_8] : memref<9x4xf32, #tpu.memory_space<vmem>>, vector<9x4xf32>
    %c0_9 = arith.constant 0 : index
    %c0_10 = arith.constant 0 : index
    %c0_11 = arith.constant 0 : index
    %c0_12 = arith.constant 0 : index
    %9 = vector.load %arg2[%c0_9, %c0_10, %c0_11, %c0_12] : memref<1x16x16x4xf32, #tpu.memory_space<vmem>>, vector<1x16x16x4xf32>
    %10 = vector.shape_cast %9 : vector<1x16x16x4xf32> to vector<16x16x4xf32>
    %11 = vector.extract_strided_slice %10 {offsets = [0, 0, 0], sizes = [16, 16, 1], strides = [1, 1, 1]} : vector<16x16x4xf32> to vector<16x16x1xf32>
    %c0_13 = arith.constant 0 : index
    %c0_14 = arith.constant 0 : index
    %12 = vector.load %arg5[%c0_13, %c0_14] : memref<4x4xf32, #tpu.memory_space<vmem>>, vector<1x4xf32>
    %13 = vector.shape_cast %12 : vector<1x4xf32> to vector<4xf32>
    %14 = vector.shape_cast %13 : vector<4xf32> to vector<1x1x4xf32>
    %15 = vector.broadcast %11 : vector<16x16x1xf32> to vector<16x16x4xf32>
    %16 = vector.broadcast %14 : vector<1x1x4xf32> to vector<16x16x4xf32>
    %17 = arith.mulf %15, %16 : vector<16x16x4xf32>
    %18 = vector.extract_strided_slice %10 {offsets = [0, 0, 1], sizes = [16, 16, 1], strides = [1, 1, 1]} : vector<16x16x4xf32> to vector<16x16x1xf32>
    %c1 = arith.constant 1 : index
    %c0_15 = arith.constant 0 : index
    %19 = vector.load %arg5[%c1, %c0_15] : memref<4x4xf32, #tpu.memory_space<vmem>>, vector<1x4xf32>
    %20 = vector.shape_cast %19 : vector<1x4xf32> to vector<4xf32>
    %21 = vector.shape_cast %20 : vector<4xf32> to vector<1x1x4xf32>
    %22 = vector.broadcast %18 : vector<16x16x1xf32> to vector<16x16x4xf32>
    %23 = vector.broadcast %21 : vector<1x1x4xf32> to vector<16x16x4xf32>
    %24 = arith.mulf %22, %23 : vector<16x16x4xf32>
    %25 = arith.addf %17, %24 : vector<16x16x4xf32>
    %26 = vector.extract_strided_slice %10 {offsets = [0, 0, 2], sizes = [16, 16, 1], strides = [1, 1, 1]} : vector<16x16x4xf32> to vector<16x16x1xf32>
    %c2 = arith.constant 2 : index
    %c0_16 = arith.constant 0 : index
    %27 = vector.load %arg5[%c2, %c0_16] : memref<4x4xf32, #tpu.memory_space<vmem>>, vector<1x4xf32>
    %28 = vector.shape_cast %27 : vector<1x4xf32> to vector<4xf32>
    %29 = vector.shape_cast %28 : vector<4xf32> to vector<1x1x4xf32>
    %30 = vector.broadcast %26 : vector<16x16x1xf32> to vector<16x16x4xf32>
    %31 = vector.broadcast %29 : vector<1x1x4xf32> to vector<16x16x4xf32>
    %32 = arith.mulf %30, %31 : vector<16x16x4xf32>
    %33 = arith.addf %25, %32 : vector<16x16x4xf32>
    %34 = vector.extract_strided_slice %10 {offsets = [0, 0, 3], sizes = [16, 16, 1], strides = [1, 1, 1]} : vector<16x16x4xf32> to vector<16x16x1xf32>
    %c3 = arith.constant 3 : index
    %c0_17 = arith.constant 0 : index
    %35 = vector.load %arg5[%c3, %c0_17] : memref<4x4xf32, #tpu.memory_space<vmem>>, vector<1x4xf32>
    %36 = vector.shape_cast %35 : vector<1x4xf32> to vector<4xf32>
    %37 = vector.shape_cast %36 : vector<4xf32> to vector<1x1x4xf32>
    %38 = vector.broadcast %34 : vector<16x16x1xf32> to vector<16x16x4xf32>
    %39 = vector.broadcast %37 : vector<1x1x4xf32> to vector<16x16x4xf32>
    %40 = arith.mulf %38, %39 : vector<16x16x4xf32>
    %41 = arith.addf %33, %40 : vector<16x16x4xf32>
    %42 = vector.shape_cast %1 : vector<4xf32> to vector<1x1x4xf32>
    %43 = vector.broadcast %42 : vector<1x1x4xf32> to vector<16x16x4xf32>
    %44 = arith.mulf %41, %43 : vector<16x16x4xf32>
    %45 = vector.shape_cast %3 : vector<4xf32> to vector<1x1x4xf32>
    %46 = vector.broadcast %45 : vector<1x1x4xf32> to vector<16x16x4xf32>
    %47 = arith.addf %44, %46 : vector<16x16x4xf32>
    %cst = arith.constant 0.000000e+00 : f32
    %48 = vector.broadcast %cst : f32 to vector<16x16x4xf32>
    %49 = arith.maximumf %47, %48 : vector<16x16x4xf32>
    %c0_18 = arith.constant 0 : index
    %c0_19 = arith.constant 0 : index
    %c0_20 = arith.constant 0 : index
    %c0_21 = arith.constant 0 : index
    %50 = vector.load %arg3[%c0_18, %c0_19, %c0_20, %c0_21] : memref<1x1x16x4xf32, #tpu.memory_space<vmem>>, vector<1x1x16x4xf32>
    %51 = vector.shape_cast %50 : vector<1x1x16x4xf32> to vector<16x4xf32>
    %52 = vector.extract_strided_slice %51 {offsets = [0, 0], sizes = [16, 1], strides = [1, 1]} : vector<16x4xf32> to vector<16x1xf32>
    %c0_22 = arith.constant 0 : index
    %c0_23 = arith.constant 0 : index
    %53 = vector.load %arg5[%c0_22, %c0_23] : memref<4x4xf32, #tpu.memory_space<vmem>>, vector<1x4xf32>
    %54 = vector.shape_cast %53 : vector<1x4xf32> to vector<4xf32>
    %55 = vector.shape_cast %54 : vector<4xf32> to vector<1x4xf32>
    %56 = vector.broadcast %52 : vector<16x1xf32> to vector<16x4xf32>
    %57 = vector.broadcast %55 : vector<1x4xf32> to vector<16x4xf32>
    %58 = arith.mulf %56, %57 : vector<16x4xf32>
    %59 = vector.extract_strided_slice %51 {offsets = [0, 1], sizes = [16, 1], strides = [1, 1]} : vector<16x4xf32> to vector<16x1xf32>
    %c1_24 = arith.constant 1 : index
    %c0_25 = arith.constant 0 : index
    %60 = vector.load %arg5[%c1_24, %c0_25] : memref<4x4xf32, #tpu.memory_space<vmem>>, vector<1x4xf32>
    %61 = vector.shape_cast %60 : vector<1x4xf32> to vector<4xf32>
    %62 = vector.shape_cast %61 : vector<4xf32> to vector<1x4xf32>
    %63 = vector.broadcast %59 : vector<16x1xf32> to vector<16x4xf32>
    %64 = vector.broadcast %62 : vector<1x4xf32> to vector<16x4xf32>
    %65 = arith.mulf %63, %64 : vector<16x4xf32>
    %66 = arith.addf %58, %65 : vector<16x4xf32>
    %67 = vector.extract_strided_slice %51 {offsets = [0, 2], sizes = [16, 1], strides = [1, 1]} : vector<16x4xf32> to vector<16x1xf32>
    %c2_26 = arith.constant 2 : index
    %c0_27 = arith.constant 0 : index
    %68 = vector.load %arg5[%c2_26, %c0_27] : memref<4x4xf32, #tpu.memory_space<vmem>>, vector<1x4xf32>
    %69 = vector.shape_cast %68 : vector<1x4xf32> to vector<4xf32>
    %70 = vector.shape_cast %69 : vector<4xf32> to vector<1x4xf32>
    %71 = vector.broadcast %67 : vector<16x1xf32> to vector<16x4xf32>
    %72 = vector.broadcast %70 : vector<1x4xf32> to vector<16x4xf32>
    %73 = arith.mulf %71, %72 : vector<16x4xf32>
    %74 = arith.addf %66, %73 : vector<16x4xf32>
    %75 = vector.extract_strided_slice %51 {offsets = [0, 3], sizes = [16, 1], strides = [1, 1]} : vector<16x4xf32> to vector<16x1xf32>
    %c3_28 = arith.constant 3 : index
    %c0_29 = arith.constant 0 : index
    %76 = vector.load %arg5[%c3_28, %c0_29] : memref<4x4xf32, #tpu.memory_space<vmem>>, vector<1x4xf32>
    %77 = vector.shape_cast %76 : vector<1x4xf32> to vector<4xf32>
    %78 = vector.shape_cast %77 : vector<4xf32> to vector<1x4xf32>
    %79 = vector.broadcast %75 : vector<16x1xf32> to vector<16x4xf32>
    %80 = vector.broadcast %78 : vector<1x4xf32> to vector<16x4xf32>
    %81 = arith.mulf %79, %80 : vector<16x4xf32>
    %82 = arith.addf %74, %81 : vector<16x4xf32>
    %83 = vector.shape_cast %1 : vector<4xf32> to vector<1x4xf32>
    %84 = vector.broadcast %83 : vector<1x4xf32> to vector<16x4xf32>
    %85 = arith.mulf %82, %84 : vector<16x4xf32>
    %86 = vector.shape_cast %3 : vector<4xf32> to vector<1x4xf32>
    %87 = vector.broadcast %86 : vector<1x4xf32> to vector<16x4xf32>
    %88 = arith.addf %85, %87 : vector<16x4xf32>
    %cst_30 = arith.constant 0.000000e+00 : f32
    %89 = vector.broadcast %cst_30 : f32 to vector<16x4xf32>
    %90 = arith.maximumf %88, %89 : vector<16x4xf32>
    %c0_31 = arith.constant 0 : index
    %c0_32 = arith.constant 0 : index
    %c0_33 = arith.constant 0 : index
    %c0_34 = arith.constant 0 : index
    %91 = vector.load %arg4[%c0_31, %c0_32, %c0_33, %c0_34] : memref<1x1x16x4xf32, #tpu.memory_space<vmem>>, vector<1x1x16x4xf32>
    %92 = vector.shape_cast %91 : vector<1x1x16x4xf32> to vector<16x4xf32>
    %93 = vector.extract_strided_slice %92 {offsets = [0, 0], sizes = [16, 1], strides = [1, 1]} : vector<16x4xf32> to vector<16x1xf32>
    %c0_35 = arith.constant 0 : index
    %c0_36 = arith.constant 0 : index
    %94 = vector.load %arg5[%c0_35, %c0_36] : memref<4x4xf32, #tpu.memory_space<vmem>>, vector<1x4xf32>
    %95 = vector.shape_cast %94 : vector<1x4xf32> to vector<4xf32>
    %96 = vector.shape_cast %95 : vector<4xf32> to vector<1x4xf32>
    %97 = vector.broadcast %93 : vector<16x1xf32> to vector<16x4xf32>
    %98 = vector.broadcast %96 : vector<1x4xf32> to vector<16x4xf32>
    %99 = arith.mulf %97, %98 : vector<16x4xf32>
    %100 = vector.extract_strided_slice %92 {offsets = [0, 1], sizes = [16, 1], strides = [1, 1]} : vector<16x4xf32> to vector<16x1xf32>
    %c1_37 = arith.constant 1 : index
    %c0_38 = arith.constant 0 : index
    %101 = vector.load %arg5[%c1_37, %c0_38] : memref<4x4xf32, #tpu.memory_space<vmem>>, vector<1x4xf32>
    %102 = vector.shape_cast %101 : vector<1x4xf32> to vector<4xf32>
    %103 = vector.shape_cast %102 : vector<4xf32> to vector<1x4xf32>
    %104 = vector.broadcast %100 : vector<16x1xf32> to vector<16x4xf32>
    %105 = vector.broadcast %103 : vector<1x4xf32> to vector<16x4xf32>
    %106 = arith.mulf %104, %105 : vector<16x4xf32>
    %107 = arith.addf %99, %106 : vector<16x4xf32>
    %108 = vector.extract_strided_slice %92 {offsets = [0, 2], sizes = [16, 1], strides = [1, 1]} : vector<16x4xf32> to vector<16x1xf32>
    %c2_39 = arith.constant 2 : index
    %c0_40 = arith.constant 0 : index
    %109 = vector.load %arg5[%c2_39, %c0_40] : memref<4x4xf32, #tpu.memory_space<vmem>>, vector<1x4xf32>
    %110 = vector.shape_cast %109 : vector<1x4xf32> to vector<4xf32>
    %111 = vector.shape_cast %110 : vector<4xf32> to vector<1x4xf32>
    %112 = vector.broadcast %108 : vector<16x1xf32> to vector<16x4xf32>
    %113 = vector.broadcast %111 : vector<1x4xf32> to vector<16x4xf32>
    %114 = arith.mulf %112, %113 : vector<16x4xf32>
    %115 = arith.addf %107, %114 : vector<16x4xf32>
    %116 = vector.extract_strided_slice %92 {offsets = [0, 3], sizes = [16, 1], strides = [1, 1]} : vector<16x4xf32> to vector<16x1xf32>
    %c3_41 = arith.constant 3 : index
    %c0_42 = arith.constant 0 : index
    %117 = vector.load %arg5[%c3_41, %c0_42] : memref<4x4xf32, #tpu.memory_space<vmem>>, vector<1x4xf32>
    %118 = vector.shape_cast %117 : vector<1x4xf32> to vector<4xf32>
    %119 = vector.shape_cast %118 : vector<4xf32> to vector<1x4xf32>
    %120 = vector.broadcast %116 : vector<16x1xf32> to vector<16x4xf32>
    %121 = vector.broadcast %119 : vector<1x4xf32> to vector<16x4xf32>
    %122 = arith.mulf %120, %121 : vector<16x4xf32>
    %123 = arith.addf %115, %122 : vector<16x4xf32>
    %124 = vector.shape_cast %1 : vector<4xf32> to vector<1x4xf32>
    %125 = vector.broadcast %124 : vector<1x4xf32> to vector<16x4xf32>
    %126 = arith.mulf %123, %125 : vector<16x4xf32>
    %127 = vector.shape_cast %3 : vector<4xf32> to vector<1x4xf32>
    %128 = vector.broadcast %127 : vector<1x4xf32> to vector<16x4xf32>
    %129 = arith.addf %126, %128 : vector<16x4xf32>
    %cst_43 = arith.constant 0.000000e+00 : f32
    %130 = vector.broadcast %cst_43 : f32 to vector<16x4xf32>
    %131 = arith.maximumf %129, %130 : vector<16x4xf32>
    %c0_i32 = arith.constant 0 : i32
    %132 = arith.cmpi sgt, %arg1, %c0_i32 : i32
    %133 = arith.extui %132 : i1 to i32
    %134 = arith.sitofp %133 : i32 to f32
    %135 = vector.broadcast %134 : f32 to vector<16x4xf32>
    %136 = arith.mulf %90, %135 : vector<16x4xf32>
    %c0_i32_44 = arith.constant 0 : i32
    %137 = arith.cmpi slt, %arg1, %c0_i32_44 : i32
    %138 = arith.extui %137 : i1 to i32
    %139 = arith.sitofp %138 : i32 to f32
    %140 = vector.broadcast %139 : f32 to vector<16x4xf32>
    %141 = arith.mulf %131, %140 : vector<16x4xf32>
    %c0_45 = arith.constant 0 : index
    %c0_46 = arith.constant 0 : index
    %c0_47 = arith.constant 0 : index
    %c0_48 = arith.constant 0 : index
    %142 = vector.load %arg11[%c0_45, %c0_46, %c0_47, %c0_48] : memref<1x16x16x8xf32, #tpu.memory_space<vmem>>, vector<1x16x16x4xf32>
    %143 = vector.shape_cast %142 : vector<1x16x16x4xf32> to vector<16x16x4xf32>
    %144 = vector.shape_cast %49 : vector<16x16x4xf32> to vector<1x16x16x4xf32>
    tpu.vector_store %arg11[%c0_45, %c0_46, %c0_47, %c0_48], %144 {strides = array<i32>} : memref<1x16x16x8xf32, #tpu.memory_space<vmem>>, vector<1x16x16x4xf32>,
    %cst_49 = arith.constant 0.000000e+00 : f32
    %145 = vector.broadcast %cst_49 : f32 to vector<18x1x4xf32>
    %c0_50 = arith.constant 0 : index
    %c0_51 = arith.constant 0 : index
    %c0_52 = arith.constant 0 : index
    %146 = vector.load %arg12[%c0_50, %c0_51, %c0_52] : memref<18x18x4xf32, #tpu.memory_space<vmem>>, vector<18x1x4xf32>
    tpu.vector_store %arg12[%c0_50, %c0_51, %c0_52], %145 {strides = array<i32>} : memref<18x18x4xf32, #tpu.memory_space<vmem>>, vector<18x1x4xf32>,
    %c0_53 = arith.constant 0 : index
    %c17 = arith.constant 17 : index
    %c0_54 = arith.constant 0 : index
    %147 = vector.load %arg12[%c0_53, %c17, %c0_54] : memref<18x18x4xf32, #tpu.memory_space<vmem>>, vector<18x1x4xf32>
    tpu.vector_store %arg12[%c0_53, %c17, %c0_54], %145 {strides = array<i32>} : memref<18x18x4xf32, #tpu.memory_space<vmem>>, vector<18x1x4xf32>,
    %148 = vector.shape_cast %136 : vector<16x4xf32> to vector<1x16x4xf32>
    %c0_55 = arith.constant 0 : index
    %c1_56 = arith.constant 1 : index
    %c0_57 = arith.constant 0 : index
    %149 = vector.load %arg12[%c0_55, %c1_56, %c0_57] : memref<18x18x4xf32, #tpu.memory_space<vmem>>, vector<1x16x4xf32>
    tpu.vector_store %arg12[%c0_55, %c1_56, %c0_57], %148 {strides = array<i32>} : memref<18x18x4xf32, #tpu.memory_space<vmem>>, vector<1x16x4xf32>,
    %c1_58 = arith.constant 1 : index
    %c1_59 = arith.constant 1 : index
    %c0_60 = arith.constant 0 : index
    %150 = vector.load %arg12[%c1_58, %c1_59, %c0_60] : memref<18x18x4xf32, #tpu.memory_space<vmem>>, vector<16x16x4xf32>
    tpu.vector_store %arg12[%c1_58, %c1_59, %c0_60], %49 {strides = array<i32>} : memref<18x18x4xf32, #tpu.memory_space<vmem>>, vector<16x16x4xf32>,
    %151 = vector.shape_cast %141 : vector<16x4xf32> to vector<1x16x4xf32>
    %c17_61 = arith.constant 17 : index
    %c1_62 = arith.constant 1 : index
    %c0_63 = arith.constant 0 : index
    %152 = vector.load %arg12[%c17_61, %c1_62, %c0_63] : memref<18x18x4xf32, #tpu.memory_space<vmem>>, vector<1x16x4xf32>
    tpu.vector_store %arg12[%c17_61, %c1_62, %c0_63], %151 {strides = array<i32>} : memref<18x18x4xf32, #tpu.memory_space<vmem>>, vector<1x16x4xf32>,
    %c0_64 = arith.constant 0 : index
    %c0_65 = arith.constant 0 : index
    %c0_66 = arith.constant 0 : index
    %153 = vector.load %arg12[%c0_64, %c0_65, %c0_66] : memref<18x18x4xf32, #tpu.memory_space<vmem>>, vector<18x18x4xf32>
    %cst_67 = arith.constant 0.000000e+00 : f32
    %154 = vector.broadcast %cst_67 : f32 to vector<16x16x4xf32>
    %155 = vector.extract_strided_slice %153 {offsets = [0, 0, 0], sizes = [16, 16, 4], strides = [1, 1, 1]} : vector<18x18x4xf32> to vector<16x16x4xf32>
    %156 = vector.extract_strided_slice %8 {offsets = [0, 0], sizes = [1, 4], strides = [1, 1]} : vector<9x4xf32> to vector<1x4xf32>
    %157 = vector.shape_cast %156 : vector<1x4xf32> to vector<4xf32>
    %158 = vector.shape_cast %157 : vector<4xf32> to vector<1x1x4xf32>
    %159 = vector.broadcast %158 : vector<1x1x4xf32> to vector<16x16x4xf32>
    %160 = arith.mulf %155, %159 : vector<16x16x4xf32>
    %161 = arith.addf %154, %160 : vector<16x16x4xf32>
    %162 = vector.extract_strided_slice %153 {offsets = [0, 1, 0], sizes = [16, 16, 4], strides = [1, 1, 1]} : vector<18x18x4xf32> to vector<16x16x4xf32>
    %163 = vector.extract_strided_slice %8 {offsets = [1, 0], sizes = [1, 4], strides = [1, 1]} : vector<9x4xf32> to vector<1x4xf32>
    %164 = vector.shape_cast %163 : vector<1x4xf32> to vector<4xf32>
    %165 = vector.shape_cast %164 : vector<4xf32> to vector<1x1x4xf32>
    %166 = vector.broadcast %165 : vector<1x1x4xf32> to vector<16x16x4xf32>
    %167 = arith.mulf %162, %166 : vector<16x16x4xf32>
    %168 = arith.addf %161, %167 : vector<16x16x4xf32>
    %169 = vector.extract_strided_slice %153 {offsets = [0, 2, 0], sizes = [16, 16, 4], strides = [1, 1, 1]} : vector<18x18x4xf32> to vector<16x16x4xf32>
    %170 = vector.extract_strided_slice %8 {offsets = [2, 0], sizes = [1, 4], strides = [1, 1]} : vector<9x4xf32> to vector<1x4xf32>
    %171 = vector.shape_cast %170 : vector<1x4xf32> to vector<4xf32>
    %172 = vector.shape_cast %171 : vector<4xf32> to vector<1x1x4xf32>
    %173 = vector.broadcast %172 : vector<1x1x4xf32> to vector<16x16x4xf32>
    %174 = arith.mulf %169, %173 : vector<16x16x4xf32>
    %175 = arith.addf %168, %174 : vector<16x16x4xf32>
    %176 = vector.extract_strided_slice %153 {offsets = [1, 0, 0], sizes = [16, 16, 4], strides = [1, 1, 1]} : vector<18x18x4xf32> to vector<16x16x4xf32>
    %177 = vector.extract_strided_slice %8 {offsets = [3, 0], sizes = [1, 4], strides = [1, 1]} : vector<9x4xf32> to vector<1x4xf32>
    %178 = vector.shape_cast %177 : vector<1x4xf32> to vector<4xf32>
    %179 = vector.shape_cast %178 : vector<4xf32> to vector<1x1x4xf32>
    %180 = vector.broadcast %179 : vector<1x1x4xf32> to vector<16x16x4xf32>
    %181 = arith.mulf %176, %180 : vector<16x16x4xf32>
    %182 = arith.addf %175, %181 : vector<16x16x4xf32>
    %183 = vector.extract_strided_slice %153 {offsets = [1, 1, 0], sizes = [16, 16, 4], strides = [1, 1, 1]} : vector<18x18x4xf32> to vector<16x16x4xf32>
    %184 = vector.extract_strided_slice %8 {offsets = [4, 0], sizes = [1, 4], strides = [1, 1]} : vector<9x4xf32> to vector<1x4xf32>
    %185 = vector.shape_cast %184 : vector<1x4xf32> to vector<4xf32>
    %186 = vector.shape_cast %185 : vector<4xf32> to vector<1x1x4xf32>
    %187 = vector.broadcast %186 : vector<1x1x4xf32> to vector<16x16x4xf32>
    %188 = arith.mulf %183, %187 : vector<16x16x4xf32>
    %189 = arith.addf %182, %188 : vector<16x16x4xf32>
    %190 = vector.extract_strided_slice %153 {offsets = [1, 2, 0], sizes = [16, 16, 4], strides = [1, 1, 1]} : vector<18x18x4xf32> to vector<16x16x4xf32>
    %191 = vector.extract_strided_slice %8 {offsets = [5, 0], sizes = [1, 4], strides = [1, 1]} : vector<9x4xf32> to vector<1x4xf32>
    %192 = vector.shape_cast %191 : vector<1x4xf32> to vector<4xf32>
    %193 = vector.shape_cast %192 : vector<4xf32> to vector<1x1x4xf32>
    %194 = vector.broadcast %193 : vector<1x1x4xf32> to vector<16x16x4xf32>
    %195 = arith.mulf %190, %194 : vector<16x16x4xf32>
    %196 = arith.addf %189, %195 : vector<16x16x4xf32>
    %197 = vector.extract_strided_slice %153 {offsets = [2, 0, 0], sizes = [16, 16, 4], strides = [1, 1, 1]} : vector<18x18x4xf32> to vector<16x16x4xf32>
    %198 = vector.extract_strided_slice %8 {offsets = [6, 0], sizes = [1, 4], strides = [1, 1]} : vector<9x4xf32> to vector<1x4xf32>
    %199 = vector.shape_cast %198 : vector<1x4xf32> to vector<4xf32>
    %200 = vector.shape_cast %199 : vector<4xf32> to vector<1x1x4xf32>
    %201 = vector.broadcast %200 : vector<1x1x4xf32> to vector<16x16x4xf32>
    %202 = arith.mulf %197, %201 : vector<16x16x4xf32>
    %203 = arith.addf %196, %202 : vector<16x16x4xf32>
    %204 = vector.extract_strided_slice %153 {offsets = [2, 1, 0], sizes = [16, 16, 4], strides = [1, 1, 1]} : vector<18x18x4xf32> to vector<16x16x4xf32>
    %205 = vector.extract_strided_slice %8 {offsets = [7, 0], sizes = [1, 4], strides = [1, 1]} : vector<9x4xf32> to vector<1x4xf32>
    %206 = vector.shape_cast %205 : vector<1x4xf32> to vector<4xf32>
    %207 = vector.shape_cast %206 : vector<4xf32> to vector<1x1x4xf32>
    %208 = vector.broadcast %207 : vector<1x1x4xf32> to vector<16x16x4xf32>
    %209 = arith.mulf %204, %208 : vector<16x16x4xf32>
    %210 = arith.addf %203, %209 : vector<16x16x4xf32>
    %211 = vector.extract_strided_slice %153 {offsets = [2, 2, 0], sizes = [16, 16, 4], strides = [1, 1, 1]} : vector<18x18x4xf32> to vector<16x16x4xf32>
    %212 = vector.extract_strided_slice %8 {offsets = [8, 0], sizes = [1, 4], strides = [1, 1]} : vector<9x4xf32> to vector<1x4xf32>
    %213 = vector.shape_cast %212 : vector<1x4xf32> to vector<4xf32>
    %214 = vector.shape_cast %213 : vector<4xf32> to vector<1x1x4xf32>
    %215 = vector.broadcast %214 : vector<1x1x4xf32> to vector<16x16x4xf32>
    %216 = arith.mulf %211, %215 : vector<16x16x4xf32>
    %217 = arith.addf %210, %216 : vector<16x16x4xf32>
    %218 = vector.shape_cast %5 : vector<4xf32> to vector<1x1x4xf32>
    %219 = vector.broadcast %218 : vector<1x1x4xf32> to vector<16x16x4xf32>
    %220 = arith.mulf %217, %219 : vector<16x16x4xf32>
    %221 = vector.shape_cast %7 : vector<4xf32> to vector<1x1x4xf32>
    %222 = vector.broadcast %221 : vector<1x1x4xf32> to vector<16x16x4xf32>
    %223 = arith.addf %220, %222 : vector<16x16x4xf32>
    %cst_68 = arith.constant 0.000000e+00 : f32
    %224 = vector.broadcast %cst_68 : f32 to vector<16x16x4xf32>
    %225 = arith.maximumf %223, %224 : vector<16x16x4xf32>
    %c0_69 = arith.constant 0 : index
    %c0_70 = arith.constant 0 : index
    %c0_71 = arith.constant 0 : index
    %c4 = arith.constant 4 : index
    %226 = vector.load %arg11[%c0_69, %c0_70, %c0_71, %c4] : memref<1x16x16x8xf32, #tpu.memory_space<vmem>>, vector<1x16x16x4xf32>
    %227 = vector.shape_cast %226 : vector<1x16x16x4xf32> to vector<16x16x4xf32>
    %228 = vector.shape_cast %225 : vector<16x16x4xf32> to vector<1x16x16x4xf32>
    tpu.vector_store %arg11[%c0_69, %c0_70, %c0_71, %c4], %228 {strides = array<i32>} : memref<1x16x16x8xf32, #tpu.memory_space<vmem>>, vector<1x16x16x4xf32>,
    return
  }
  func.func @transform_0(%arg0: i32, %arg1: i32) -> (i32, i32, i32, i32) {
    %c0_i32 = arith.constant 0 : i32
    %c0_i32_0 = arith.constant 0 : i32
    %c0_i32_1 = arith.constant 0 : i32
    return %arg0, %arg1, %c0_i32, %c0_i32_0 : i32, i32, i32, i32
  }
  func.func @transform_1(%arg0: i32, %arg1: i32) -> (i32, i32, i32, i32) {
    %c16_i32 = arith.constant 16 : i32
    %0 = arith.muli %arg1, %c16_i32 : i32
    %c1_i32 = arith.constant 1 : i32
    %1 = arith.subi %0, %c1_i32 : i32
    %c0_i32 = arith.constant 0 : i32
    %2 = arith.maxsi %1, %c0_i32 : i32
    %c0_i32_0 = arith.constant 0 : i32
    %c0_i32_1 = arith.constant 0 : i32
    %c0_i32_2 = arith.constant 0 : i32
    return %arg0, %2, %c0_i32_0, %c0_i32_1 : i32, i32, i32, i32
  }
  func.func @transform_2(%arg0: i32, %arg1: i32) -> (i32, i32, i32, i32) {
    %c16_i32 = arith.constant 16 : i32
    %0 = arith.muli %arg1, %c16_i32 : i32
    %c16_i32_0 = arith.constant 16 : i32
    %1 = arith.addi %0, %c16_i32_0 : i32
    %c15_i32 = arith.constant 15 : i32
    %2 = arith.minsi %1, %c15_i32 : i32
    %c0_i32 = arith.constant 0 : i32
    %c0_i32_1 = arith.constant 0 : i32
    %c0_i32_2 = arith.constant 0 : i32
    return %arg0, %2, %c0_i32, %c0_i32_1 : i32, i32, i32, i32
  }
  func.func @transform_3(%arg0: i32, %arg1: i32) -> (i32, i32) {
    %c0_i32 = arith.constant 0 : i32
    %c0_i32_0 = arith.constant 0 : i32
    %c0_i32_1 = arith.constant 0 : i32
    return %c0_i32, %c0_i32_0 : i32, i32
  }
  func.func @transform_4(%arg0: i32, %arg1: i32) -> (i32, i32) {
    %c0_i32 = arith.constant 0 : i32
    %c0_i32_0 = arith.constant 0 : i32
    %c0_i32_1 = arith.constant 0 : i32
    return %c0_i32, %c0_i32_0 : i32, i32
  }
  func.func @transform_5(%arg0: i32, %arg1: i32) -> (i32, i32) {
    %c0_i32 = arith.constant 0 : i32
    %c0_i32_0 = arith.constant 0 : i32
    %c0_i32_1 = arith.constant 0 : i32
    return %c0_i32, %c0_i32_0 : i32, i32
  }
  func.func @transform_6(%arg0: i32, %arg1: i32) -> (i32, i32) {
    %c0_i32 = arith.constant 0 : i32
    %c0_i32_0 = arith.constant 0 : i32
    %c0_i32_1 = arith.constant 0 : i32
    return %c0_i32, %c0_i32_0 : i32, i32
  }
  func.func @transform_7(%arg0: i32, %arg1: i32) -> (i32, i32) {
    %c0_i32 = arith.constant 0 : i32
    %c0_i32_0 = arith.constant 0 : i32
    %c0_i32_1 = arith.constant 0 : i32
    return %c0_i32, %c0_i32_0 : i32, i32
  }
  func.func @transform_8(%arg0: i32, %arg1: i32) -> (i32, i32) {
    %c0_i32 = arith.constant 0 : i32
    %c0_i32_0 = arith.constant 0 : i32
    %c0_i32_1 = arith.constant 0 : i32
    return %c0_i32, %c0_i32_0 : i32, i32
  }
  func.func @transform_9(%arg0: i32, %arg1: i32) -> (i32, i32, i32, i32) {
    %c0_i32 = arith.constant 0 : i32
    %c0_i32_0 = arith.constant 0 : i32
    %c0_i32_1 = arith.constant 0 : i32
    return %arg0, %arg1, %c0_i32, %c0_i32_0 : i32, i32, i32, i32
  }
}

</mosaic_0001>

<bundles_post_ra>
// kernel: ghost_module_forward.1
= control target key start
LH: loop header
LB: loop body
LE: loop exit
PB: predicated region body
PF: predicated region fallthrough
CT: control target
= control target key end

     0   :  { %s3967_s30 = smov 0   ;;  %s3969_s10 = smov 0   ;;  %s6973_s0 = inlined_call_operand.vmem [shape: f32[2,16,16,4], index: 0, kind: input, shape index: {}, may-alias: {0,1,2}]   ;;  %s6974_s1 = inlined_call_operand.vmem [shape: f32[2,16,16,4], index: 1, kind: input, shape index: {}, may-alias: {0,1,2}]   ;;  %s6975_s2 = inlined_call_operand.vmem [shape: f32[2,16,16,4], index: 2, kind: input, shape index: {}, may-alias: {0,1,2}]   ;;  %s6976_s3 = inlined_call_operand.vmem [shape: f32[4,4], index: 3, kind: input, shape index: {}]   ;;  %s6977_s4 = inlined_call_operand.vmem [shape: f32[9,4], index: 4, kind: input, shape index: {}]   ;;  %s6978_s5 = inlined_call_operand.vmem [shape: f32[1,4], index: 5, kind: input, shape index: {}]   ;;  %s6979_s6 = inlined_call_operand.vmem [shape: f32[1,4], index: 6, kind: input, shape index: {}]   ;;  %s6980_s7 = inlined_call_operand.vmem [shape: f32[1,4], index: 7, kind: input, shape index: {}]   ;;  %s6981_s8 = inlined_call_operand.vmem [shape: f32[1,4], index: 8, kind: input, shape index: {}]   ;;  %s6982_s9 = inlined_call_operand.vmem [shape: f32[2,16,16,8], index: 9, kind: output, shape index: {}]  }
   0x1   :  { %s3971_s11 = smov 0  }
   0x2 LB: > { %s31_s12 = sadd.s32 1, %s3905_s10  ;;  %p3802_p0 = scmp.ge.s32.totalorder %s3909_s11, 1  ;;  %s3909_s11 = sphi %s3971_s11, %s19_s11   ;;  %s3905_s10 = sphi %s3969_s10, %s7167_s10   ;;  %s3901_s30 = sphi %s3967_s30, %s7166_s30  }
   0x3   : > { %p33_p1 = scmp.ge.s32.totalorder %s31_s12, 2  ;;  %p373_p2 = scmp.lt.s32.totalorder %s3909_s11, 3 }
   0x5   : > { %s7169_s12 = smov (%p33_p1, %s31_s12), 0  ;;  %p374_p3 = pnand %p3802_p0, %p373_p2 }
   0x7   : > { %377 = sbr.rel (%p374_p3) target bundleno = 842 (0x34a), region = 56 }
   0xc   : > { %p446_p4 = scmp.lt.s32.totalorder %s3901_s30, 1  ;;  %v6983_v0 = vmov 2   ;;  %v6985_v1 = vmov 0   ;;  %v6987_v34 = vmov 3   ;;  %v6989_v35 = vmov 1   ;;  %s3916_s24 = smov 4  }
   0xd   : > { %3861 = vset.pattern.permute.xlu0 %v6983_v0  ;;  %3858 = vset.pattern.permute.xlu1 %v6985_v1  ;;  %vm1592_vm0 = vcmask 24576   ;;  %vm1559_vm1 = vcmask 31744   ;;  %vm1889_vm2 = vcmask 1046528   ;;  %vm2134_vm3 = vcmask 1045504  }
   0xe   : > { %s7171_s30 = smov (!%p446_p4, %s3901_s30), 1  ;;  %vm3627_vm4 = vcmask 64544  }
   0xf   : > { %s3987_s13 = sshll.u32 %s7171_s30, 8 }
  0x10   : > { %s3993_s16 = scalar_lea.vmem %s6973_s0, %s3987_s13  ;;  %s4145_s19 = scalar_lea.vmem %s6974_s1, %s3987_s13 }
  0x11   : > { %v3996_v2 = vld [vmem:[%s3993_s16 + $0x10] sm:$0xff]  ;;  %v3999_v3 = vld [vmem:[%s3993_s16 + $0x8] sm:$0xff]  ;;  %v4004_v4 = vld [vmem:[%s3993_s16 + $0x18] sm:$0xff]  ;;  %s3825_s20 = sadd.s32 240, %s3987_s13 }
  0x12   : > { %552 = vperm.xlu1 %3858, %v3996_v2   ;;  %939 = vperm.xlu0 %3861, %v3999_v3   ;;  %v4007_v5 = vld [vmem:[%s3993_s16 + $0x20] sm:$0xff]  ;;  %v4012_v6 = vld [vmem:[%s3993_s16 + $0x28] sm:$0xff]  ;;  %v4015_v7 = vld [vmem:[%s3993_s16 + $0x30] sm:$0xff]  ;;  %s4300_s23 = scalar_lea.vmem %s6975_s2, %s3825_s20 }
  0x13   : > { %v4020_v8 = vld [vmem:[%s3993_s16 + $0x38] sm:$0xff]  ;;  %v4023_v9 = vld [vmem:[%s3993_s16 + $0x40] sm:$0xff]  ;;  %v4028_v10 = vld [vmem:[%s3993_s16 + $0x48] sm:$0xff] }
  0x14   : > { %v4031_v11 = vld [vmem:[%s3993_s16 + $0x50] sm:$0xff]  ;;  %v4036_v12 = vld [vmem:[%s3993_s16 + $0x58] sm:$0xff]  ;;  %v4039_v13 = vld [vmem:[%s3993_s16 + $0x60] sm:$0xff] }
  0x15   : > { %v4044_v14 = vld [vmem:[%s3993_s16 + $0x68] sm:$0xff]  ;;  %v4047_v15 = vld [vmem:[%s3993_s16 + $0x70] sm:$0xff]  ;;  %v4052_v16 = vld [vmem:[%s3993_s16 + $0x78] sm:$0xff] }
  0x16   : > { %557 = vperm.xlu1 %3858, %v4004_v4   ;;  %951 = vperm.xlu0 %3861, %v4007_v5   ;;  %v4055_v17 = vld [vmem:[%s3993_s16 + $0x80] sm:$0xff]  ;;  %v4060_v18 = vld [vmem:[%s3993_s16 + $0x88] sm:$0xff]  ;;  %v4063_v19 = vld [vmem:[%s3993_s16 + $0x90] sm:$0xff] }
  0x17   : > { %v4068_v20 = vld [vmem:[%s3993_s16 + $0x98] sm:$0xff]  ;;  %v4071_v21 = vld [vmem:[%s3993_s16 + $0xa0] sm:$0xff]  ;;  %v4076_v22 = vld [vmem:[%s3993_s16 + $0xa8] sm:$0xff] }
  0x18   : > { %v4079_v23 = vld [vmem:[%s3993_s16 + $0xb0] sm:$0xff]  ;;  %v4084_v24 = vld [vmem:[%s3993_s16 + $0xb8] sm:$0xff]  ;;  %v4087_v25 = vld [vmem:[%s3993_s16 + $0xc0] sm:$0xff] }
  0x19   : > { %v4092_v26 = vld [vmem:[%s3993_s16 + $0xc8] sm:$0xff]  ;;  %v4095_v27 = vld [vmem:[%s3993_s16 + $0xd0] sm:$0xff]  ;;  %v4100_v28 = vld [vmem:[%s3993_s16 + $0xd8] sm:$0xff] }
  0x1a   : > { %567 = vperm.xlu1 %3858, %v4012_v6   ;;  %959 = vperm.xlu0 %3861, %v4015_v7   ;;  %v4103_v29 = vld [vmem:[%s3993_s16 + $0xe0] sm:$0xff]  ;;  %v4108_v30 = vld [vmem:[%s3993_s16 + $0xe8] sm:$0xff]  ;;  %v4111_v31 = vld [vmem:[%s3993_s16 + $0xf0] sm:$0xff] }
  0x1b   : > { %v4116_v32 = vld [vmem:[%s3993_s16 + $0xf8] sm:$0xff]  ;;  %v4119_v33 = vld [vmem:[%s3993_s16] sm:$0xff] }
  0x1c   : > { %v4150_v36 = vld [vmem:[%s4145_s19] sm:$0xff] }
  0x1e   : > { %577 = vperm.xlu1 %3858, %v4020_v8   ;;  %967 = vperm.xlu0 %3861, %v4023_v9  }
  0x22   : > { %587 = vperm.xlu1 %3858, %v4028_v10   ;;  %975 = vperm.xlu0 %3861, %v4031_v11  }
  0x26   : > { %597 = vperm.xlu1 %3858, %v4036_v12   ;;  %983 = vperm.xlu0 %3861, %v4039_v13  }
  0x2a   : > { %607 = vperm.xlu1 %3858, %v4044_v14   ;;  %991 = vperm.xlu0 %3861, %v4047_v15  }
  0x2e   : > { %617 = vperm.xlu1 %3858, %v4052_v16   ;;  %999 = vperm.xlu0 %3861, %v4055_v17  }
  0x32   : > { %627 = vperm.xlu1 %3858, %v4060_v18   ;;  %1007 = vperm.xlu0 %3861, %v4063_v19  }
  0x36   : > { %637 = vperm.xlu1 %3858, %v4068_v20   ;;  %1015 = vperm.xlu0 %3861, %v4071_v21  }
  0x3a   : > { %647 = vperm.xlu1 %3858, %v4076_v22   ;;  %1023 = vperm.xlu0 %3861, %v4079_v23  }
  0x3e   : > { %657 = vperm.xlu1 %3858, %v4084_v24   ;;  %1031 = vperm.xlu0 %3861, %v4087_v25  }
  0x42   : > { %667 = vperm.xlu1 %3858, %v4092_v26   ;;  %1039 = vperm.xlu0 %3861, %v4095_v27  }
  0x46   : > { %677 = vperm.xlu1 %3858, %v4100_v28   ;;  %1047 = vperm.xlu0 %3861, %v4103_v29  }
  0x4a   : > { %687 = vperm.xlu1 %3858, %v4108_v30   ;;  %1055 = vperm.xlu0 %3861, %v4111_v31  }
  0x4e   : > { %697 = vperm.xlu1 %3858, %v4116_v32   ;;  %3862 = vset.pattern.permute.xlu0 %v6987_v34 }
  0x4f   : > { %1132 = vperm.xlu0 %3862, %v4119_v33  }
  0x52   : > { %3859 = vset.pattern.permute.xlu1 %v6989_v35 }
  0x53   : > { %742 = vperm.xlu1 %3859, %v3999_v3   ;;  %1144 = vperm.xlu0 %3862, %v4004_v4  }
  0x57   : > { %746 = vperm.xlu1 %3859, %v3996_v2   ;;  %1152 = vperm.xlu0 %3862, %v4012_v6  }
  0x5b   : > { %754 = vperm.xlu1 %3859, %v4007_v5   ;;  %1160 = vperm.xlu0 %3862, %v4020_v8  }
  0x5f   : > { %762 = vperm.xlu1 %3859, %v4015_v7   ;;  %1168 = vperm.xlu0 %3862, %v4028_v10  }
  0x63   : > { %770 = vperm.xlu1 %3859, %v4023_v9   ;;  %1176 = vperm.xlu0 %3862, %v4036_v12  }
  0x67   : > { %778 = vperm.xlu1 %3859, %v4031_v11   ;;  %1184 = vperm.xlu0 %3862, %v4044_v14  }
  0x6b   : > { %786 = vperm.xlu1 %3859, %v4039_v13   ;;  %1192 = vperm.xlu0 %3862, %v4052_v16  }
  0x6f   : > { %794 = vperm.xlu1 %3859, %v4047_v15   ;;  %1200 = vperm.xlu0 %3862, %v4060_v18  }
  0x73   : > { %802 = vperm.xlu1 %3859, %v4055_v17   ;;  %1208 = vperm.xlu0 %3862, %v4068_v20  }
  0x77   : > { %810 = vperm.xlu1 %3859, %v4063_v19   ;;  %1474 = vperm.xlu0 %3862, %v4150_v36  }
  0x7b   : > { %818 = vperm.xlu1 %3859, %v4071_v21   ;;  %1220 = vperm.xlu0 %3862, %v4079_v23  }
  0x7f   : > { %826 = vperm.xlu1 %3859, %v4079_v23   ;;  %1228 = vperm.xlu0 %3862, %v4087_v25  }
  0x83   : > { %834 = vperm.xlu1 %3859, %v4087_v25   ;;  %1236 = vperm.xlu0 %3862, %v4095_v27  }
  0x87   : > { %842 = vperm.xlu1 %3859, %v4095_v27   ;;  %1244 = vperm.xlu0 %3862, %v4103_v29  }
  0x8b   : > { %850 = vperm.xlu1 %3859, %v4103_v29   ;;  %3868 = vset.pattern.permute.xlu0 %v6985_v1 }
  0x8c   : > { %542 = vperm.xlu0 %3868, %v4119_v33  }
  0x8d   : > { %v4165_v37 = vpop.permute.xlu1 %552  ;;  %v4167_v38 = vpop.permute.xlu0 %939 }
  0x8f   : > { %858 = vperm.xlu1 %3859, %v4111_v31  }
  0x90   : > { %547 = vperm.xlu0 %3868, %v3999_v3  }
  0x91   : > { %v4171_v39 = vpop.permute.xlu1 %557  ;;  %v4173_v40 = vpop.permute.xlu0 %951 }
  0x93   : > { %3860 = vset.pattern.permute.xlu1 %v6983_v0  ;;  %v3915_v0 = vmov 0.0  }
  0x94   : > { %562 = vperm.xlu0 %3868, %v4007_v5   ;;  %935 = vperm.xlu1 %3860, %v4119_v33   ;;  %1593 = vst.msk [vmem:[#allocation2] sm:$0x1] %vm1592_vm0, %v3915_v0  ;;  %1594 = vst.msk [vmem:[#allocation2 + $0x18] sm:$0x1] %vm1592_vm0, %v3915_v0 }
  0x95   : > { %v4178_v41 = vpop.permute.xlu1 %567  ;;  %v4180_v42 = vpop.permute.xlu0 %959  ;;  %1595 = vst.msk [vmem:[#allocation2 + $0x30] sm:$0x1] %vm1592_vm0, %v3915_v0  ;;  %1596 = vst.msk [vmem:[#allocation2 + $0x48] sm:$0x1] %vm1592_vm0, %v3915_v0 }
  0x96   : > { %1597 = vst.msk [vmem:[#allocation2 + $0x60] sm:$0x1] %vm1592_vm0, %v3915_v0  ;;  %1598 = vst.msk [vmem:[#allocation2 + $0x78] sm:$0x1] %vm1592_vm0, %v3915_v0 }
  0x97   : > { %1599 = vst.msk [vmem:[#allocation2 + $0x90] sm:$0x1] %vm1592_vm0, %v3915_v0  ;;  %1600 = vst.msk [vmem:[#allocation2 + $0xa8] sm:$0x1] %vm1592_vm0, %v3915_v0 }
  0x98   : > { %572 = vperm.xlu0 %3868, %v4015_v7   ;;  %943 = vperm.xlu1 %3860, %v3996_v2   ;;  %1601 = vst.msk [vmem:[#allocation2 + $0xc0] sm:$0x1] %vm1592_vm0, %v3915_v0  ;;  %1602 = vst.msk [vmem:[#allocation2 + $0xd8] sm:$0x1] %vm1592_vm0, %v3915_v0 }
  0x99   : > { %v4184_v43 = vpop.permute.xlu1 %577  ;;  %v4186_v44 = vpop.permute.xlu0 %967  ;;  %1603 = vst.msk [vmem:[#allocation2 + $0xf0] sm:$0x1] %vm1592_vm0, %v3915_v0  ;;  %1604 = vst.msk [vmem:[#allocation2 + $0x108] sm:$0x1] %vm1592_vm0, %v3915_v0 }
  0x9a   : > { %1605 = vst.msk [vmem:[#allocation2 + $0x120] sm:$0x1] %vm1592_vm0, %v3915_v0  ;;  %1606 = vst.msk [vmem:[#allocation2 + $0x138] sm:$0x1] %vm1592_vm0, %v3915_v0 }
  0x9b   : > { %1607 = vst.msk [vmem:[#allocation2 + $0x150] sm:$0x1] %vm1592_vm0, %v3915_v0  ;;  %1608 = vst.msk [vmem:[#allocation2 + $0x168] sm:$0x1] %vm1592_vm0, %v3915_v0 }
  0x9c   : > { %582 = vperm.xlu0 %3868, %v4023_v9   ;;  %947 = vperm.xlu1 %3860, %v4004_v4   ;;  %1609 = vst.msk [vmem:[#allocation2 + $0x180] sm:$0x1] %vm1592_vm0, %v3915_v0  ;;  %1610 = vst.msk [vmem:[#allocation2 + $0x198] sm:$0x1] %vm1592_vm0, %v3915_v0 }
  0x9d   : > { %v4190_v45 = vpop.permute.xlu1 %587  ;;  %v4192_v46 = vpop.permute.xlu0 %975  ;;  %1611 = vst.msk [vmem:[#allocation2 + $0x11] sm:$0x1] %vm1592_vm0, %v3915_v0  ;;  %1612 = vst.msk [vmem:[#allocation2 + $0x29] sm:$0x1] %vm1592_vm0, %v3915_v0 }
  0x9e   : > { %1613 = vst.msk [vmem:[#allocation2 + $0x41] sm:$0x1] %vm1592_vm0, %v3915_v0  ;;  %1614 = vst.msk [vmem:[#allocation2 + $0x59] sm:$0x1] %vm1592_vm0, %v3915_v0 }
  0x9f   : > { %1615 = vst.msk [vmem:[#allocation2 + $0x71] sm:$0x1] %vm1592_vm0, %v3915_v0  ;;  %1616 = vst.msk [vmem:[#allocation2 + $0x89] sm:$0x1] %vm1592_vm0, %v3915_v0 }
  0xa0   : > { %592 = vperm.xlu0 %3868, %v4031_v11   ;;  %955 = vperm.xlu1 %3860, %v4012_v6   ;;  %1617 = vst.msk [vmem:[#allocation2 + $0xa1] sm:$0x1] %vm1592_vm0, %v3915_v0  ;;  %1618 = vst.msk [vmem:[#allocation2 + $0xb9] sm:$0x1] %vm1592_vm0, %v3915_v0 }
  0xa1   : > { %v4196_v47 = vpop.permute.xlu1 %597  ;;  %v4198_v48 = vpop.permute.xlu0 %983  ;;  %1619 = vst.msk [vmem:[#allocation2 + $0xd1] sm:$0x1] %vm1592_vm0, %v3915_v0  ;;  %1620 = vst.msk [vmem:[#allocation2 + $0xe9] sm:$0x1] %vm1592_vm0, %v3915_v0 }
  0xa2   : > { %1621 = vst.msk [vmem:[#allocation2 + $0x101] sm:$0x1] %vm1592_vm0, %v3915_v0  ;;  %1622 = vst.msk [vmem:[#allocation2 + $0x119] sm:$0x1] %vm1592_vm0, %v3915_v0 }
  0xa3   : > { %1623 = vst.msk [vmem:[#allocation2 + $0x131] sm:$0x1] %vm1592_vm0, %v3915_v0  ;;  %1624 = vst.msk [vmem:[#allocation2 + $0x149] sm:$0x1] %vm1592_vm0, %v3915_v0 }
  0xa4   : > { %602 = vperm.xlu0 %3868, %v4039_v13   ;;  %963 = vperm.xlu1 %3860, %v4020_v8   ;;  %1625 = vst.msk [vmem:[#allocation2 + $0x161] sm:$0x1] %vm1592_vm0, %v3915_v0  ;;  %1626 = vst.msk [vmem:[#allocation2 + $0x179] sm:$0x1] %vm1592_vm0, %v3915_v0 }
  0xa5   : > { %v4202_v49 = vpop.permute.xlu1 %607  ;;  %v4204_v50 = vpop.permute.xlu0 %991  ;;  %1627 = vst.msk [vmem:[#allocation2 + $0x191] sm:$0x1] %vm1592_vm0, %v3915_v0  ;;  %1628 = vst.msk [vmem:[#allocation2 + $0x1a9] sm:$0x1] %vm1592_vm0, %v3915_v0  ;;  %v4305_v0 = vld [vmem:[%s4300_s23] sm:$0xff] }
  0xa8   : > { %612 = vperm.xlu0 %3868, %v4047_v15   ;;  %971 = vperm.xlu1 %3860, %v4028_v10  }
  0xa9   : > { %v4208_v51 = vpop.permute.xlu1 %617  ;;  %v4210_v52 = vpop.permute.xlu0 %999 }
  0xac   : > { %622 = vperm.xlu0 %3868, %v4055_v17   ;;  %979 = vperm.xlu1 %3860, %v4036_v12  }
  0xad   : > { %v4214_v53 = vpop.permute.xlu1 %627  ;;  %v4216_v54 = vpop.permute.xlu0 %1007 }
  0xb0   : > { %632 = vperm.xlu0 %3868, %v4063_v19   ;;  %987 = vperm.xlu1 %3860, %v4044_v14  }
  0xb1   : > { %v4220_v55 = vpop.permute.xlu1 %637  ;;  %v4222_v56 = vpop.permute.xlu0 %1015 }
  0xb4   : > { %642 = vperm.xlu0 %3868, %v4071_v21   ;;  %995 = vperm.xlu1 %3860, %v4052_v16  }
  0xb5   : > { %v4226_v57 = vpop.permute.xlu1 %647  ;;  %v4228_v58 = vpop.permute.xlu0 %1023 }
  0xb8   : > { %652 = vperm.xlu0 %3868, %v4079_v23   ;;  %1003 = vperm.xlu1 %3860, %v4060_v18  }
  0xb9   : > { %v4232_v59 = vpop.permute.xlu1 %657  ;;  %v4234_v60 = vpop.permute.xlu0 %1031 }
  0xbc   : > { %662 = vperm.xlu0 %3868, %v4087_v25   ;;  %1011 = vperm.xlu1 %3860, %v4068_v20  }
  0xbd   : > { %v4238_v61 = vpop.permute.xlu1 %667  ;;  %v4240_v62 = vpop.permute.xlu0 %1039 }
  0xc0   : > { %672 = vperm.xlu0 %3868, %v4095_v27   ;;  %1019 = vperm.xlu1 %3860, %v4076_v22  }
  0xc1   : > { %v4244_v63 = vpop.permute.xlu1 %677  ;;  %v4246_v23 = vpop.permute.xlu0 %1047 }
  0xc2   : > { %7007 = vst [vmem:[#allocation3_spill] sm:$0xff] %v4246_v23 }
  0xc4   : > { %682 = vperm.xlu0 %3868, %v4103_v29   ;;  %1027 = vperm.xlu1 %3860, %v4084_v24  }
  0xc5   : > { %v4286_v25 = vpop.permute.xlu1 %687  ;;  %v4288_v27 = vpop.permute.xlu0 %1055 }
  0xc6   : > { %7008 = vst [vmem:[#allocation4_spill] sm:$0xff] %v4286_v25  ;;  %7009 = vst [vmem:[#allocation5_spill] sm:$0xff] %v4288_v27  ;;  %v7016_v27 = vmov 1  }
  0xc8   : > { %692 = vperm.xlu0 %3868, %v4111_v31   ;;  %1035 = vperm.xlu1 %3860, %v4092_v26  }
  0xc9   : > { %v4293_v1 = vpop.permute.xlu1 %697 }
  0xca   : > { %7010 = vst [vmem:[#allocation6_spill] sm:$0xff] %v4293_v1  ;;  %v4295_v34 = vpop.permute.xlu0 %1132 }
  0xcb   : > { %7011 = vst [vmem:[#allocation7_spill] sm:$0xff] %v4295_v34 }
  0xcc   : > { %1439 = vperm.xlu0 %3868, %v4150_v36   ;;  %1043 = vperm.xlu1 %3860, %v4100_v28  }
  0xce   : > { %v4307_v29 = vpop.permute.xlu1 %742  ;;  %v4309_v35 = vpop.permute.xlu0 %1144 }
  0xcf   : > { %7012 = vst [vmem:[#allocation8_spill] sm:$0xff] %v4307_v29  ;;  %7013 = vst [vmem:[#allocation9_spill] sm:$0xff] %v4309_v35  ;;  %v7018_v29 = vmov 3  }
  0xd0   : > { %1495 = vperm.xlu0 %3868, %v4305_v0   ;;  %1051 = vperm.xlu1 %3860, %v4108_v30  }
  0xd2   : > { %v4313_v34 = vpop.permute.xlu1 %746  ;;  %v4315_v1 = vpop.permute.xlu0 %1152 }
  0xd3   : > { %7014 = vst [vmem:[#allocation10_spill] sm:$0xff] %v4313_v34  ;;  %7015 = vst [vmem:[#allocation11_spill] sm:$0xff] %v4315_v1 }
  0xd4   : > { %3869 = vset.pattern.permute.xlu0 %v7016_v27  ;;  %1059 = vperm.xlu1 %3860, %v4116_v32  }
  0xd5   : > { %738 = vperm.xlu0 %3869, %v4119_v33  }
  0xd6   : > { %v4320_v25 = vpop.permute.xlu1 %754  ;;  %v4322_v23 = vpop.permute.xlu0 %1160 }
  0xd7   : > { %7017 = vst [vmem:[#allocation12_spill] sm:$0xff] %v4322_v23 }
  0xd8   : > { %3863 = vset.pattern.permute.xlu1 %v7018_v29 }
  0xd9   : > { %750 = vperm.xlu0 %3869, %v4004_v4   ;;  %1136 = vperm.xlu1 %3863, %v3999_v3  }
  0xda   : > { %v4327_v35 = vpop.permute.xlu1 %762  ;;  %v4329_v34 = vpop.permute.xlu0 %1168 }
  0xdd   : > { %758 = vperm.xlu0 %3869, %v4012_v6   ;;  %1140 = vperm.xlu1 %3863, %v3996_v2  }
  0xde   : > { %v4333_v1 = vpop.permute.xlu1 %770  ;;  %v4335_v33 = vpop.permute.xlu0 %1176 }
  0xe1   : > { %766 = vperm.xlu0 %3869, %v4020_v8   ;;  %1148 = vperm.xlu1 %3863, %v4007_v5  }
  0xe2   : > { %v4339_v23 = vpop.permute.xlu1 %778  ;;  %v4341_v4 = vpop.permute.xlu0 %1184 }
  0xe5   : > { %774 = vperm.xlu0 %3869, %v4028_v10   ;;  %1156 = vperm.xlu1 %3863, %v4015_v7  }
  0xe6   : > { %v4345_v3 = vpop.permute.xlu1 %786  ;;  %v4347_v6 = vpop.permute.xlu0 %1192 }
  0xe7   : > { %7019 = vst [vmem:[#allocation13_spill] sm:$0xff] %v4345_v3  ;;  %7020 = vst [vmem:[#allocation14_spill] sm:$0xff] %v4347_v6 }
  0xe9   : > { %782 = vperm.xlu0 %3869, %v4036_v12   ;;  %1164 = vperm.xlu1 %3863, %v4023_v9  }
  0xea   : > { %v4351_v2 = vpop.permute.xlu1 %794  ;;  %v4353_v8 = vpop.permute.xlu0 %1200 }
  0xeb   : > { %7021 = vst [vmem:[#allocation15_spill] sm:$0xff] %v4351_v2  ;;  %7022 = vst [vmem:[#allocation16_spill] sm:$0xff] %v4353_v8  ;;  %v4418_v2 = vld [vmem:[%s4300_s23 + $0x8] sm:$0xff]  ;;  %s4634_s23 = scalar_lea.vmem %s6982_s9, %s3987_s13 }
  0xed   : > { %790 = vperm.xlu0 %3869, %v4044_v14   ;;  %1172 = vperm.xlu1 %3863, %v4031_v11  }
  0xee   : > { %v4357_v5 = vpop.permute.xlu1 %802  ;;  %v4359_v10 = vpop.permute.xlu0 %1208 }
  0xef   : > { %7023 = vst [vmem:[#allocation17_spill] sm:$0xff] %v4357_v5  ;;  %7024 = vst [vmem:[#allocation18_spill] sm:$0xff] %v4359_v10  ;;  %v7031_v5 = vmov 2  }
  0xf1   : > { %798 = vperm.xlu0 %3869, %v4052_v16   ;;  %1180 = vperm.xlu1 %3863, %v4039_v13  }
  0xf2   : > { %v4363_v7 = vpop.permute.xlu1 %810  ;;  %v4365_v12 = vpop.permute.xlu0 %1474 }
  0xf3   : > { %7025 = vst [vmem:[#allocation19_spill] sm:$0xff] %v4363_v7  ;;  %7026 = vst [vmem:[#allocation20_spill] sm:$0xff] %v4365_v12 }
  0xf5   : > { %806 = vperm.xlu0 %3869, %v4060_v18   ;;  %1188 = vperm.xlu1 %3863, %v4047_v15  }
  0xf6   : > { %v4369_v9 = vpop.permute.xlu1 %818  ;;  %v4371_v11 = vpop.permute.xlu0 %1220 }
  0xf7   : > { %7027 = vst [vmem:[#allocation21_spill] sm:$0xff] %v4369_v9  ;;  %v7028_v9 = vmov 0  }
  0xf9   : > { %814 = vperm.xlu0 %3869, %v4068_v20   ;;  %1196 = vperm.xlu1 %3863, %v4055_v17   ;;  %v1436_v17 = vld [vmem:[%s4145_s19 + $0x8] sm:$0xff] }
  0xfa   : > { %v4375_v14 = vpop.permute.xlu1 %826  ;;  %v4377_v13 = vpop.permute.xlu0 %1228 }
  0xfd   : > { %822 = vperm.xlu0 %3869, %v4076_v22   ;;  %1204 = vperm.xlu1 %3863, %v4063_v19  }
  0xfe   : > { %v4381_v16 = vpop.permute.xlu1 %834  ;;  %v4383_v18 = vpop.permute.xlu0 %1236 }
 0x101   : > { %830 = vperm.xlu0 %3869, %v4084_v24   ;;  %1212 = vperm.xlu1 %3863, %v4071_v21  }
 0x102   : > { %v4387_v15 = vpop.permute.xlu1 %842  ;;  %v4389_v20 = vpop.permute.xlu0 %1244 }
 0x105   : > { %838 = vperm.xlu0 %3869, %v4092_v26   ;;  %3864 = vset.pattern.permute.xlu1 %v7028_v9 }
 0x106   : > { %v4394_v12 = vpop.permute.xlu1 %850  ;;  %1444 = vperm.xlu1 %3864, %v1436_v17  }
 0x107   : > { %v4396_v19 = vpop.permute.xlu0 %542 }
 0x108   : > { %7029 = vst [vmem:[#allocation22_spill] sm:$0xff] %v4396_v19 }
 0x109   : > { %846 = vperm.xlu0 %3869, %v4100_v28  }
 0x10a   : > { %v4399_v7 = vpop.permute.xlu1 %858  ;;  %3865 = vset.pattern.permute.xlu1 %v7016_v27 }
 0x10b   : > { %7030 = vst [vmem:[#allocation23_spill] sm:$0xff] %v4399_v7  ;;  %v4402_v21 = vpop.permute.xlu0 %547  ;;  %1450 = vperm.xlu1 %3865, %v4150_v36  }
 0x10d   : > { %854 = vperm.xlu0 %3869, %v4108_v30  }
 0x10f   : > { %v4406_v10 = vpop.permute.xlu0 %562  ;;  %3866 = vset.pattern.permute.xlu1 %v7031_v5  ;;  %v4409_v8 = vpop.permute.xlu1 %935 }
 0x110   : > { %7032 = vst [vmem:[#allocation24_spill] sm:$0xff] %v4409_v8  ;;  %1462 = vperm.xlu1 %3866, %v4150_v36  }
 0x111   : > { %862 = vperm.xlu0 %3869, %v4116_v32  }
 0x113   : > { %v4413_v19 = vpop.permute.xlu0 %572  ;;  %v4415_v7 = vpop.permute.xlu1 %943 }
 0x114   : > { %7033 = vst [vmem:[#allocation25_spill] sm:$0xff] %v4415_v7  ;;  %1466 = vperm.xlu1 %3866, %v1436_v17  }
 0x115   : > { %1454 = vperm.xlu0 %3869, %v1436_v17  }
 0x117   : > { %v4420_v6 = vpop.permute.xlu0 %582  ;;  %v4422_v3 = vpop.permute.xlu1 %947 }
 0x118   : > { %7034 = vst [vmem:[#allocation26_spill] sm:$0xff] %v4420_v6  ;;  %7035 = vst [vmem:[#allocation27_spill] sm:$0xff] %v4422_v3  ;;  %3867 = vset.pattern.permute.xlu1 %v7018_v29 }
 0x119   : > { %1510 = vperm.xlu0 %3869, %v4418_v2   ;;  %1478 = vperm.xlu1 %3867, %v1436_v17  }
 0x11b   : > { %v4426_v36 = vpop.permute.xlu0 %592  ;;  %v4428_v8 = vpop.permute.xlu1 %955 }
 0x11c   : > { %7036 = vst [vmem:[#allocation28_spill] sm:$0xff] %v4426_v36  ;;  %7037 = vst [vmem:[#allocation29_spill] sm:$0xff] %v4428_v8 }
 0x11d   : > { %3872 = vset.pattern.permute.xlu0 %v7018_v29  ;;  %1216 = vperm.xlu1 %3867, %v4076_v22  }
 0x11e   : > { %1252 = vperm.xlu0 %3872, %v4111_v31  }
 0x11f   : > { %v4433_v7 = vpop.permute.xlu0 %602  ;;  %v4435_v6 = vpop.permute.xlu1 %963 }
 0x120   : > { %7038 = vst [vmem:[#allocation30_spill] sm:$0xff] %v4435_v6 }
 0x121   : > { %1224 = vperm.xlu1 %3867, %v4084_v24   ;;  %v4457_v24 = vld [vmem:[%s6976_s3] ss:$0 sm:$0xff] }
 0x122   : > { %1530 = vperm.xlu0 %3872, %v4305_v0  }
 0x123   : > { %v4439_v3 = vpop.permute.xlu0 %612  ;;  %v4441_v17 = vpop.permute.xlu1 %971 }
 0x124   : > { %7039 = vst [vmem:[#allocation31_spill] sm:$0xff] %v4441_v17 }
 0x125   : > { %1232 = vperm.xlu1 %3867, %v4092_v26   ;;  %v4462_v26 = vld [vmem:[%s6976_s3 + $0x2] ss:$0 sm:$0xff] }
 0x126   : > { %v4483_v6 = vmul.f32 %v4462_v26, %v4173_v40 }
 0x127   : > { %v4444_v8 = vpop.permute.xlu0 %622  ;;  %v4446_v36 = vpop.permute.xlu1 %979 }
 0x128   : > { %7040 = vst [vmem:[#allocation32_spill] sm:$0xff] %v4446_v36 }
 0x129   : > { %1240 = vperm.xlu1 %3867, %v4100_v28   ;;  %v4471_v28 = vmul.f32 %v4457_v24, %v4165_v37  ;;  %v4495_v37 = vmul.f32 %v4457_v24, %v4184_v43  ;;  %v4514_v43 = vmul.f32 %v4462_v26, %v4192_v46  ;;  %v1721_v46 = vlaneseq }
 0x12b   : > { %v4449_v22 = vpop.permute.xlu0 %632  ;;  %v4451_v31 = vpop.permute.xlu1 %987  ;;  %7044 = vst [vmem:[#allocation36_spill] sm:$0xff] %v4495_v37 }
 0x12c   : > { %7041 = vst [vmem:[#allocation33_spill] sm:$0xff] %v4451_v31  ;;  %v4479_v31 = vmul.f32 %v4457_v24, %v4171_v39  ;;  %v4504_v39 = vld [vmem:[%s6976_s3 + $0x1] ss:$0 sm:$0xff] }
 0x12d   : > { %1248 = vperm.xlu1 %3867, %v4108_v30   ;;  %v4475_v30 = vmul.f32 %v4462_v26, %v4167_v38  ;;  %v4499_v38 = vmul.f32 %v4462_v26, %v4186_v44  ;;  %v891_v44 = vmul.f32 %v4504_v39, %v4375_v14  ;;  %v4534_v14 = vmul.f32 %v4462_v26, %v4204_v50 }
 0x12e   : > { %v4553_v50 = vmul.f32 %v4462_v26, %v4216_v54 }
 0x12f   : > { %v4464_v17 = vpop.permute.xlu0 %642  ;;  %v4466_v36 = vpop.permute.xlu1 %995 }
 0x130   : > { %7042 = vst [vmem:[#allocation34_spill] sm:$0xff] %v4466_v36  ;;  %v4487_v36 = vmul.f32 %v4457_v24, %v4178_v41 }
 0x131   : > { %1256 = vperm.xlu1 %3867, %v4116_v32   ;;  %v4491_v32 = vmul.f32 %v4462_v26, %v4180_v42  ;;  %v4510_v42 = vmul.f32 %v4457_v24, %v4190_v45  ;;  %v4529_v45 = vmul.f32 %v4457_v24, %v4202_v49  ;;  %v4545_v49 = vmul.f32 %v4462_v26, %v4210_v52 }
 0x132   : > { %7043 = vst [vmem:[#allocation35_spill] sm:$0xff] %v4487_v36  ;;  %v4521_v36 = vmul.f32 %v4457_v24, %v4196_v47  ;;  %v1088_v47 = vmul.f32 %v4462_v26, %v4228_v58  ;;  %v4562_v58 = vld [vmem:[%s6976_s3 + $0x3] ss:$0 sm:$0xff] }
 0x133   : > { %v653_v40 = vpop.permute.xlu0 %652  ;;  %v4506_v41 = vpop.permute.xlu1 %1003  ;;  %7047 = vst [vmem:[#allocation39_spill] sm:$0xff] %v4529_v45 }
 0x134   : > { %7045 = vst [vmem:[#allocation37_spill] sm:$0xff] %v4506_v41  ;;  %v726_v37 = vmul.f32 %v4457_v24, %v653_v40  ;;  %7046 = vst [vmem:[#allocation38_spill] sm:$0xff] %v4521_v36  ;;  %v4525_v41 = vmul.f32 %v4462_v26, %v4198_v48  ;;  %v4538_v40 = vmul.f32 %v4457_v24, %v4208_v51 }
 0x135   : > { %3870 = vset.pattern.permute.xlu1 %v7028_v9  ;;  %v4549_v9 = vmul.f32 %v4457_v24, %v4214_v53  ;;  %v4557_v51 = vmul.f32 %v4457_v24, %v4220_v55  ;;  %v1285_v53 = vmul.f32 %v4562_v58, %v4371_v11  ;;  %v4573_v55 = vmul.f32 %v4462_v26, %v4222_v56 }
 0x136   : > { %7048 = vst [vmem:[#allocation40_spill] sm:$0xff] %v4538_v40  ;;  %v923_v48 = vadd.f32 %v891_v44, %v726_v37  ;;  %1500 = vperm.xlu1 %3870, %v4418_v2   ;;  %v893_v44 = vmul.f32 %v4504_v39, %v4381_v16  ;;  %v4582_v40 = vld [vmem:[%s6978_s5] ss:$0 sm:$0xff]  ;;  %v4584_v11 = vshrl.u32 %v1721_v46, 7  ;;  %v4588_v16 = vmul.f32 %v4457_v24, %v4232_v59 }
 0x137   : > { %7049 = vst [vmem:[#allocation41_spill] sm:$0xff] %v4549_v9  ;;  %7050 = vst [vmem:[#allocation42_spill] sm:$0xff] %v4557_v51  ;;  %v663_v37 = vpop.permute.xlu0 %662  ;;  %v4564_v52 = vpop.permute.xlu1 %1011  ;;  %v4577_v51 = vmul.f32 %v4457_v24, %v4226_v57  ;;  %v1090_v56 = vmul.f32 %v4462_v26, %v4234_v60  ;;  %v4595_v57 = vmul.f32 %v4457_v24, %v4238_v61  ;;  %v4608_v60 = vld [vmem:[%s6979_s6] ss:$0 sm:$0xff] }
 0x138   : > { %v1120_v54 = vadd.f32 %v1088_v47, %v923_v48  ;;  %v728_v9 = vmul.f32 %v4457_v24, %v663_v37  ;;  %7052 = vst [vmem:[#allocation44_spill] sm:$0xff] %v4588_v16  ;;  %v1092_v37 = vmul.f32 %v4462_v26, %v4240_v62  ;;  %v4601_v46 = vmul.f32 %v4457_v24, %v4244_v63 }
 0x139   : > { %7051 = vst [vmem:[#allocation43_spill] sm:$0xff] %v4577_v51  ;;  %7053 = vst [vmem:[#allocation45_spill] sm:$0xff] %v4595_v57  ;;  %v1287_v59 = vmul.f32 %v4562_v58, %v4377_v13  ;;  %v895_v62 = vmul.f32 %v4504_v39, %v4387_v15  ;;  %v7055_v13 = vld [vmem:[#allocation3_spill] sm:$0xff]  ;;  %v1723_v57 = vsub.s32 0, %v4584_v11  ;;  %v1791_v16 = vsub.s32 1, %v4584_v11 }
 0x13a   : > { %v1317_v47 = vadd.f32 %v1285_v53, %v1120_v54  ;;  %v925_v48 = vadd.f32 %v893_v44, %v728_v9  ;;  %3871 = vset.pattern.permute.xlu1 %v7016_v27  ;;  %7054 = vst [vmem:[#allocation46_spill] sm:$0xff] %v4601_v46  ;;  %v1094_v44 = vmul.f32 %v4462_v26, %v7055_v13  ;;  %v7056_v54 = vld [vmem:[#allocation4_spill] sm:$0xff] }
 0x13b   : > { %v673_v27 = vpop.permute.xlu0 %672  ;;  %1506 = vperm.xlu1 %3871, %v4305_v0   ;;  %v4611_v61 = vpop.permute.xlu1 %1019  ;;  %v4621_v46 = vmul.f32 %v4457_v24, %v7056_v54 }
 0x13c   : > { %v1355_v63 = vmul.f32 %v4582_v40, %v1317_v47  ;;  %v1122_v9 = vadd.f32 %v1090_v56, %v925_v48  ;;  %v730_v53 = vmul.f32 %v4457_v24, %v673_v27  ;;  %v505_v56 = vld [vmem:[%s6977_s4] sm:$0xff]  ;;  %v2036_v47 = vsub.s32 2, %v4584_v11 }
 0x13d   : > { %7057 = vst [vmem:[#allocation3_spill] sm:$0xff] %v4621_v46  ;;  %v7058_v48 = vld [vmem:[#allocation5_spill] sm:$0xff]  ;;  %v4653_v36 = vrot.slane %v505_v56, %v1791_v16 }
 0x13e   : > { %v1393_v51 = vadd.f32 %v4608_v60, %v1355_v63  ;;  %v1319_v45 = vadd.f32 %v1287_v59, %v1122_v9  ;;  %v927_v15 = vadd.f32 %v895_v62, %v730_v53  ;;  %v4638_v27 = vmul.f32 %v4462_v26, %v7058_v48 }
 0x13f   : > { %v1289_v63 = vmul.f32 %v4562_v58, %v4383_v18  ;;  %v897_v59 = vmul.f32 %v4504_v39, %v4394_v12  ;;  %v683_v62 = vpop.permute.xlu0 %682  ;;  %3873 = vset.pattern.permute.xlu1 %v7031_v5  ;;  %v4645_v9 = vpop.permute.xlu1 %1027  ;;  %v2281_v53 = vsub.s32 3, %v4584_v11  ;;  %v4651_v18 = vrot.slane %v505_v56, %v1723_v57  ;;  %7061 = vst [vmem:[#allocation47_spill] sm:$0xff] %v4653_v36 }
 0x140   : > { %7059 = vst [vmem:[#allocation4_spill] sm:$0xff] %v4638_v27  ;;  %v1425_v13 = vmax.f32 %v1393_v51, 0.0  ;;  %v1357_v54 = vmul.f32 %v4582_v40, %v1319_v45  ;;  %v1124_v46 = vadd.f32 %v1092_v37, %v927_v15  ;;  %v732_v48 = vmul.f32 %v4457_v24, %v683_v62  ;;  %1518 = vperm.xlu1 %3873, %v4305_v0   ;;  %v7063_v62 = vld [vmem:[#allocation10_spill] sm:$0xff] }
 0x141   : > { %7060 = vst [vmem:[#allocation5_spill] sm:$0xff] %v4651_v18  ;;  %v2349_v12 = vsub.s32 4, %v4584_v11  ;;  %v2593_v5 = vsub.s32 5, %v4584_v11  ;;  %v4661_v15 = vrot.slane %v505_v56, %v2036_v47  ;;  %v871_v0 = vmul.f32 %v4504_v39, %v7063_v62  ;;  %v7067_v62 = vld [vmem:[#allocation7_spill] sm:$0xff] }
 0x142   : > { %1654 = vst.msk [vmem:[#allocation2 + $0x121] sm:$0xff] %vm1559_vm1, %v1425_v13  ;;  %1582 = vst.msk [vmem:[%s4634_s23 + $0xb0] sm:$0xff] %vm1559_vm1, %v1425_v13  ;;  %v1395_v51 = vadd.f32 %v4608_v60, %v1357_v54  ;;  %v1321_v45 = vadd.f32 %v1289_v63, %v1124_v46  ;;  %v929_v37 = vadd.f32 %v897_v59, %v732_v48  ;;  %v2837_v36 = vsub.s32 6, %v4584_v11  ;;  %v7065_v54 = vld [vmem:[#allocation6_spill] sm:$0xff] }
 0x143   : > { %7062 = vst [vmem:[#allocation48_spill] sm:$0xff] %v4661_v15  ;;  %v4665_v57 = vpop.permute.xlu0 %692  ;;  %v4667_v16 = vpop.permute.xlu1 %1035  ;;  %v4669_v18 = vrot.slane %v505_v56, %v2281_v53  ;;  %v2905_v13 = vsub.s32 7, %v4584_v11  ;;  %v1291_v46 = vmul.f32 %v4562_v58, %v4389_v20  ;;  %v4679_v48 = vmul.f32 %v4457_v24, %v7065_v54 }
 0x144   : > { %v1427_v63 = vmax.f32 %v1395_v51, 0.0  ;;  %v1359_v47 = vmul.f32 %v4582_v40, %v1321_v45  ;;  %v1126_v59 = vadd.f32 %v1094_v44, %v929_v37  ;;  %1522 = vperm.xlu1 %3873, %v4418_v2   ;;  %v4683_v53 = vmul.f32 %v4562_v58, %v7067_v62  ;;  %v7071_v51 = vld [vmem:[#allocation9_spill] sm:$0xff] }
 0x145   : > { %7064 = vst [vmem:[#allocation10_spill] sm:$0xff] %v4669_v18  ;;  %7066 = vst [vmem:[#allocation6_spill] sm:$0xff] %v4679_v48  ;;  %v4685_v15 = vrot.slane %v505_v56, %v2349_v12  ;;  %v4687_v11 = vrot.slane %v505_v56, %v2593_v5  ;;  %v7070_v18 = vld [vmem:[#allocation8_spill] sm:$0xff]  ;;  %v4693_v44 = vmul.f32 %v4562_v58, %v7071_v51  ;;  %v7072_v12 = vld [vmem:[#allocation11_spill] sm:$0xff] }
 0x146   : > { %v870_v20 = vmul.f32 %v4504_v39, %v7070_v18  ;;  %1656 = vst.msk [vmem:[#allocation2 + $0x139] sm:$0xff] %vm1559_vm1, %v1427_v63  ;;  %1584 = vst.msk [vmem:[%s4634_s23 + $0xc0] sm:$0xff] %vm1559_vm1, %v1427_v63  ;;  %v1397_v45 = vadd.f32 %v4608_v60, %v1359_v47  ;;  %v1323_v37 = vadd.f32 %v1291_v46, %v1126_v59  ;;  %v7075_v47 = vld [vmem:[#allocation12_spill] sm:$0xff] }
 0x147   : > { %7068 = vst [vmem:[#allocation7_spill] sm:$0xff] %v4685_v15  ;;  %7069 = vst [vmem:[#allocation49_spill] sm:$0xff] %v4687_v11  ;;  %v903_v54 = vadd.f32 %v871_v0, %v4471_v28  ;;  %v4702_v5 = vmul.f32 %v4562_v58, %v7072_v12  ;;  %v4704_v62 = vpop.permute.xlu0 %1439  ;;  %v4706_v18 = vpop.permute.xlu1 %1043  ;;  %v4708_v48 = vrot.slane %v505_v56, %v2837_v36  ;;  %v7083_v12 = vld [vmem:[#allocation15_spill] sm:$0xff]  ;;  %v7091_v15 = vld [vmem:[#allocation25_spill] sm:$0xff] }
 0x148   : > { %v4710_v51 = vrot.slane %v505_v56, %v2905_v13  ;;  %v873_v63 = vmul.f32 %v4504_v39, %v4320_v25  ;;  %v4716_v46 = vmul.f32 %v4562_v58, %v7075_v47  ;;  %v1429_v28 = vmax.f32 %v1397_v45, 0.0  ;;  %3874 = vset.pattern.permute.xlu1 %v7018_v29 }
 0x149   : > { %7073 = vst [vmem:[#allocation8_spill] sm:$0xff] %v4708_v48  ;;  %v1361_v0 = vmul.f32 %v4582_v40, %v1323_v37  ;;  %v875_v59 = vmul.f32 %v4504_v39, %v4327_v35  ;;  %v4724_v36 = vmul.f32 %v4562_v58, %v4329_v34  ;;  %v705_v56 = vmul.f32 %v4457_v24, %v4402_v21  ;;  %v7080_v21 = vld [vmem:[#allocation14_spill] sm:$0xff] }
 0x14a   : > { %7074 = vst [vmem:[#allocation9_spill] sm:$0xff] %v4710_v51  ;;  %v708_v25 = vmul.f32 %v4457_v24, %v4406_v10  ;;  %1534 = vperm.xlu1 %3874, %v4418_v2   ;;  %v877_v13 = vmul.f32 %v4504_v39, %v4333_v1  ;;  %v4735_v29 = vmul.f32 %v4562_v58, %v4335_v33  ;;  %1658 = vst.msk [vmem:[#allocation2 + $0x151] sm:$0xff] %vm1559_vm1, %v1429_v28  ;;  %v7079_v2 = vld [vmem:[#allocation13_spill] sm:$0xff] }
 0x14b   : > { %7076 = vst [vmem:[#allocation11_spill] sm:$0xff] %v4724_v36  ;;  %v879_v35 = vmul.f32 %v4504_v39, %v4339_v23  ;;  %1586 = vst.msk [vmem:[%s4634_s23 + $0xd0] sm:$0xff] %vm1559_vm1, %v1429_v28  ;;  %v1399_v34 = vadd.f32 %v4608_v60, %v1361_v0  ;;  %v4745_v10 = vmul.f32 %v4562_v58, %v4341_v4  ;;  %v4755_v45 = vpop.permute.xlu0 %1495  ;;  %v4757_v37 = vpop.permute.xlu1 %1051  ;;  %v7084_v4 = vld [vmem:[#allocation16_spill] sm:$0xff]  ;;  %v7086_v0 = vld [vmem:[#allocation26_spill] sm:$0xff] }
 0x14c   : > { %7077 = vst [vmem:[#allocation12_spill] sm:$0xff] %v4735_v29  ;;  %v881_v1 = vmul.f32 %v4504_v39, %v7079_v2  ;;  %v4751_v33 = vmul.f32 %v4562_v58, %v7080_v21  ;;  %v710_v23 = vmul.f32 %v4457_v24, %v4413_v19  ;;  %7082 = vst [vmem:[#allocation14_spill] sm:$0xff] %v4757_v37  ;;  %v7087_v51 = vld [vmem:[#allocation17_spill] sm:$0xff]  ;;  %v7088_v19 = vld [vmem:[#allocation18_spill] sm:$0xff] }
 0x14d   : > { %7078 = vst [vmem:[#allocation50_spill] sm:$0xff] %v4745_v10  ;;  %v883_v47 = vmul.f32 %v4504_v39, %v7083_v12  ;;  %v4763_v28 = vmul.f32 %v4562_v58, %v7084_v4  ;;  %v712_v2 = vmul.f32 %v4457_v24, %v7086_v0  ;;  %v1431_v21 = vmax.f32 %v1399_v34, 0.0  ;;  %v7090_v29 = vld [vmem:[#allocation19_spill] sm:$0xff]  ;;  %v7101_v37 = vld [vmem:[#allocation29_spill] sm:$0xff] }
 0x14e   : > { %7081 = vst [vmem:[#allocation13_spill] sm:$0xff] %v4751_v33  ;;  %v885_v33 = vmul.f32 %v4504_v39, %v7087_v51  ;;  %v4771_v48 = vmul.f32 %v4562_v58, %v7088_v19  ;;  %v902_v10 = vadd.f32 %v870_v20, %v705_v56  ;;  %v905_v11 = vadd.f32 %v873_v63, %v708_v25  ;;  %v7093_v51 = vld [vmem:[#allocation20_spill] sm:$0xff]  ;;  %v7095_v63 = vld [vmem:[#allocation21_spill] sm:$0xff]  ;;  %v7096_v25 = vld [vmem:[#allocation22_spill] sm:$0xff] }
 0x14f   : > { %7085 = vst [vmem:[#allocation15_spill] sm:$0xff] %v4763_v28  ;;  %v887_v12 = vmul.f32 %v4504_v39, %v7090_v29  ;;  %v1068_v4 = vmul.f32 %v4462_v26, %v7091_v15  ;;  %v7092_v28 = vld [vmem:[#allocation28_spill] sm:$0xff]  ;;  %v716_v34 = vmul.f32 %v4457_v24, %v4433_v7  ;;  %1660 = vst.msk [vmem:[#allocation2 + $0x169] sm:$0xff] %vm1559_vm1, %v1431_v21  ;;  %v4792_v0 = vpop.permute.xlu1 %1059 }
 0x150   : > { %7089 = vst [vmem:[#allocation16_spill] sm:$0xff] %v4771_v48  ;;  %v714_v36 = vmul.f32 %v4457_v24, %v7092_v28  ;;  %1588 = vst.msk [vmem:[%s4634_s23 + $0xe0] sm:$0xff] %vm1559_vm1, %v1431_v21  ;;  %v4786_v20 = vmul.f32 %v4562_v58, %v7093_v51  ;;  %v889_v56 = vmul.f32 %v4504_v39, %v7095_v63  ;;  %v7098_v28 = vld [vmem:[#allocation23_spill] sm:$0xff]  ;;  %v7099_v48 = vld [vmem:[#allocation24_spill] sm:$0xff] }
 0x151   : > { %v704_v15 = vmul.f32 %v4457_v24, %v7096_v25  ;;  %v907_v29 = vadd.f32 %v875_v59, %v710_v23  ;;  %7097 = vst [vmem:[#allocation17_spill] sm:$0xff] %v4792_v0  ;;  %v4796_v7 = vmul.f32 %v4504_v39, %v7098_v28  ;;  %v909_v19 = vadd.f32 %v877_v13, %v712_v2  ;;  %v7100_v2 = vld [vmem:[#allocation27_spill] sm:$0xff] }
 0x152   : > { %7094 = vst [vmem:[#allocation26_spill] sm:$0xff] %v4786_v20  ;;  %v718_v21 = vmul.f32 %v4457_v24, %v4439_v3  ;;  %v720_v51 = vmul.f32 %v4457_v24, %v4444_v8  ;;  %v739_v20 = vpop.permute.xlu0 %738  ;;  %v1066_v63 = vmul.f32 %v4462_v26, %v7099_v48  ;;  %v1099_v59 = vadd.f32 %v4475_v30, %v902_v10 }
 0x153   : > { %v869_v25 = vmul.f32 %v4504_v39, %v739_v20  ;;  %v4807_v23 = vadd.f32 %v4483_v6, %v905_v11  ;;  %v1100_v28 = vadd.f32 %v1068_v4, %v903_v54  ;;  %v911_v0 = vadd.f32 %v879_v35, %v714_v36  ;;  %v7103_v4 = vld [vmem:[#allocation31_spill] sm:$0xff] }
 0x154   : > { %v913_v13 = vadd.f32 %v881_v1, %v716_v34  ;;  %v722_v3 = vmul.f32 %v4457_v24, %v4449_v22  ;;  %v1069_v8 = vmul.f32 %v4462_v26, %v7100_v2  ;;  %v1071_v27 = vmul.f32 %v4462_v26, %v7101_v37  ;;  %v1137_v54 = vpop.permute.xlu1 %1136  ;;  %v7102_v22 = vld [vmem:[#allocation30_spill] sm:$0xff]  ;;  %v7104_v34 = vld [vmem:[#allocation32_spill] sm:$0xff] }
 0x155   : > { %v901_v48 = vadd.f32 %v869_v25, %v704_v15  ;;  %v4816_v20 = vadd.f32 %v4491_v32, %v907_v29  ;;  %v915_v30 = vadd.f32 %v883_v47, %v718_v21  ;;  %v917_v10 = vadd.f32 %v885_v33, %v720_v51  ;;  %v7105_v51 = vld [vmem:[#allocation33_spill] sm:$0xff] }
 0x156   : > { %v724_v6 = vmul.f32 %v4457_v24, %v4464_v17  ;;  %v751_v11 = vpop.permute.xlu0 %750  ;;  %v4821_v36 = vadd.f32 %v4499_v38, %v909_v19  ;;  %v4825_v35 = vmul.f32 %v4462_v26, %v7102_v22  ;;  %v1264_v32 = vmul.f32 %v4562_v58, %v1137_v54 }
 0x157   : > { %v1098_v1 = vadd.f32 %v1066_v63, %v901_v48  ;;  %v872_v37 = vmul.f32 %v4504_v39, %v751_v11  ;;  %v4831_v33 = vmul.f32 %v4462_v26, %v7103_v4  ;;  %v919_v47 = vadd.f32 %v887_v12, %v722_v3 }
 0x158   : > { %v4834_v17 = vadd.f32 %v4514_v43, %v911_v0  ;;  %v4837_v38 = vadd.f32 %v4525_v41, %v913_v13  ;;  %v4841_v15 = vmul.f32 %v4462_v26, %v7104_v34  ;;  %v1296_v21 = vadd.f32 %v1264_v32, %v1099_v59  ;;  %v1141_v43 = vpop.permute.xlu1 %1140  ;;  %v7106_v59 = vld [vmem:[#allocation34_spill] sm:$0xff] }
 0x159   : > { %v1295_v29 = vadd.f32 %v4683_v53, %v1098_v1  ;;  %v904_v19 = vadd.f32 %v872_v37, %v4479_v31  ;;  %v4847_v63 = vmul.f32 %v4462_v26, %v7105_v51  ;;  %v921_v12 = vadd.f32 %v889_v56, %v724_v6  ;;  %v7107_v56 = vld [vmem:[#allocation37_spill] sm:$0xff]  ;;  %v7108_v6 = vld [vmem:[#allocation35_spill] sm:$0xff]  ;;  %v7109_v51 = vld [vmem:[#allocation36_spill] sm:$0xff] }
 0x15a   : > { %v759_v25 = vpop.permute.xlu0 %758  ;;  %v4850_v0 = vadd.f32 %v4534_v14, %v915_v30  ;;  %v4853_v41 = vadd.f32 %v4545_v49, %v917_v10  ;;  %v1334_v53 = vmul.f32 %v4582_v40, %v1296_v21  ;;  %v4860_v2 = vmul.f32 %v4462_v26, %v7106_v59 }
 0x15b   : > { %v1333_v13 = vmul.f32 %v4582_v40, %v1295_v29  ;;  %v1101_v3 = vadd.f32 %v1069_v8, %v904_v19  ;;  %v874_v31 = vmul.f32 %v4504_v39, %v759_v25  ;;  %v4864_v48 = vmul.f32 %v4462_v26, %v7107_v56 }
 0x15c   : > { %v1265_v14 = vmul.f32 %v4562_v58, %v1141_v43  ;;  %v4868_v49 = vadd.f32 %v4553_v50, %v919_v47  ;;  %v1372_v10 = vadd.f32 %v4608_v60, %v1334_v53  ;;  %v4876_v54 = vmul.f32 %v4462_v26, %v4564_v52  ;;  %v1149_v50 = vpop.permute.xlu1 %1148 }
 0x15d   : > { %v1371_v30 = vadd.f32 %v4608_v60, %v1333_v13  ;;  %v1298_v8 = vadd.f32 %v4693_v44, %v1101_v3  ;;  %v906_v11 = vadd.f32 %v874_v31, %v7108_v6  ;;  %v734_v22 = vmul.f32 %v4457_v24, %v4665_v57 }
 0x15e   : > { %v1297_v1 = vadd.f32 %v1265_v14, %v1100_v28  ;;  %v767_v37 = vpop.permute.xlu0 %766  ;;  %v4881_v32 = vadd.f32 %v4573_v55, %v921_v12  ;;  %v1404_v47 = vmax.f32 %v1372_v10, 0.0  ;;  %v4886_v52 = vmul.f32 %v4462_v26, %v4611_v61 }
 0x15f   : > { %v1403_v44 = vmax.f32 %v1371_v30, 0.0  ;;  %v1336_v4 = vmul.f32 %v4582_v40, %v1298_v8  ;;  %v1103_v34 = vadd.f32 %v1071_v27, %v906_v11  ;;  %v876_v57 = vmul.f32 %v4504_v39, %v767_v37  ;;  %v7111_v11 = vld [vmem:[#allocation4_spill] sm:$0xff]  ;;  %v7112_v37 = vld [vmem:[#allocation14_spill] sm:$0xff] }
 0x160   : > { %v1335_v29 = vmul.f32 %v4582_v40, %v1297_v1  ;;  %v1267_v28 = vmul.f32 %v4562_v58, %v1149_v50  ;;  %v4893_v19 = vmul.f32 %v4462_v26, %v4645_v9  ;;  %v4897_v55 = vmul.f32 %v4462_v26, %v4667_v16  ;;  %1633 = vst.msk [vmem:[#allocation2 + $0x21] sm:$0xff] %vm1559_vm1, %v1404_v47  ;;  %v1157_v43 = vpop.permute.xlu1 %1156 }
 0x161   : > { %1632 = vst.msk [vmem:[#allocation2 + $0x19] sm:$0xff] %vm1559_vm1, %v1403_v44  ;;  %1560 = vst.msk [vmem:[%s4634_s23] sm:$0xff] %vm1559_vm1, %v1403_v44  ;;  %v1374_v61 = vadd.f32 %v4608_v60, %v1336_v4  ;;  %v1300_v27 = vadd.f32 %v4702_v5, %v1103_v34  ;;  %v931_v21 = vadd.f32 %v4796_v7, %v734_v22 }
 0x162   : > { %1561 = vst.msk [vmem:[%s4634_s23 + $0x8] sm:$0xff] %vm1559_vm1, %v1404_v47  ;;  %v1373_v9 = vadd.f32 %v4608_v60, %v1335_v29  ;;  %v908_v16 = vadd.f32 %v876_v57, %v7109_v51  ;;  %v1299_v12 = vadd.f32 %v1267_v28, %v4807_v23  ;;  %v775_v25 = vpop.permute.xlu0 %774  ;;  %v1269_v31 = vmul.f32 %v4562_v58, %v1157_v43  ;;  %v7113_v29 = vld [vmem:[#allocation17_spill] sm:$0xff]  ;;  %v7114_v57 = vld [vmem:[#allocation11_spill] sm:$0xff] }
 0x163   : > { %v1406_v13 = vmax.f32 %v1374_v61, 0.0  ;;  %v1338_v3 = vmul.f32 %v4582_v40, %v1300_v27  ;;  %v878_v53 = vmul.f32 %v4504_v39, %v775_v25  ;;  %v4916_v5 = vmul.f32 %v4457_v24, %v4704_v62  ;;  %v7115_v27 = vld [vmem:[#allocation38_spill] sm:$0xff]  ;;  %v7116_v25 = vld [vmem:[#allocation7_spill] sm:$0xff] }
 0x164   : > { %v1405_v7 = vmax.f32 %v1373_v9, 0.0  ;;  %v1105_v59 = vadd.f32 %v4825_v35, %v908_v16  ;;  %v1337_v56 = vmul.f32 %v4582_v40, %v1299_v12  ;;  %v4922_v23 = vmul.f32 %v4462_v26, %v4706_v18  ;;  %v1165_v6 = vpop.permute.xlu1 %1164 }
 0x165   : > { %1635 = vst.msk [vmem:[#allocation2 + $0x39] sm:$0xff] %vm1559_vm1, %v1406_v13  ;;  %1563 = vst.msk [vmem:[%s4634_s23 + $0x18] sm:$0xff] %vm1559_vm1, %v1406_v13  ;;  %v1376_v14 = vadd.f32 %v4608_v60, %v1338_v3  ;;  %v910_v30 = vadd.f32 %v878_v53, %v4510_v42  ;;  %v1301_v62 = vadd.f32 %v1269_v31, %v4816_v20 }
 0x166   : > { %v4932_v8 = vmul.f32 %v4457_v24, %v4755_v45  ;;  %1634 = vst.msk [vmem:[#allocation2 + $0x31] sm:$0xff] %vm1559_vm1, %v1405_v7  ;;  %1562 = vst.msk [vmem:[%s4634_s23 + $0x10] sm:$0xff] %vm1559_vm1, %v1405_v7  ;;  %v1302_v18 = vadd.f32 %v4716_v46, %v1105_v59  ;;  %v1375_v35 = vadd.f32 %v4608_v60, %v1337_v56  ;;  %v783_v10 = vpop.permute.xlu0 %782 }
 0x167   : > { %v4940_v22 = vadd.f32 %v7111_v11, %v931_v21  ;;  %v1408_v42 = vmax.f32 %v1376_v14, 0.0  ;;  %v1107_v20 = vadd.f32 %v4831_v33, %v910_v30  ;;  %v1339_v45 = vmul.f32 %v4582_v40, %v1301_v62  ;;  %v7117_v62 = vld [vmem:[#allocation12_spill] sm:$0xff] }
 0x168   : > { %7110 = vst [vmem:[#allocation18_spill] sm:$0xff] %v4932_v8  ;;  %v880_v1 = vmul.f32 %v4504_v39, %v783_v10  ;;  %v4947_v46 = vmul.f32 %v4462_v26, %v7112_v37  ;;  %v1340_v50 = vmul.f32 %v4582_v40, %v1302_v18  ;;  %v1407_v44 = vmax.f32 %v1375_v35, 0.0  ;;  %v4951_v47 = vld [vmem:[#allocation2 + $0x18] sm:$0xff]  ;;  %v4953_v34 = vld [vmem:[#allocation2 + $0x20] sm:$0xff]  ;;  %v1173_v12 = vpop.permute.xlu1 %1172  ;;  %v7118_v35 = vld [vmem:[#allocation39_spill] sm:$0xff] }
 0x169   : > { %v1271_v4 = vmul.f32 %v4562_v58, %v1165_v6  ;;  %v4957_v33 = vmul.f32 %v4462_v26, %v7113_v29  ;;  %1637 = vst.msk [vmem:[#allocation2 + $0x51] sm:$0xff] %vm1559_vm1, %v1408_v42  ;;  %1565 = vst.msk [vmem:[%s4634_s23 + $0x28] sm:$0xff] %vm1559_vm1, %v1408_v42  ;;  %v1304_v28 = vadd.f32 %v7114_v57, %v1107_v20 }
 0x16a   : > { %v1377_v61 = vadd.f32 %v4608_v60, %v1339_v45  ;;  %v912_v21 = vadd.f32 %v880_v1, %v7115_v27  ;;  %v1378_v9 = vadd.f32 %v4608_v60, %v1340_v50  ;;  %1636 = vst.msk [vmem:[#allocation2 + $0x49] sm:$0xff] %vm1559_vm1, %v1407_v44  ;;  %1564 = vst.msk [vmem:[%s4634_s23 + $0x20] sm:$0xff] %vm1559_vm1, %v1407_v44  ;;  %v791_v16 = vpop.permute.xlu0 %790  ;;  %v7119_v45 = vld [vmem:[#allocation49_spill] sm:$0xff] }
 0x16b   : > { %v1303_v51 = vadd.f32 %v1271_v4, %v4821_v36  ;;  %v2351_v43 = vmul.f32 %v7116_v25, %v4951_v47  ;;  %v4974_v13 = vmul.f32 %v7116_v25, %v4953_v34  ;;  %v1342_v3 = vmul.f32 %v4582_v40, %v1304_v28 }
 0x16c   : > { %v1409_v53 = vmax.f32 %v1377_v61, 0.0  ;;  %v1109_v31 = vadd.f32 %v4841_v15, %v912_v21  ;;  %v882_v7 = vmul.f32 %v4504_v39, %v791_v16  ;;  %v1410_v36 = vmax.f32 %v1378_v9, 0.0  ;;  %v1181_v20 = vpop.permute.xlu1 %1180  ;;  %v7120_v61 = vld [vmem:[#allocation10_spill] sm:$0xff] }
 0x16d   : > { %v1341_v59 = vmul.f32 %v4582_v40, %v1303_v51  ;;  %v1273_v56 = vmul.f32 %v4562_v58, %v1173_v12  ;;  %v2447_v14 = vrot.slane %v2351_v43, 1  ;;  %v1380_v30 = vadd.f32 %v4608_v60, %v1342_v3  ;;  %v7121_v9 = vld [vmem:[#allocation50_spill] sm:$0xff]  ;;  %v5014_v12 = vld [vmem:[#allocation2 + $0x30] sm:$0xff] }
 0x16e   : > { %1638 = vst.msk [vmem:[#allocation2 + $0x61] sm:$0xff] %vm1559_vm1, %v1409_v53  ;;  %1566 = vst.msk [vmem:[%s4634_s23 + $0x30] sm:$0xff] %vm1559_vm1, %v1409_v53  ;;  %v1306_v18 = vadd.f32 %v7117_v62, %v1109_v31  ;;  %v914_v10 = vadd.f32 %v882_v7, %v7118_v35  ;;  %v2448_v15 = vrot.slane %v4974_v13, 1  ;;  %v799_v42 = vpop.permute.xlu0 %798  ;;  %v2595_v1 = vmul.f32 %v7119_v45, %v4951_v47 }
 0x16f   : > { %1639 = vst.msk [vmem:[#allocation2 + $0x69] sm:$0xff] %vm1559_vm1, %v1410_v36  ;;  %1567 = vst.msk [vmem:[%s4634_s23 + $0x38] sm:$0xff] %vm1559_vm1, %v1410_v36  ;;  %v1379_v6 = vadd.f32 %v4608_v60, %v1341_v59  ;;  %v1305_v11 = vadd.f32 %v1273_v56, %v4834_v17  ;;  %v4997_v37 = vmul.f32 %v7119_v45, %v4953_v34  ;;  %v1412_v50 = vmax.f32 %v1380_v30, 0.0 }
 0x170   : > { %v1344_v44 = vmul.f32 %v4582_v40, %v1306_v18  ;;  %v1111_v4 = vadd.f32 %v4847_v63, %v914_v10  ;;  %v884_v29 = vmul.f32 %v4504_v39, %v799_v42  ;;  %v1275_v28 = vmul.f32 %v4562_v58, %v1181_v20  ;;  %v7122_v63 = vld [vmem:[#allocation40_spill] sm:$0xff]  ;;  %v1189_v7 = vpop.permute.xlu1 %1188 }
 0x171   : > { %v1411_v57 = vmax.f32 %v1379_v6, 0.0  ;;  %v1343_v17 = vmul.f32 %v4582_v40, %v1305_v11  ;;  %v5006_v27 = vmul.f32 %v7120_v61, %v4951_v47  ;;  %1641 = vst.msk [vmem:[#allocation2 + $0x81] sm:$0xff] %vm1559_vm1, %v1412_v50  ;;  %1569 = vst.msk [vmem:[%s4634_s23 + $0x48] sm:$0xff] %vm1559_vm1, %v1412_v50  ;;  %v5019_v43 = vsel %vm1889_vm2, %v2447_v14, %v2448_v15  ;;  %v5030_v18 = vld [vmem:[#allocation2 + $0x38] sm:$0xff] }
 0x172   : > { %v1382_v21 = vadd.f32 %v4608_v60, %v1344_v44  ;;  %v1308_v51 = vadd.f32 %v7121_v9, %v1111_v4  ;;  %v916_v16 = vadd.f32 %v884_v29, %v7122_v63  ;;  %v1307_v53 = vadd.f32 %v1275_v28, %v4837_v38  ;;  %v807_v31 = vpop.permute.xlu0 %806  ;;  %v7123_v6 = vld [vmem:[#allocation8_spill] sm:$0xff]  ;;  %v7126_v44 = vld [vmem:[#allocation9_spill] sm:$0xff] }
 0x173   : > { %1640 = vst.msk [vmem:[#allocation2 + $0x79] sm:$0xff] %vm1559_vm1, %v1411_v57  ;;  %1568 = vst.msk [vmem:[%s4634_s23 + $0x40] sm:$0xff] %vm1559_vm1, %v1411_v57  ;;  %v1381_v3 = vadd.f32 %v4608_v60, %v1343_v17  ;;  %v2691_v36 = vrot.slane %v2595_v1, 2  ;;  %v2692_v59 = vrot.slane %v4997_v37, 2  ;;  %v886_v62 = vmul.f32 %v4504_v39, %v807_v31  ;;  %v7125_v1 = vld [vmem:[#allocation41_spill] sm:$0xff] }
 0x174   : > { %v1414_v56 = vmax.f32 %v1382_v21, 0.0  ;;  %v1346_v30 = vmul.f32 %v4582_v40, %v1308_v51  ;;  %v1113_v14 = vadd.f32 %v4860_v2, %v916_v16  ;;  %v1345_v10 = vmul.f32 %v4582_v40, %v1307_v53  ;;  %v7124_v2 = vld [vmem:[#allocation13_spill] sm:$0xff]  ;;  %v1197_v28 = vpop.permute.xlu1 %1196 }
 0x175   : > { %v1413_v35 = vmax.f32 %v1381_v3, 0.0  ;;  %v1277_v38 = vmul.f32 %v4562_v58, %v1189_v7  ;;  %v5036_v11 = vmul.f32 %v7123_v6, %v5014_v12  ;;  %v918_v50 = vadd.f32 %v886_v62, %v7125_v1 }
 0x176   : > { %1643 = vst.msk [vmem:[#allocation2 + $0x99] sm:$0xff] %vm1559_vm1, %v1414_v56  ;;  %1571 = vst.msk [vmem:[%s4634_s23 + $0x58] sm:$0xff] %vm1559_vm1, %v1414_v56  ;;  %v1384_v42 = vadd.f32 %v4608_v60, %v1346_v30  ;;  %v1310_v20 = vadd.f32 %v7124_v2, %v1113_v14  ;;  %v2907_v4 = vmul.f32 %v7126_v44, %v5014_v12  ;;  %v815_v17 = vpop.permute.xlu0 %814  ;;  %v7127_v56 = vld [vmem:[#allocation15_spill] sm:$0xff]  ;;  %v7128_v14 = vld [vmem:[#allocation42_spill] sm:$0xff] }
 0x177   : > { %1642 = vst.msk [vmem:[#allocation2 + $0x91] sm:$0xff] %vm1559_vm1, %v1413_v35  ;;  %1570 = vst.msk [vmem:[%s4634_s23 + $0x50] sm:$0xff] %vm1559_vm1, %v1413_v35  ;;  %v1383_v29 = vadd.f32 %v4608_v60, %v1345_v10  ;;  %v1309_v57 = vadd.f32 %v1277_v38, %v4850_v0  ;;  %v5054_v21 = vsel %vm2134_vm3, %v2691_v36, %v2692_v59  ;;  %v5066_v0 = vld [vmem:[%s6977_s4 + $0x8] ss:$0 sm:$0xff] }
 0x178   : > { %v5058_v9 = vmul.f32 %v7126_v44, %v5030_v18  ;;  %v1416_v51 = vmax.f32 %v1384_v42, 0.0  ;;  %v1348_v63 = vmul.f32 %v4582_v40, %v1310_v20  ;;  %v1115_v16 = vadd.f32 %v4864_v48, %v918_v50  ;;  %v1205_v2 = vpop.permute.xlu1 %1204 }
 0x179   : > { %v888_v3 = vmul.f32 %v4504_v39, %v815_v17  ;;  %v1415_v53 = vmax.f32 %v1383_v29, 0.0  ;;  %v1347_v31 = vmul.f32 %v4582_v40, %v1309_v57  ;;  %v1279_v7 = vmul.f32 %v4562_v58, %v1197_v28  ;;  %v5091_v17 = vld [vmem:[#allocation2 + $0x28] sm:$0x3] }
 0x17a   : > { %v3151_v36 = vmul.f32 %v5066_v0, %v5014_v12  ;;  %1645 = vst.msk [vmem:[#allocation2 + $0xb1] sm:$0xff] %vm1559_vm1, %v1416_v51  ;;  %1573 = vst.msk [vmem:[%s4634_s23 + $0x68] sm:$0xff] %vm1559_vm1, %v1416_v51  ;;  %v1386_v48 = vadd.f32 %v4608_v60, %v1348_v63  ;;  %v1312_v30 = vadd.f32 %v7127_v56, %v1115_v16  ;;  %v3003_v35 = vrot.slane %v2907_v4, 1  ;;  %v823_v42 = vpop.permute.xlu0 %822 }
 0x17b   : > { %v920_v62 = vadd.f32 %v888_v3, %v7128_v14  ;;  %1644 = vst.msk [vmem:[#allocation2 + $0xa9] sm:$0xff] %vm1559_vm1, %v1415_v53  ;;  %1572 = vst.msk [vmem:[%s4634_s23 + $0x60] sm:$0xff] %vm1559_vm1, %v1415_v53  ;;  %v1385_v10 = vadd.f32 %v4608_v60, %v1347_v31  ;;  %v1311_v38 = vadd.f32 %v1279_v7, %v4853_v41  ;;  %v3004_v20 = vrot.slane %v5058_v9, 1  ;;  %v7129_v3 = vld [vmem:[#allocation16_spill] sm:$0xff]  ;;  %v7130_v31 = vld [vmem:[#allocation43_spill] sm:$0xff] }
 0x17c   : > { %v5086_v1 = vmul.f32 %v5066_v0, %v5030_v18  ;;  %v1418_v50 = vmax.f32 %v1386_v48, 0.0  ;;  %v1350_v4 = vmul.f32 %v4582_v40, %v1312_v30  ;;  %v890_v57 = vmul.f32 %v4504_v39, %v823_v42  ;;  %v1213_v30 = vpop.permute.xlu1 %1212 }
 0x17d   : > { %v1117_v29 = vadd.f32 %v4876_v54, %v920_v62  ;;  %v1417_v28 = vmax.f32 %v1385_v10, 0.0  ;;  %v1349_v41 = vmul.f32 %v4582_v40, %v1311_v38  ;;  %v1281_v51 = vmul.f32 %v4562_v58, %v1205_v2 }
 0x17e   : > { %v3247_v63 = vrot.slane %v3151_v36, 2  ;;  %1647 = vst.msk [vmem:[#allocation2 + $0xc9] sm:$0xff] %vm1559_vm1, %v1418_v50  ;;  %1575 = vst.msk [vmem:[%s4634_s23 + $0x78] sm:$0xff] %vm1559_vm1, %v1418_v50  ;;  %v1388_v16 = vadd.f32 %v4608_v60, %v1350_v4  ;;  %v922_v54 = vadd.f32 %v890_v57, %v7130_v31  ;;  %v3248_v7 = vrot.slane %v5086_v1, 2  ;;  %v831_v56 = vpop.permute.xlu0 %830  ;;  %v5117_v50 = vld [vmem:[#allocation2 + $0x40] sm:$0x3] }
 0x17f   : > { %v1314_v53 = vadd.f32 %v7129_v3, %v1117_v29  ;;  %1646 = vst.msk [vmem:[#allocation2 + $0xc1] sm:$0xff] %vm1559_vm1, %v1417_v28  ;;  %1574 = vst.msk [vmem:[%s4634_s23 + $0x70] sm:$0xff] %vm1559_vm1, %v1417_v28  ;;  %v1387_v48 = vadd.f32 %v4608_v60, %v1349_v41  ;;  %v1313_v36 = vadd.f32 %v1281_v51, %v4868_v49  ;;  %v7132_v28 = vld [vmem:[#allocation44_spill] sm:$0xff]  ;;  %v5234_v1 = vld [vmem:[#allocation2 + $0x50] sm:$0xff] }
 0x180   : > { %v5110_v14 = vsel %vm1889_vm2, %v3003_v35, %v3004_v20  ;;  %v2353_v62 = vmul.f32 %v7116_v25, %v5091_v17  ;;  %v1420_v10 = vmax.f32 %v1388_v16, 0.0  ;;  %v892_v42 = vmul.f32 %v4504_v39, %v831_v56 }
 0x181   : > { %7131 = vst [vmem:[#allocation19_spill] sm:$0xff] %v5110_v14  ;;  %v1352_v38 = vmul.f32 %v4582_v40, %v1314_v53  ;;  %v1283_v2 = vmul.f32 %v4562_v58, %v1213_v30  ;;  %v1419_v49 = vmax.f32 %v1387_v48, 0.0  ;;  %v1351_v4 = vmul.f32 %v4582_v40, %v1313_v36  ;;  %v1445_v36 = vpop.permute.xlu1 %1444 }
 0x182   : > { %v5121_v29 = vadd.f32 %v4886_v52, %v922_v54  ;;  %v5125_v35 = vmul.f32 %v7120_v61, %v4953_v34  ;;  %1649 = vst.msk [vmem:[#allocation2 + $0xe1] sm:$0xff] %vm1559_vm1, %v1420_v10  ;;  %1577 = vst.msk [vmem:[%s4634_s23 + $0x88] sm:$0xff] %vm1559_vm1, %v1420_v10  ;;  %v924_v41 = vadd.f32 %v892_v42, %v7132_v28  ;;  %v839_v3 = vpop.permute.xlu0 %838  ;;  %v2450_v53 = vrot.slane %v2353_v62, 1 }
 0x183   : > { %v1390_v57 = vadd.f32 %v4608_v60, %v1352_v38  ;;  %v1315_v51 = vadd.f32 %v1283_v2, %v4881_v32  ;;  %v5136_v16 = vsel %vm2134_vm3, %v3247_v63, %v3248_v7  ;;  %1648 = vst.msk [vmem:[#allocation2 + $0xd9] sm:$0xff] %vm1559_vm1, %v1419_v49  ;;  %1576 = vst.msk [vmem:[%s4634_s23 + $0x80] sm:$0xff] %vm1559_vm1, %v1419_v49  ;;  %v7134_v2 = vld [vmem:[#allocation45_spill] sm:$0xff] }
 0x184   : > { %7133 = vst [vmem:[#allocation25_spill] sm:$0xff] %v5136_v16  ;;  %v1389_v52 = vadd.f32 %v4608_v60, %v1351_v4  ;;  %v2597_v31 = vmul.f32 %v7119_v45, %v5091_v17  ;;  %v2909_v32 = vmul.f32 %v7126_v44, %v5117_v50  ;;  %v894_v48 = vmul.f32 %v4504_v39, %v839_v3 }
 0x185   : > { %v1422_v54 = vmax.f32 %v1390_v57, 0.0  ;;  %v1353_v63 = vmul.f32 %v4582_v40, %v1315_v51  ;;  %v5150_v56 = vmul.f32 %v7123_v6, %v5030_v18  ;;  %v5153_v62 = vmul.f32 %v4457_v24, %v1445_v36  ;;  %v7138_v36 = vld [vmem:[#allocation46_spill] sm:$0xff] }
 0x186   : > { %v1421_v30 = vmax.f32 %v1389_v52, 0.0  ;;  %v5156_v10 = vadd.f32 %v4893_v19, %v924_v41  ;;  %v2694_v38 = vrot.slane %v2597_v31, 2  ;;  %v926_v49 = vadd.f32 %v894_v48, %v7134_v2  ;;  %v847_v24 = vpop.permute.xlu0 %846  ;;  %v7135_v41 = vld [vmem:[#allocation47_spill] sm:$0xff]  ;;  %v1451_v37 = vpop.permute.xlu1 %1450 }
 0x187   : > { %1651 = vst.msk [vmem:[#allocation2 + $0xf9] sm:$0xff] %vm1559_vm1, %v1422_v54  ;;  %1579 = vst.msk [vmem:[%s4634_s23 + $0x98] sm:$0xff] %vm1559_vm1, %v1422_v54  ;;  %v1391_v42 = vadd.f32 %v4608_v60, %v1353_v63  ;;  %v3006_v4 = vrot.slane %v2909_v32, 1  ;;  %v3153_v57 = vmul.f32 %v5066_v0, %v5117_v50  ;;  %v5171_v19 = vsel %vm1889_vm2, %v2448_v15, %v2450_v53  ;;  %v7136_v15 = vld [vmem:[#allocation5_spill] sm:$0xff]  ;;  %v7137_v63 = vld [vmem:[#allocation48_spill] sm:$0xff] }
 0x188   : > { %1650 = vst.msk [vmem:[#allocation2 + $0xf1] sm:$0xff] %vm1559_vm1, %v1421_v30  ;;  %1578 = vst.msk [vmem:[%s4634_s23 + $0x90] sm:$0xff] %vm1559_vm1, %v1421_v30  ;;  %v5176_v28 = vsel %vm2134_vm3, %v2692_v59, %v2694_v38  ;;  %v1796_v51 = vmul.f32 %v7135_v41, %v4951_v47  ;;  %v5182_v52 = vmul.f32 %v7135_v41, %v4953_v34 }
 0x189   : > { %v1423_v3 = vmax.f32 %v1391_v42, 0.0  ;;  %v896_v31 = vmul.f32 %v4504_v39, %v847_v24  ;;  %v5186_v13 = vadd.f32 %v4897_v55, %v926_v49  ;;  %v1727_v53 = vmul.f32 %v7136_v15, %v4951_v47  ;;  %v5207_v49 = vld [vmem:[#allocation2 + $0x48] sm:$0xff] }
 0x18a   : > { %v3250_v32 = vrot.slane %v3153_v57, 2  ;;  %v1895_v59 = vrot.slane %v1796_v51, 1  ;;  %v6999_v54 = vrot.slane %v5182_v52, 1  ;;  %v2041_v48 = vmul.f32 %v7137_v63, %v4951_v47  ;;  %v855_v2 = vpop.permute.xlu0 %854 }
 0x18b   : > { %1652 = vst.msk [vmem:[#allocation2 + $0x109] sm:$0xff] %vm1559_vm1, %v1423_v3  ;;  %1580 = vst.msk [vmem:[%s4634_s23 + $0xa0] sm:$0xff] %vm1559_vm1, %v1423_v3  ;;  %v928_v30 = vadd.f32 %v896_v31, %v7138_v36  ;;  %v1457_v55 = vmul.f32 %v4504_v39, %v1451_v37  ;;  %v5201_v38 = vsel %vm1889_vm2, %v3004_v20, %v3006_v4 }
 0x18c   : > { %7139 = vst [vmem:[#allocation28_spill] sm:$0xff] %v5201_v38  ;;  %v5205_v42 = vmul.f32 %v7137_v63, %v4953_v34  ;;  %v1897_v47 = vsel %vm1889_vm2, %v1895_v59, %v6999_v54  ;;  %v2140_v57 = vrot.slane %v2041_v48, 2  ;;  %v2285_v24 = vmul.f32 %v7120_v61, %v5014_v12  ;;  %v7141_v48 = vld [vmem:[#allocation3_spill] sm:$0xff] }
 0x18d   : > { %v2354_v9 = vmul.f32 %v7116_v25, %v5014_v12  ;;  %v1459_v20 = vadd.f32 %v1457_v55, %v4916_v5  ;;  %v898_v4 = vmul.f32 %v4504_v39, %v855_v2  ;;  %v5221_v51 = vsel %vm2134_vm3, %v3248_v7, %v3250_v32  ;;  %v1463_v55 = vpop.permute.xlu1 %1462 }
 0x18e   : > { %7140 = vst [vmem:[#allocation20_spill] sm:$0xff] %v5221_v51  ;;  %v2004_v3 = vadd.f32 %v1897_v47, %v1727_v53  ;;  %v5224_v31 = vadd.f32 %v4922_v23, %v928_v30  ;;  %v7000_v37 = vrot.slane %v5205_v42, 2  ;;  %v5229_v59 = vmul.f32 %v7116_v25, %v5030_v18  ;;  %v863_v30 = vpop.permute.xlu0 %862 }
 0x18f   : > { %v2598_v5 = vmul.f32 %v7119_v45, %v5014_v12  ;;  %v930_v36 = vadd.f32 %v898_v4, %v7141_v48  ;;  %v2452_v7 = vrot.slane %v2354_v9, 1  ;;  %v5238_v53 = vmul.f32 %v7119_v45, %v5030_v18 }
 0x190   : > { %v2910_v23 = vmul.f32 %v7126_v44, %v5207_v49  ;;  %v1469_v32 = vmul.f32 %v4462_v26, %v1463_v55  ;;  %v2142_v2 = vsel %vm2134_vm3, %v2140_v57, %v7000_v37  ;;  %v900_v48 = vmul.f32 %v4504_v39, %v863_v30  ;;  %v7142_v37 = vld [vmem:[#allocation6_spill] sm:$0xff] }
 0x191   : > { %v2696_v4 = vrot.slane %v2598_v5, 2  ;;  %v2249_v9 = vadd.f32 %v2142_v2, %v2004_v3  ;;  %v7001_v54 = vrot.slane %v5238_v53, 2  ;;  %v2841_v51 = vmul.f32 %v7123_v6, %v5207_v49  ;;  %v1467_v5 = vpop.permute.xlu1 %1466 }
 0x192   : > { %v1471_v16 = vadd.f32 %v1469_v32, %v1459_v20  ;;  %v5252_v38 = vadd.f32 %v4947_v46, %v930_v36  ;;  %v5256_v55 = vmul.f32 %v7126_v44, %v5234_v1  ;;  %v3008_v57 = vrot.slane %v2910_v23, 1  ;;  %v7144_v20 = vld [vmem:[#allocation26_spill] sm:$0xff]  ;;  %v1455_v46 = vpop.permute.xlu0 %1454 }
 0x193   : > { %v932_v47 = vadd.f32 %v900_v48, %v7142_v37  ;;  %v2317_v14 = vadd.f32 %v2285_v24, %v2249_v9  ;;  %v7143_v3 = vrot.slane %v5229_v59, 1  ;;  %v3154_v2 = vmul.f32 %v5066_v0, %v5207_v49 }
 0x194   : > { %v1483_v32 = vadd.f32 %v7144_v20, %v1471_v16  ;;  %v2698_v36 = vsel %vm2134_vm3, %v2696_v4, %v7001_v54  ;;  %v7003_v23 = vrot.slane %v5256_v55, 1  ;;  %v5271_v37 = vmul.f32 %v5066_v0, %v5234_v1 }
 0x195   : > { %v2454_v30 = vsel %vm1889_vm2, %v2452_v7, %v7143_v3  ;;  %v1470_v24 = vmul.f32 %v4462_v26, %v1467_v5  ;;  %v1458_v7 = vmul.f32 %v4504_v39, %v1455_v46  ;;  %v3252_v9 = vrot.slane %v3154_v2, 2 }
 0x196   : > { %v2561_v48 = vadd.f32 %v2454_v30, %v2317_v14  ;;  %v1485_v3 = vmul.f32 %v4582_v40, %v1483_v32  ;;  %v5277_v16 = vadd.f32 %v4957_v33, %v932_v47  ;;  %v3010_v4 = vsel %vm1889_vm2, %v3008_v57, %v7003_v23  ;;  %v1511_v5 = vpop.permute.xlu0 %1510  ;;  %v1479_v33 = vpop.permute.xlu1 %1478  ;;  %v5354_v23 = vld [vmem:[%s6978_s5] ss:$0 sm:$0xff] }
 0x197   : > { %v7002_v20 = vrot.slane %v5271_v37, 2  ;;  %v1460_v54 = vadd.f32 %v1458_v7, %v5153_v62  ;;  %v1798_v26 = vmul.f32 %v7135_v41, %v5091_v17  ;;  %v2043_v39 = vmul.f32 %v7137_v63, %v5091_v17 }
 0x198   : > { %v2805_v8 = vadd.f32 %v2698_v36, %v2561_v48  ;;  %v1487_v14 = vadd.f32 %v4608_v60, %v1485_v3  ;;  %v1728_v57 = vmul.f32 %v7136_v15, %v4953_v34  ;;  %v2356_v62 = vmul.f32 %v7116_v25, %v5117_v50  ;;  %v5302_v36 = vld [vmem:[%s6976_s3 + $0x1] ss:$0 sm:$0xff] }
 0x199   : > { %v3254_v47 = vsel %vm2134_vm3, %v3252_v9, %v7002_v20  ;;  %v1472_v30 = vadd.f32 %v1470_v24, %v1460_v54  ;;  %v1482_v2 = vmul.f32 %v4562_v58, %v1479_v33  ;;  %v2286_v17 = vmul.f32 %v7120_v61, %v5030_v18  ;;  %v5307_v54 = vld [vmem:[#allocation2 + $0x58] sm:$0x3] }
 0x19a   : > { %v2873_v32 = vadd.f32 %v2841_v51, %v2805_v8  ;;  %v1489_v46 = vmax.f32 %v1487_v14, 0.0  ;;  %v5305_v7 = vmul.f32 %v5302_v36, %v1511_v5  ;;  %v1898_v34 = vrot.slane %v1798_v26, 1  ;;  %v1217_v24 = vpop.permute.xlu1 %1216  ;;  %v5314_v14 = vld [vmem:[%s6980_s7] ss:$0 sm:$0xff] }
 0x19b   : > { %v2143_v48 = vrot.slane %v2043_v39, 2  ;;  %v1484_v9 = vadd.f32 %v1482_v2, %v1472_v30  ;;  %v2455_v58 = vrot.slane %v2356_v62, 1  ;;  %v2600_v8 = vmul.f32 %v7119_v45, %v5117_v50  ;;  %v5330_v30 = vld [vmem:[%s6976_s3 + $0x3] ss:$0 sm:$0xff] }
 0x19c   : > { %v3117_v3 = vadd.f32 %v3010_v4, %v2873_v32  ;;  %v1551_v51 = vmul.f32 0.0, %v1489_v46  ;;  %v7145_v5 = vrot.slane %v5182_v52, 1  ;;  %v7146_v39 = vrot.slane %v5205_v42, 2  ;;  %v1253_v52 = vpop.permute.xlu0 %1252 }
 0x19d   : > { %v5324_v33 = vmul.f32 %v7123_v6, %v5234_v1  ;;  %v1486_v62 = vmul.f32 %v4582_v40, %v1484_v9  ;;  %v1284_v2 = vmul.f32 %v5330_v30, %v1217_v24  ;;  %v1293_v42 = vmul.f32 %v5330_v30, %v1253_v52 }
 0x19e   : > { %v1899_v26 = vsel %vm1889_vm2, %v7145_v5, %v1898_v34  ;;  %v2144_v4 = vsel %vm2134_vm3, %v7146_v39, %v2143_v48  ;;  %v3361_v32 = vadd.f32 %v3254_v47, %v3117_v3  ;;  %1629 = vst.msk [vmem:[#allocation2 + $0x1] sm:$0xff] %vm1559_vm1, %v1551_v51  ;;  %v5338_v34 = vld [vmem:[%s6981_s8] ss:$0 sm:$0xff]  ;;  %v2699_v40 = vrot.slane %v2600_v8, 2  ;;  %v1225_v5 = vpop.permute.xlu1 %1224 }
 0x19f   : > { %v2005_v46 = vadd.f32 %v1899_v26, %v1728_v57  ;;  %v2912_v48 = vmul.f32 %v7126_v44, %v5307_v54  ;;  %v3156_v9 = vmul.f32 %v5066_v0, %v5307_v54  ;;  %v1488_v24 = vadd.f32 %v4608_v60, %v1486_v62 }
 0x1a0   : > { %v1316_v47 = vadd.f32 %v1284_v2, %v5121_v29  ;;  %v3399_v57 = vmul.f32 %v5314_v14, %v3361_v32  ;;  %v1325_v51 = vadd.f32 %v1293_v42, %v4940_v22  ;;  %v7147_v26 = vrot.slane %v5229_v59, 1  ;;  %v5371_v42 = vld [vmem:[%s6979_s6] ss:$0 sm:$0xff] }
 0x1a1   : > { %v2250_v3 = vadd.f32 %v2144_v4, %v2005_v46  ;;  %v3011_v39 = vrot.slane %v2912_v48, 1  ;;  %v3255_v52 = vrot.slane %v3156_v9, 2  ;;  %v1490_v20 = vmax.f32 %v1488_v24, 0.0  ;;  %v1531_v4 = vpop.permute.xlu0 %1530 }
 0x1a2   : > { %v2456_v8 = vsel %vm1889_vm2, %v7147_v26, %v2455_v58  ;;  %v1354_v60 = vmul.f32 %v5354_v23, %v1316_v47  ;;  %v1286_v29 = vmul.f32 %v5330_v30, %v1225_v5  ;;  %v5359_v22 = vadd.f32 %v5338_v34, %v3399_v57 }
 0x1a3   : > { %v1363_v59 = vmul.f32 %v5354_v23, %v1325_v51  ;;  %v5363_v58 = vmul.f32 %v5330_v30, %v1531_v4  ;;  %v2318_v62 = vadd.f32 %v2286_v17, %v2250_v3  ;;  %v7150_v2 = vrot.slane %v5238_v53, 2  ;;  %v1233_v53 = vpop.permute.xlu1 %1232 }
 0x1a4   : > { %7148 = vst [vmem:[#allocation21_spill] sm:$0xff] %v5359_v22  ;;  %v1552_v46 = vmul.f32 0.0, %v1490_v20  ;;  %v1392_v48 = vadd.f32 %v5371_v42, %v1354_v60  ;;  %v1318_v9 = vadd.f32 %v1286_v29, %v5156_v10  ;;  %v7151_v24 = vrot.slane %v5256_v55, 1 }
 0x1a5   : > { %7149 = vst [vmem:[#allocation22_spill] sm:$0xff] %v5363_v58  ;;  %v2700_v32 = vsel %vm2134_vm3, %v7150_v2, %v2699_v40  ;;  %v1401_v17 = vadd.f32 %v5371_v42, %v1363_v59  ;;  %v2562_v20 = vadd.f32 %v2456_v8, %v2318_v62  ;;  %v7152_v57 = vrot.slane %v5271_v37, 2  ;;  %v1667_v5 = vld [vmem:[#allocation2] sm:$0xff] }
 0x1a6   : > { %v3012_v47 = vsel %vm1889_vm2, %v7151_v24, %v3011_v39  ;;  %1630 = vst.msk [vmem:[#allocation2 + $0x9] sm:$0xff] %vm1559_vm1, %v1552_v46  ;;  %v1424_v51 = vmax.f32 %v1392_v48, 0.0  ;;  %v1356_v10 = vmul.f32 %v5354_v23, %v1318_v9  ;;  %v1288_v55 = vmul.f32 %v5330_v30, %v1233_v53 }
 0x1a7   : > { %v3256_v3 = vsel %vm2134_vm3, %v7152_v57, %v3255_v52  ;;  %v1799_v26 = vmul.f32 %v7135_v41, %v5014_v12  ;;  %v1433_v39 = vmax.f32 %v1401_v17, 0.0  ;;  %v1793_v60 = vmul.f32 %v7135_v41, %v1667_v5  ;;  %v1241_v62 = vpop.permute.xlu1 %1240 }
 0x1a8   : > { %v2038_v8 = vmul.f32 %v7137_v63, %v1667_v5  ;;  %v1729_v37 = vmul.f32 %v7136_v15, %v5014_v12  ;;  %1653 = vst.msk [vmem:[#allocation2 + $0x111] sm:$0xff] %vm1559_vm1, %v1424_v51  ;;  %1581 = vst.msk [vmem:[%s4634_s23 + $0xa8] sm:$0xff] %vm1559_vm1, %v1424_v51  ;;  %v1394_v52 = vadd.f32 %v5371_v42, %v1356_v10 }
 0x1a9   : > { %v1320_v29 = vadd.f32 %v1288_v55, %v5186_v13  ;;  %v2806_v4 = vadd.f32 %v2700_v32, %v2562_v20  ;;  %v5399_v59 = vmul.f32 %v7135_v41, %v5030_v18  ;;  %1662 = vst.msk [vmem:[#allocation2 + $0x181] sm:$0xff] %vm1559_vm1, %v1433_v39  ;;  %1590 = vst.msk [vmem:[%s4634_s23 + $0xf0] sm:$0xff] %vm1559_vm1, %v1433_v39  ;;  %v1890_v46 = vrot.slane %v1793_v60, 1 }
 0x1aa   : > { %v1725_v2 = vmul.f32 %v7136_v15, %v1667_v5  ;;  %v1900_v48 = vrot.slane %v1799_v26, 1  ;;  %v2044_v9 = vmul.f32 %v7137_v63, %v5014_v12  ;;  %v1426_v24 = vmax.f32 %v1394_v52, 0.0 }
 0x1ab   : > { %7153 = vst [vmem:[#allocation23_spill] sm:$0xff] %v5399_v59  ;;  %v1358_v13 = vmul.f32 %v5354_v23, %v1320_v29  ;;  %v1290_v32 = vmul.f32 %v5330_v30, %v1241_v62  ;;  %v2874_v17 = vadd.f32 %v5324_v33, %v2806_v4  ;;  %v2135_v53 = vrot.slane %v2038_v8, 2  ;;  %v1249_v5 = vpop.permute.xlu1 %1248 }
 0x1ac   : > { %v7004_v20 = vrot.slane %v5399_v59, 1  ;;  %v5413_v57 = vmul.f32 %v7137_v63, %v5030_v18  ;;  %v2145_v51 = vrot.slane %v2044_v9, 2  ;;  %1655 = vst.msk [vmem:[#allocation2 + $0x129] sm:$0xff] %vm1559_vm1, %v1426_v24  ;;  %1583 = vst.msk [vmem:[%s4634_s23 + $0xb8] sm:$0xff] %vm1559_vm1, %v1426_v24  ;;  %v5422_v33 = vmul.f32 %v7116_v25, %v5207_v49 }
 0x1ad   : > { %v1396_v12 = vadd.f32 %v5371_v42, %v1358_v13  ;;  %v1322_v10 = vadd.f32 %v1290_v32, %v5224_v31  ;;  %v3118_v55 = vadd.f32 %v3012_v47, %v2874_v17  ;;  %v1668_v26 = vld [vmem:[#allocation2 + $0x8] sm:$0xff]  ;;  %v1669_v39 = vld [vmem:[#allocation2 + $0x10] sm:$0x3]  ;;  %v5430_v52 = vmul.f32 %v7116_v25, %v5234_v1 }
 0x1ae   : > { %v1902_v60 = vsel %vm1889_vm2, %v1900_v48, %v7004_v20  ;;  %v5434_v31 = vmul.f32 %v7119_v45, %v5207_v49  ;;  %v1292_v4 = vmul.f32 %v5330_v30, %v1249_v5  ;;  %v1794_v62 = vmul.f32 %v7135_v41, %v1668_v26 }
 0x1af   : > { %v1428_v47 = vmax.f32 %v1396_v12, 0.0  ;;  %v1360_v29 = vmul.f32 %v5354_v23, %v1322_v10  ;;  %v2039_v9 = vmul.f32 %v7137_v63, %v1668_v26  ;;  %v1726_v48 = vmul.f32 %v7136_v15, %v1668_v26  ;;  %v1257_v5 = vpop.permute.xlu1 %1256 }
 0x1b0   : > { %v1795_v24 = vmul.f32 %v7135_v41, %v1669_v39  ;;  %v2040_v13 = vmul.f32 %v7137_v63, %v1669_v39  ;;  %v1324_v17 = vadd.f32 %v1292_v4, %v5252_v38  ;;  %v1891_v12 = vrot.slane %v1794_v62, 1 }
 0x1b1   : > { %1657 = vst.msk [vmem:[#allocation2 + $0x141] sm:$0xff] %vm1559_vm1, %v1428_v47  ;;  %1585 = vst.msk [vmem:[%s4634_s23 + $0xc8] sm:$0xff] %vm1559_vm1, %v1428_v47  ;;  %v1398_v32 = vadd.f32 %v5371_v42, %v1360_v29  ;;  %v3362_v10 = vadd.f32 %v3256_v3, %v3118_v55  ;;  %v2136_v40 = vrot.slane %v2039_v9, 2  ;;  %v2006_v26 = vadd.f32 %v1902_v60, %v1729_v37 }
 0x1b2   : > { %v1893_v20 = vrot.slane %v1795_v24, 1  ;;  %v2138_v8 = vrot.slane %v2040_v13, 2  ;;  %v1362_v58 = vmul.f32 %v5354_v23, %v1324_v17  ;;  %v1294_v39 = vmul.f32 %v5330_v30, %v1257_v5  ;;  %v5482_v17 = vld [vmem:[#allocation2 + $0x68] sm:$0xff] }
 0x1b3   : > { %v1430_v22 = vmax.f32 %v1398_v32, 0.0  ;;  %v1892_v59 = vsel %vm1889_vm2, %v1890_v46, %v1891_v12  ;;  %v2137_v29 = vsel %vm2134_vm3, %v2135_v53, %v2136_v40  ;;  %v3400_v60 = vmul.f32 %v5314_v14, %v3362_v10 }
 0x1b4   : > { %v2002_v47 = vadd.f32 %v1892_v59, %v1725_v2  ;;  %v1894_v38 = vsel %vm1889_vm2, %v1891_v12, %v1893_v20  ;;  %v2139_v4 = vsel %vm2134_vm3, %v2136_v40, %v2138_v8  ;;  %v1400_v3 = vadd.f32 %v5371_v42, %v1362_v58  ;;  %v1501_v20 = vpop.permute.xlu1 %1500  ;;  %v3879_v8 = vld [vmem:[%s6976_s3] ss:$0 sm:$0xff] }
 0x1b5   : > { %1659 = vst.msk [vmem:[#allocation2 + $0x159] sm:$0xff] %vm1559_vm1, %v1430_v22  ;;  %1587 = vst.msk [vmem:[%s4634_s23 + $0xd8] sm:$0xff] %vm1559_vm1, %v1430_v22  ;;  %v1326_v37 = vadd.f32 %v1294_v39, %v5277_v16  ;;  %v2003_v55 = vadd.f32 %v1894_v38, %v1726_v48  ;;  %v7154_v59 = vrot.slane %v5413_v57, 2  ;;  %v2457_v46 = vrot.slane %v5422_v33, 1 }
 0x1b6   : > { %v2247_v62 = vadd.f32 %v2137_v29, %v2002_v47  ;;  %v2458_v40 = vrot.slane %v5430_v52, 1  ;;  %v1432_v53 = vmax.f32 %v1400_v3, 0.0  ;;  %v5467_v16 = vadd.f32 %v5338_v34, %v3400_v60 }
 0x1b7   : > { %v2147_v2 = vsel %vm2134_vm3, %v2145_v51, %v7154_v59  ;;  %v1364_v22 = vmul.f32 %v5354_v23, %v1326_v37  ;;  %v2248_v58 = vadd.f32 %v2139_v4, %v2003_v55  ;;  %v1504_v9 = vmul.f32 %v3879_v8, %v1501_v20  ;;  %v5473_v51 = vld [vmem:[#allocation2 + $0x60] sm:$0xff]  ;;  %v7155_v20 = vld [vmem:[#allocation18_spill] sm:$0xff]  ;;  %v7156_v8 = vld [vmem:[#allocation19_spill] sm:$0xff] }
 0x1b8   : > { %v2315_v48 = vadd.f32 %v5006_v27, %v2247_v62  ;;  %v2251_v33 = vadd.f32 %v2147_v2, %v2006_v26  ;;  %v2287_v24 = vmul.f32 %v7120_v61, %v5207_v49  ;;  %1661 = vst.msk [vmem:[#allocation2 + $0x171] sm:$0xff] %vm1559_vm1, %v1432_v53  ;;  %1589 = vst.msk [vmem:[%s4634_s23 + $0xe8] sm:$0xff] %vm1559_vm1, %v1432_v53  ;;  %v3470_v5 = vmax.f32 %v5467_v16, 0.0  ;;  %v1507_v4 = vpop.permute.xlu1 %1506 }
 0x1b9   : > { %v1402_v13 = vadd.f32 %v5371_v42, %v1364_v22  ;;  %v2316_v32 = vadd.f32 %v5125_v35, %v2248_v58  ;;  %v2459_v27 = vsel %vm1889_vm2, %v2457_v46, %v2458_v40  ;;  %v5489_v12 = vmul.f32 %v7119_v45, %v5234_v1 }
 0x1ba   : > { %v2559_v10 = vadd.f32 %v5019_v43, %v2315_v48  ;;  %v2319_v26 = vadd.f32 %v2287_v24, %v2251_v33  ;;  %v2701_v39 = vrot.slane %v5434_v31, 2  ;;  %v2843_v38 = vmul.f32 %v7123_v6, %v5473_v51 }
 0x1bb   : > { %v1434_v47 = vmax.f32 %v1402_v13, 0.0  ;;  %v2560_v35 = vadd.f32 %v5171_v19, %v2316_v32  ;;  %v2702_v29 = vrot.slane %v5489_v12, 2  ;;  %v2913_v43 = vmul.f32 %v7126_v44, %v5473_v51  ;;  %v7157_v13 = vld [vmem:[#allocation28_spill] sm:$0xff] }
 0x1bc   : > { %v2803_v3 = vadd.f32 %v5054_v21, %v2559_v10  ;;  %v2563_v37 = vadd.f32 %v2459_v27, %v2319_v26  ;;  %v5503_v55 = vmul.f32 %v7126_v44, %v5482_v17  ;;  %v1513_v19 = vmul.f32 %v5302_v36, %v1507_v4  ;;  %v1519_v24 = vpop.permute.xlu1 %1518  ;;  %v3880_v27 = vld [vmem:[%s6976_s3 + $0x2] ss:$0 sm:$0xff] }
 0x1bd   : > { %1663 = vst.msk [vmem:[#allocation2 + $0x189] sm:$0xff] %vm1559_vm1, %v1434_v47  ;;  %1591 = vst.msk [vmem:[%s4634_s23 + $0xf8] sm:$0xff] %vm1559_vm1, %v1434_v47  ;;  %v2804_v31 = vadd.f32 %v5176_v28, %v2560_v35  ;;  %v2703_v21 = vsel %vm2134_vm3, %v2701_v39, %v2702_v29  ;;  %v3157_v60 = vmul.f32 %v5066_v0, %v5473_v51  ;;  %v3013_v2 = vrot.slane %v2913_v43, 1  ;;  %v7158_v26 = vld [vmem:[#allocation25_spill] sm:$0xff] }
 0x1be   : > { %v2871_v62 = vadd.f32 %v5036_v11, %v2803_v3  ;;  %v2807_v59 = vadd.f32 %v2703_v21, %v2563_v37  ;;  %v3014_v46 = vrot.slane %v5503_v55, 1  ;;  %v1516_v53 = vadd.f32 %v5305_v7, %v1504_v9 }
 0x1bf   : > { %v2872_v22 = vadd.f32 %v5150_v56, %v2804_v31  ;;  %v5521_v28 = vmul.f32 %v5066_v0, %v5482_v17  ;;  %v3257_v36 = vrot.slane %v3157_v60, 2  ;;  %v1515_v58 = vadd.f32 %v1513_v19, %v7155_v20  ;;  %v7162_v20 = vld [vmem:[#allocation22_spill] sm:$0xff] }
 0x1c0   : > { %v3115_v48 = vadd.f32 %v7156_v8, %v2871_v62  ;;  %v2875_v33 = vadd.f32 %v2843_v38, %v2807_v59  ;;  %v3015_v11 = vsel %vm1889_vm2, %v3013_v2, %v3014_v46  ;;  %v1801_v56 = vmul.f32 %v7135_v41, %v5117_v50  ;;  %v7159_v38 = vld [vmem:[#allocation20_spill] sm:$0xff]  ;;  %v1523_v60 = vpop.permute.xlu1 %1522  ;;  %v7160_v59 = vld [vmem:[#allocation23_spill] sm:$0xff] }
 0x1c1   : > { %v3116_v32 = vadd.f32 %v7157_v13, %v2872_v22  ;;  %v3258_v7 = vrot.slane %v5521_v28, 2  ;;  %v2046_v9 = vmul.f32 %v7137_v63, %v5117_v50  ;;  %v1525_v10 = vmul.f32 %v3880_v27, %v1519_v24  ;;  %v5559_v24 = vld [vmem:[#allocation2 + $0x70] sm:$0x3] }
 0x1c2   : > { %v3359_v39 = vadd.f32 %v7158_v26, %v3115_v48  ;;  %v3119_v47 = vadd.f32 %v3015_v11, %v2875_v33  ;;  %v1730_v35 = vmul.f32 %v7136_v15, %v5030_v18  ;;  %v1903_v37 = vrot.slane %v1801_v56, 1 }
 0x1c3   : > { %v3360_v4 = vadd.f32 %v7159_v38, %v3116_v32  ;;  %v3259_v3 = vsel %vm2134_vm3, %v3257_v36, %v3258_v7  ;;  %v2148_v43 = vrot.slane %v2046_v9, 2  ;;  %v1527_v50 = vadd.f32 %v1525_v10, %v1515_v58 }
 0x1c4   : > { %v3397_v19 = vmul.f32 %v5314_v14, %v3359_v39  ;;  %v3363_v31 = vadd.f32 %v3259_v3, %v3119_v47  ;;  %v2359_v21 = vmul.f32 %v7116_v25, %v5307_v54  ;;  %v7161_v18 = vrot.slane %v7160_v59, 1 }
 0x1c5   : > { %v3398_v62 = vmul.f32 %v5314_v14, %v3360_v4  ;;  %v2288_v22 = vmul.f32 %v7120_v61, %v5234_v1  ;;  %v2603_v36 = vmul.f32 %v7119_v45, %v5307_v54  ;;  %v1539_v58 = vadd.f32 %v7162_v20, %v1527_v50 }
 0x1c6   : > { %v1904_v2 = vsel %vm1889_vm2, %v7161_v18, %v1903_v37  ;;  %v1526_v8 = vmul.f32 %v3880_v27, %v1523_v60  ;;  %v3435_v48 = vadd.f32 %v5338_v34, %v3397_v19  ;;  %v3401_v33 = vmul.f32 %v5314_v14, %v3363_v31  ;;  %v1535_v37 = vpop.permute.xlu1 %1534 }
 0x1c7   : > { %v3436_v11 = vadd.f32 %v5338_v34, %v3398_v62  ;;  %v2007_v13 = vadd.f32 %v1904_v2, %v1730_v35  ;;  %v2460_v32 = vrot.slane %v2359_v21, 1  ;;  %v2704_v56 = vrot.slane %v2603_v36, 2  ;;  %v7164_v2 = vld [vmem:[#allocation21_spill] sm:$0xff] }
 0x1c8   : > { %v1541_v9 = vmul.f32 %v5354_v23, %v1539_v58  ;;  %v3467_v10 = vmax.f32 %v3435_v48, 0.0  ;;  %v3439_v26 = vadd.f32 %v5338_v34, %v3401_v33  ;;  %v7163_v39 = vrot.slane %v5413_v57, 2 }
 0x1c9   : > { %v1528_v47 = vadd.f32 %v1526_v8, %v1516_v53  ;;  %v3468_v38 = vmax.f32 %v3436_v11, 0.0  ;;  %v2461_v3 = vsel %vm1889_vm2, %v2458_v40, %v2460_v32  ;;  %v2705_v57 = vsel %vm2134_vm3, %v2702_v29, %v2704_v56  ;;  %v5617_v56 = vld [vmem:[#allocation2 + $0x78] sm:$0xff] }
 0x1ca   : > { %v2149_v27 = vsel %vm2134_vm3, %v7163_v39, %v2148_v43  ;;  %v1543_v35 = vadd.f32 %v5371_v42, %v1541_v9  ;;  %3531 = vrot.lane.b32.xlu1 %v3467_v10, %s3916_s24  ;;  %v3471_v50 = vmax.f32 %v3439_v26, 0.0  ;;  %v2915_v53 = vmul.f32 %v7126_v44, %v5559_v24  ;;  %v5619_v9 = vld [vmem:[#allocation2 + $0x80] sm:$0xff] }
 0x1cb   : > { %v2252_v4 = vadd.f32 %v2149_v27, %v2007_v13  ;;  %3533 = vrot.lane.b32.xlu0 %v3468_v38, %s3916_s24  ;;  %v1538_v52 = vmul.f32 %v5330_v30, %v1535_v37  ;;  %v2844_v40 = vmul.f32 %v7123_v6, %v5482_v17  ;;  %v3159_v19 = vmul.f32 %v5066_v0, %v5559_v24 }
 0x1cc   : > { %v1545_v31 = vmax.f32 %v1543_v35, 0.0  ;;  %v3016_v21 = vrot.slane %v2915_v53, 1  ;;  %v1802_v12 = vmul.f32 %v7135_v41, %v5207_v49  ;;  %v5586_v29 = vmul.f32 %v7135_v41, %v5234_v1 }
 0x1cd   : > { %v2320_v43 = vadd.f32 %v2288_v22, %v2252_v4  ;;  %v1540_v60 = vadd.f32 %v1538_v52, %v1528_v47  ;;  %v3260_v59 = vrot.slane %v3159_v19, 2  ;;  %v2047_v30 = vmul.f32 %v7137_v63, %v5207_v49 }
 0x1ce   : > { %v1557_v18 = vmul.f32 0.0, %v1545_v31  ;;  %v7165_v22 = vmax.f32 %v7164_v2, 0.0  ;;  %v1731_v36 = vmul.f32 %v7136_v15, %v5207_v49  ;;  %v1905_v20 = vrot.slane %v1802_v12, 1 }
 0x1cf   : > { %v2564_v62 = vadd.f32 %v2461_v3, %v2320_v43  ;;  %v1906_v58 = vrot.slane %v5586_v29, 1  ;;  %v1542_v8 = vmul.f32 %v5354_v23, %v1540_v60  ;;  %3537 = vrot.lane.b32.xlu0 %v3470_v5, %s3916_s24  ;;  %v3017_v33 = vsel %vm1889_vm2, %v3014_v46, %v3016_v21 }
 0x1d0   : > { %3535 = vrot.lane.b32.xlu1 %v7165_v22, %s3916_s24  ;;  %v5605_v11 = vmul.f32 %v7137_v63, %v5234_v1  ;;  %1665 = vst.msk [vmem:[#allocation2 + $0x199] sm:$0xff] %vm1559_vm1, %v1557_v18  ;;  %v3261_v49 = vsel %vm2134_vm3, %v3258_v7, %v3260_v59  ;;  %v2150_v13 = vrot.slane %v2047_v30, 2  ;;  %v2360_v16 = vmul.f32 %v7116_v25, %v5473_v51 }
 0x1d1   : > { %v2808_v48 = vadd.f32 %v2705_v57, %v2564_v62  ;;  %v1907_v23 = vsel %vm1889_vm2, %v1905_v20, %v1906_v58  ;;  %v1544_v5 = vadd.f32 %v5371_v42, %v1542_v8  ;;  %v2289_v28 = vmul.f32 %v7120_v61, %v5473_v51 }
 0x1d2   : > { %v2008_v46 = vadd.f32 %v1907_v23, %v1731_v36  ;;  %v2151_v32 = vrot.slane %v5605_v11, 2  ;;  %v2361_v7 = vmul.f32 %v7116_v25, %v5482_v17  ;;  %v2604_v10 = vmul.f32 %v7119_v45, %v5473_v51 }
 0x1d3   : > { %v2876_v55 = vadd.f32 %v2844_v40, %v2808_v48  ;;  %v2605_v42 = vmul.f32 %v7119_v45, %v5482_v17  ;;  %v1546_v26 = vmax.f32 %v1544_v5, 0.0  ;;  %v2462_v47 = vrot.slane %v2360_v16, 1 }
 0x1d4   : > { %3539 = vrot.lane.b32.xlu1 %v3471_v50, %s3916_s24  ;;  %v2152_v27 = vsel %vm2134_vm3, %v2150_v13, %v2151_v32  ;;  %v2463_v4 = vrot.slane %v2361_v7, 1  ;;  %v2706_v3 = vrot.slane %v2604_v10, 2  ;;  %v2916_v57 = vmul.f32 %v7126_v44, %v5617_v56 }
 0x1d5   : > { %v3120_v39 = vadd.f32 %v3017_v33, %v2876_v55  ;;  %v2253_v38 = vadd.f32 %v2152_v27, %v2008_v46  ;;  %v2707_v35 = vrot.slane %v2605_v42, 2  ;;  %v1558_v37 = vmul.f32 0.0, %v1546_v26  ;;  %v5657_v33 = vld [vmem:[#allocation2 + $0x88] sm:$0x3] }
 0x1d6   : > { %v5634_v53 = vmul.f32 %v7126_v44, %v5619_v9  ;;  %v3160_v43 = vmul.f32 %v5066_v0, %v5617_v56  ;;  %v2464_v19 = vsel %vm1889_vm2, %v2462_v47, %v2463_v4  ;;  %v5644_v21 = vmul.f32 %v5066_v0, %v5619_v9 }
 0x1d7   : > { %v3364_v50 = vadd.f32 %v3261_v49, %v3120_v39  ;;  %v2321_v52 = vadd.f32 %v2289_v28, %v2253_v38  ;;  %1666 = vst.msk [vmem:[#allocation2 + $0x1a1] sm:$0xff] %vm1559_vm1, %v1558_v37  ;;  %v2708_v31 = vsel %vm2134_vm3, %v2706_v3, %v2707_v35  ;;  %v3018_v29 = vrot.slane %v2916_v57, 1 }
 0x1d8   : > { %v3019_v60 = vrot.slane %v5634_v53, 1  ;;  %v1804_v62 = vmul.f32 %v7135_v41, %v5307_v54  ;;  %v3262_v30 = vrot.slane %v3160_v43, 2  ;;  %v3263_v18 = vrot.slane %v5644_v21, 2 }
 0x1d9   : > { %v3402_v40 = vmul.f32 %v5314_v14, %v3364_v50  ;;  %v2565_v12 = vadd.f32 %v2464_v19, %v2321_v52  ;;  %v2049_v2 = vmul.f32 %v7137_v63, %v5307_v54  ;;  %v2845_v36 = vmul.f32 %v7123_v6, %v5617_v56 }
 0x1da   : > { %v1908_v20 = vrot.slane %v1804_v62, 1  ;;  %v2362_v8 = vmul.f32 %v7116_v25, %v5559_v24  ;;  %v1732_v11 = vmul.f32 %v7136_v15, %v5234_v1  ;;  %v2606_v23 = vmul.f32 %v7119_v45, %v5559_v24  ;;  %v5702_v62 = vld [vmem:[#allocation2 + $0x90] sm:$0xff] }
 0x1db   : > { %v3440_v59 = vadd.f32 %v5338_v34, %v3402_v40  ;;  %v2809_v22 = vadd.f32 %v2708_v31, %v2565_v12  ;;  %v2153_v49 = vrot.slane %v2049_v2, 2  ;;  %v3020_v54 = vsel %vm1889_vm2, %v3018_v29, %v3019_v60 }
 0x1dc   : > { %v1909_v16 = vsel %vm1889_vm2, %v1906_v58, %v1908_v20  ;;  %v2465_v5 = vrot.slane %v2362_v8, 1  ;;  %v3264_v55 = vsel %vm2134_vm3, %v3262_v30, %v3263_v18  ;;  %v2290_v1 = vmul.f32 %v7120_v61, %v5482_v17 }
 0x1dd   : > { %v3472_v48 = vmax.f32 %v3440_v59, 0.0  ;;  %v2877_v13 = vadd.f32 %v2845_v36, %v2809_v22  ;;  %v2009_v46 = vadd.f32 %v1909_v16, %v1732_v11  ;;  %v2709_v28 = vrot.slane %v2606_v23, 2  ;;  %v5709_v36 = vld [vmem:[#allocation2 + $0x98] sm:$0xff] }
 0x1de   : > { %v2154_v10 = vsel %vm2134_vm3, %v2151_v32, %v2153_v49  ;;  %v2846_v42 = vmul.f32 %v7123_v6, %v5619_v9  ;;  %v2918_v58 = vmul.f32 %v7126_v44, %v5657_v33  ;;  %v2466_v39 = vsel %vm1889_vm2, %v2463_v4, %v2465_v5 }
 0x1df   : > { %3541 = vrot.lane.b32.xlu0 %v3472_v48, %s3916_s24  ;;  %v3121_v7 = vadd.f32 %v3020_v54, %v2877_v13  ;;  %v2254_v26 = vadd.f32 %v2154_v10, %v2009_v46  ;;  %v3162_v27 = vmul.f32 %v5066_v0, %v5657_v33  ;;  %v1805_v47 = vmul.f32 %v7135_v41, %v5473_v51 }
 0x1e0   : > { %v1733_v3 = vmul.f32 %v7136_v15, %v5473_v51  ;;  %v5687_v32 = vmul.f32 %v7135_v41, %v5482_v17  ;;  %v2050_v37 = vmul.f32 %v7137_v63, %v5473_v51  ;;  %v2710_v4 = vsel %vm2134_vm3, %v2707_v35, %v2709_v28 }
 0x1e1   : > { %v3365_v38 = vadd.f32 %v3264_v55, %v3121_v7  ;;  %v2322_v50 = vadd.f32 %v2290_v1, %v2254_v26  ;;  %v1910_v57 = vrot.slane %v1805_v47, 1  ;;  %v5694_v0 = vmul.f32 %v7137_v63, %v5482_v17  ;;  %v5729_v7 = vld [vmem:[%s6977_s4 + $0x8] ss:$0 sm:$0xff] }
 0x1e2   : > { %v3021_v43 = vrot.slane %v2918_v58, 1  ;;  %v1911_v40 = vrot.slane %v5687_v32, 1  ;;  %v2155_v19 = vrot.slane %v2050_v37, 2  ;;  %v3265_v12 = vrot.slane %v3162_v27, 2 }
 0x1e3   : > { %v3403_v52 = vmul.f32 %v5314_v14, %v3365_v38  ;;  %v2566_v31 = vadd.f32 %v2466_v39, %v2322_v50  ;;  %v2156_v29 = vrot.slane %v5694_v0, 2  ;;  %v2363_v51 = vmul.f32 %v7116_v25, %v5617_v56  ;;  %v5748_v50 = vld [vmem:[#allocation2 + $0xa0] sm:$0x3] }
 0x1e4   : > { %v1912_v59 = vsel %vm1889_vm2, %v1910_v57, %v1911_v40  ;;  %v2364_v30 = vmul.f32 %v7116_v25, %v5619_v9  ;;  %v2607_v2 = vmul.f32 %v7119_v45, %v5617_v56  ;;  %v2291_v48 = vmul.f32 %v7120_v61, %v5617_v56 }
 0x1e5   : > { %v3441_v35 = vadd.f32 %v5338_v34, %v3403_v52  ;;  %v2810_v22 = vadd.f32 %v2710_v4, %v2566_v31  ;;  %v2010_v20 = vadd.f32 %v1912_v59, %v1733_v3  ;;  %v2157_v8 = vsel %vm2134_vm3, %v2155_v19, %v2156_v29 }
 0x1e6   : > { %v2467_v49 = vrot.slane %v2363_v51, 1  ;;  %v2468_v23 = vrot.slane %v2364_v30, 1  ;;  %v2608_v13 = vmul.f32 %v7119_v45, %v5619_v9  ;;  %v2711_v5 = vrot.slane %v2607_v2, 2 }
 0x1e7   : > { %v3473_v11 = vmax.f32 %v3441_v35, 0.0  ;;  %v2878_v54 = vadd.f32 %v2846_v42, %v2810_v22  ;;  %v2255_v16 = vadd.f32 %v2157_v8, %v2010_v20  ;;  %v2919_v55 = vmul.f32 %v7126_v44, %v5702_v62 }
 0x1e8   : > { %v3022_v46 = vsel %vm1889_vm2, %v3019_v60, %v3021_v43  ;;  %v2712_v1 = vrot.slane %v2608_v13, 2  ;;  %v5724_v28 = vmul.f32 %v7126_v44, %v5709_v36  ;;  %v3163_v10 = vmul.f32 %v5729_v7, %v5702_v62 }
 0x1e9   : > { %3543 = vrot.lane.b32.xlu1 %v3473_v11, %s3916_s24  ;;  %v3122_v42 = vadd.f32 %v3022_v46, %v2878_v54  ;;  %v3266_v53 = vsel %vm2134_vm3, %v3263_v18, %v3265_v12  ;;  %v2323_v58 = vadd.f32 %v2291_v48, %v2255_v16  ;;  %v5738_v60 = vmul.f32 %v5729_v7, %v5709_v36 }
 0x1ea   : > { %v2469_v26 = vsel %vm1889_vm2, %v2467_v49, %v2468_v23  ;;  %v2847_v39 = vmul.f32 %v7123_v6, %v5702_v62  ;;  %v3023_v27 = vrot.slane %v2919_v55, 1  ;;  %v3024_v47 = vrot.slane %v5724_v28, 1 }
 0x1eb   : > { %v3366_v38 = vadd.f32 %v3266_v53, %v3122_v42  ;;  %v2567_v3 = vadd.f32 %v2469_v26, %v2323_v58  ;;  %v2713_v32 = vsel %vm2134_vm3, %v2711_v5, %v2712_v1  ;;  %v1807_v21 = vmul.f32 %v7135_v41, %v5559_v24 }
 0x1ec   : > { %v3267_v18 = vrot.slane %v3163_v10, 2  ;;  %v3268_v37 = vrot.slane %v5738_v60, 2  ;;  %v2052_v4 = vmul.f32 %v7137_v63, %v5559_v24  ;;  %v2365_v57 = vmul.f32 %v7116_v25, %v5657_v33 }
 0x1ed   : > { %v3404_v0 = vmul.f32 %v5314_v14, %v3366_v38  ;;  %v2811_v52 = vadd.f32 %v2713_v32, %v2567_v3  ;;  %v1734_v43 = vmul.f32 %v7136_v15, %v5482_v17  ;;  %v1913_v19 = vrot.slane %v1807_v21, 1 }
 0x1ee   : > { %v3025_v31 = vsel %vm1889_vm2, %v3023_v27, %v3024_v47  ;;  %v2158_v12 = vrot.slane %v2052_v4, 2  ;;  %v2470_v51 = vrot.slane %v2365_v57, 1  ;;  %v2609_v35 = vmul.f32 %v7119_v45, %v5657_v33  ;;  %v5799_v4 = vld [vmem:[#allocation2 + $0xa8] sm:$0xff] }
 0x1ef   : > { %v3442_v24 = vadd.f32 %v5338_v34, %v3404_v0  ;;  %v2879_v59 = vadd.f32 %v2847_v39, %v2811_v52  ;;  %v1914_v30 = vsel %vm1889_vm2, %v1911_v40, %v1913_v19  ;;  %v2921_v2 = vmul.f32 %v7126_v44, %v5748_v50 }
 0x1f0   : > { %v3269_v17 = vsel %vm2134_vm3, %v3267_v18, %v3268_v37  ;;  %v2011_v22 = vadd.f32 %v1914_v30, %v1734_v43  ;;  %v2292_v20 = vmul.f32 %v7120_v61, %v5619_v9  ;;  %v2714_v8 = vrot.slane %v2609_v35, 2  ;;  %v5806_v43 = vld [vmem:[#allocation2 + $0xb0] sm:$0xff] }
 0x1f1   : > { %v3474_v48 = vmax.f32 %v3442_v24, 0.0  ;;  %v3123_v11 = vadd.f32 %v3025_v31, %v2879_v59  ;;  %v2159_v49 = vsel %vm2134_vm3, %v2156_v29, %v2158_v12  ;;  %v3165_v13 = vmul.f32 %v5729_v7, %v5748_v50 }
 0x1f2   : > { %v2256_v40 = vadd.f32 %v2159_v49, %v2011_v22  ;;  %v2471_v54 = vsel %vm1889_vm2, %v2468_v23, %v2470_v51  ;;  %v2848_v16 = vmul.f32 %v7123_v6, %v5709_v36  ;;  %v1808_v5 = vmul.f32 %v7135_v41, %v5617_v56 }
 0x1f3   : > { %3545 = vrot.lane.b32.xlu0 %v3474_v48, %s3916_s24  ;;  %v3367_v55 = vadd.f32 %v3269_v17, %v3123_v11  ;;  %v2715_v46 = vsel %vm2134_vm3, %v2712_v1, %v2714_v8  ;;  %v3026_v10 = vrot.slane %v2921_v2, 1  ;;  %v5783_v29 = vmul.f32 %v7135_v41, %v5619_v9 }
 0x1f4   : > { %v2324_v42 = vadd.f32 %v2292_v20, %v2256_v40  ;;  %v1915_v53 = vrot.slane %v1808_v5, 1  ;;  %v2053_v23 = vmul.f32 %v7137_v63, %v5617_v56  ;;  %v5789_v58 = vmul.f32 %v7137_v63, %v5619_v9 }
 0x1f5   : > { %v3405_v26 = vmul.f32 %v5314_v14, %v3367_v55  ;;  %v3270_v39 = vrot.slane %v3165_v13, 2  ;;  %v1735_v1 = vmul.f32 %v7136_v15, %v5617_v56  ;;  %v1916_v27 = vrot.slane %v5783_v29, 1 }
 0x1f6   : > { %v2568_v38 = vadd.f32 %v2471_v54, %v2324_v42  ;;  %v2160_v3 = vrot.slane %v2053_v23, 2  ;;  %v2161_v32 = vrot.slane %v5789_v58, 2  ;;  %v2366_v21 = vmul.f32 %v7116_v25, %v5702_v62  ;;  %v5840_v42 = vld [vmem:[#allocation2 + $0xb8] sm:$0x3] }
 0x1f7   : > { %v3443_v18 = vadd.f32 %v5338_v34, %v3405_v26  ;;  %v1917_v57 = vsel %vm1889_vm2, %v1915_v53, %v1916_v27  ;;  %v2367_v0 = vmul.f32 %v7116_v25, %v5709_v36  ;;  %v2610_v56 = vmul.f32 %v7119_v45, %v5702_v62 }
 0x1f8   : > { %v2812_v52 = vadd.f32 %v2715_v46, %v2568_v38  ;;  %v2012_v19 = vadd.f32 %v1917_v57, %v1735_v1  ;;  %v2162_v31 = vsel %vm2134_vm3, %v2160_v3, %v2161_v32  ;;  %v2293_v12 = vmul.f32 %v7120_v61, %v5702_v62 }
 0x1f9   : > { %v3475_v51 = vmax.f32 %v3443_v18, 0.0  ;;  %v2472_v35 = vrot.slane %v2366_v21, 1  ;;  %v2473_v24 = vrot.slane %v2367_v0, 1  ;;  %v2611_v59 = vmul.f32 %v7119_v45, %v5709_v36 }
 0x1fa   : > { %v2880_v30 = vadd.f32 %v2848_v16, %v2812_v52  ;;  %v2257_v2 = vadd.f32 %v2162_v31, %v2012_v19  ;;  %v2716_v17 = vrot.slane %v2610_v56, 2  ;;  %v2922_v22 = vmul.f32 %v7126_v44, %v5799_v4 }
 0x1fb   : > { %3547 = vrot.lane.b32.xlu1 %v3475_v51, %s3916_s24  ;;  %v3027_v20 = vsel %vm1889_vm2, %v3024_v47, %v3026_v10  ;;  %v2717_v8 = vrot.slane %v2611_v59, 2  ;;  %v5821_v48 = vmul.f32 %v7126_v44, %v5806_v43  ;;  %v3166_v11 = vmul.f32 %v5729_v7, %v5799_v4 }
 0x1fc   : > { %v3124_v49 = vadd.f32 %v3027_v20, %v2880_v30  ;;  %v3271_v13 = vsel %vm2134_vm3, %v3268_v37, %v3270_v39  ;;  %v2325_v40 = vadd.f32 %v2293_v12, %v2257_v2  ;;  %v5830_v54 = vmul.f32 %v5729_v7, %v5806_v43 }
 0x1fd   : > { %v2474_v28 = vsel %vm1889_vm2, %v2472_v35, %v2473_v24  ;;  %v2849_v47 = vmul.f32 %v7123_v6, %v5799_v4  ;;  %v3028_v16 = vrot.slane %v2922_v22, 1  ;;  %v3029_v5 = vrot.slane %v5821_v48, 1 }
 0x1fe   : > { %v3368_v55 = vadd.f32 %v3271_v13, %v3124_v49  ;;  %v2569_v46 = vadd.f32 %v2474_v28, %v2325_v40  ;;  %v2718_v10 = vsel %vm2134_vm3, %v2716_v17, %v2717_v8  ;;  %v1810_v60 = vmul.f32 %v7135_v41, %v5657_v33 }
 0x1ff   : > { %v3272_v37 = vrot.slane %v3166_v11, 2  ;;  %v3273_v29 = vrot.slane %v5830_v54, 2  ;;  %v2055_v53 = vmul.f32 %v7137_v63, %v5657_v33  ;;  %v2368_v23 = vmul.f32 %v7116_v25, %v5748_v50 }
 0x200   : > { %v3406_v58 = vmul.f32 %v5314_v14, %v3368_v55  ;;  %v2813_v26 = vadd.f32 %v2718_v10, %v2569_v46  ;;  %v1736_v39 = vmul.f32 %v7136_v15, %v5619_v9  ;;  %v1918_v1 = vrot.slane %v1810_v60, 1 }
 0x201   : > { %v3030_v38 = vsel %vm1889_vm2, %v3028_v16, %v3029_v5  ;;  %v2163_v3 = vrot.slane %v2055_v53, 2  ;;  %v2475_v21 = vrot.slane %v2368_v23, 1  ;;  %v2612_v18 = vmul.f32 %v7119_v45, %v5748_v50  ;;  %v5891_v53 = vld [vmem:[#allocation2 + $0xc0] sm:$0xff] }
 0x202   : > { %v3444_v33 = vadd.f32 %v5338_v34, %v3406_v58  ;;  %v2881_v57 = vadd.f32 %v2849_v47, %v2813_v26  ;;  %v1919_v0 = vsel %vm1889_vm2, %v1916_v27, %v1918_v1  ;;  %v2924_v56 = vmul.f32 %v7126_v44, %v5840_v42  ;;  %v5898_v26 = vld [vmem:[#allocation2 + $0xc8] sm:$0xff] }
 0x203   : > { %v3274_v9 = vsel %vm2134_vm3, %v3272_v37, %v3273_v29  ;;  %v2013_v52 = vadd.f32 %v1919_v0, %v1736_v39  ;;  %v2294_v19 = vmul.f32 %v7120_v61, %v5709_v36  ;;  %v2719_v31 = vrot.slane %v2612_v18, 2 }
 0x204   : > { %v3476_v12 = vmax.f32 %v3444_v33, 0.0  ;;  %v3125_v51 = vadd.f32 %v3030_v38, %v2881_v57  ;;  %v2164_v35 = vsel %vm2134_vm3, %v2161_v32, %v2163_v3  ;;  %v3168_v59 = vmul.f32 %v5729_v7, %v5840_v42 }
 0x205   : > { %v2258_v27 = vadd.f32 %v2164_v35, %v2013_v52  ;;  %v2476_v30 = vsel %vm1889_vm2, %v2473_v24, %v2475_v21  ;;  %v2850_v2 = vmul.f32 %v7123_v6, %v5806_v43  ;;  %v1811_v17 = vmul.f32 %v7135_v41, %v5702_v62 }
 0x206   : > { %3549 = vrot.lane.b32.xlu0 %v3476_v12, %s3916_s24  ;;  %v3369_v22 = vadd.f32 %v3274_v9, %v3125_v51  ;;  %v2720_v20 = vsel %vm2134_vm3, %v2717_v8, %v2719_v31  ;;  %v3031_v11 = vrot.slane %v2924_v56, 1  ;;  %v5875_v32 = vmul.f32 %v7135_v41, %v5709_v36 }
 0x207   : > { %v2326_v49 = vadd.f32 %v2294_v19, %v2258_v27  ;;  %v1920_v13 = vrot.slane %v1811_v17, 1  ;;  %v2056_v24 = vmul.f32 %v7137_v63, %v5702_v62  ;;  %v5881_v40 = vmul.f32 %v7137_v63, %v5709_v36 }
 0x208   : > { %v3407_v28 = vmul.f32 %v5314_v14, %v3369_v22  ;;  %v3275_v47 = vrot.slane %v3168_v59, 2  ;;  %v1737_v8 = vmul.f32 %v7136_v15, %v5702_v62  ;;  %v1921_v16 = vrot.slane %v5875_v32, 1 }
 0x209   : > { %v2570_v55 = vadd.f32 %v2476_v30, %v2326_v49  ;;  %v2165_v46 = vrot.slane %v2056_v24, 2  ;;  %v2166_v10 = vrot.slane %v5881_v40, 2  ;;  %v2369_v60 = vmul.f32 %v7116_v25, %v5799_v4 }
 0x20a   : > { %v3445_v37 = vadd.f32 %v5338_v34, %v3407_v28  ;;  %v1922_v23 = vsel %vm1889_vm2, %v1920_v13, %v1921_v16  ;;  %v2370_v14 = vmul.f32 %v7116_v25, %v5806_v43  ;;  %v2613_v62 = vmul.f32 %v7119_v45, %v5799_v4  ;;  %v5943_v13 = vld [vmem:[%s6980_s7] ss:$0 sm:$0xff] }
 0x20b   : > { %v2814_v58 = vadd.f32 %v2720_v20, %v2570_v55  ;;  %v2014_v39 = vadd.f32 %v1922_v23, %v1737_v8  ;;  %v2167_v1 = vsel %vm2134_vm3, %v2165_v46, %v2166_v10  ;;  %v2295_v34 = vmul.f32 %v7120_v61, %v5799_v4 }
 0x20c   : > { %v3477_v38 = vmax.f32 %v3445_v37, 0.0  ;;  %v2477_v3 = vrot.slane %v2369_v60, 1  ;;  %v2478_v21 = vrot.slane %v2370_v14, 1  ;;  %v2614_v18 = vmul.f32 %v7119_v45, %v5806_v43  ;;  %v5956_v37 = vld [vmem:[%s6981_s8] ss:$0 sm:$0xff] }
 0x20d   : > { %v2882_v33 = vadd.f32 %v2850_v2, %v2814_v58  ;;  %v2259_v57 = vadd.f32 %v2167_v1, %v2014_v39  ;;  %v2721_v0 = vrot.slane %v2613_v62, 2  ;;  %v2925_v56 = vmul.f32 %v7126_v44, %v5891_v53 }
 0x20e   : > { %3551 = vrot.lane.b32.xlu1 %v3477_v38, %s3916_s24  ;;  %v3032_v9 = vsel %vm1889_vm2, %v3029_v5, %v3031_v11  ;;  %v2722_v52 = vrot.slane %v2614_v18, 2  ;;  %v5915_v19 = vmul.f32 %v7126_v44, %v5898_v26  ;;  %v3169_v31 = vmul.f32 %v5729_v7, %v5891_v53  ;;  %v5934_v11 = vld [vmem:[#allocation2 + $0xd0] sm:$0x3] }
 0x20f   : > { %v3126_v12 = vadd.f32 %v3032_v9, %v2882_v33  ;;  %v3276_v51 = vsel %vm2134_vm3, %v3273_v29, %v3275_v47  ;;  %v2327_v35 = vadd.f32 %v2295_v34, %v2259_v57  ;;  %v5924_v59 = vmul.f32 %v5729_v7, %v5898_v26 }
 0x210   : > { %v2479_v48 = vsel %vm1889_vm2, %v2477_v3, %v2478_v21  ;;  %v2851_v5 = vmul.f32 %v7123_v6, %v5891_v53  ;;  %v3033_v27 = vrot.slane %v2925_v56, 1  ;;  %v3034_v30 = vrot.slane %v5915_v19, 1 }
 0x211   : > { %v3370_v2 = vadd.f32 %v3276_v51, %v3126_v12  ;;  %v2571_v17 = vadd.f32 %v2479_v48, %v2327_v35  ;;  %v2723_v22 = vsel %vm2134_vm3, %v2721_v0, %v2722_v52  ;;  %v1813_v54 = vmul.f32 %v7135_v41, %v5748_v50 }
 0x212   : > { %v3277_v29 = vrot.slane %v3169_v31, 2  ;;  %v3278_v20 = vrot.slane %v5924_v59, 2  ;;  %v2058_v32 = vmul.f32 %v7137_v63, %v5748_v50  ;;  %v2371_v49 = vmul.f32 %v7116_v25, %v5840_v42 }
 0x213   : > { %v3408_v24 = vmul.f32 %v5943_v13, %v3370_v2  ;;  %v2815_v28 = vadd.f32 %v2723_v22, %v2571_v17  ;;  %v1738_v47 = vmul.f32 %v7136_v15, %v5709_v36  ;;  %v1923_v8 = vrot.slane %v1813_v54, 1 }
 0x214   : > { %v3035_v55 = vsel %vm1889_vm2, %v3033_v27, %v3034_v30  ;;  %v2168_v50 = vrot.slane %v2058_v32, 2  ;;  %v2480_v46 = vrot.slane %v2371_v49, 1  ;;  %v2615_v60 = vmul.f32 %v7119_v45, %v5840_v42  ;;  %v5997_v32 = vld [vmem:[#allocation2 + $0xd8] sm:$0xff] }
 0x215   : > { %v3446_v23 = vadd.f32 %v5956_v37, %v3408_v24  ;;  %v2883_v14 = vadd.f32 %v2851_v5, %v2815_v28  ;;  %v1924_v36 = vsel %vm1889_vm2, %v1921_v16, %v1923_v8  ;;  %v2927_v62 = vmul.f32 %v7126_v44, %v5934_v11 }
 0x216   : > { %v3279_v58 = vsel %vm2134_vm3, %v3277_v29, %v3278_v20  ;;  %v2015_v39 = vadd.f32 %v1924_v36, %v1738_v47  ;;  %v2296_v1 = vmul.f32 %v7120_v61, %v5806_v43  ;;  %v2724_v34 = vrot.slane %v2615_v60, 2  ;;  %v6004_v47 = vld [vmem:[#allocation2 + $0xe0] sm:$0xff] }
 0x217   : > { %v3478_v38 = vmax.f32 %v3446_v23, 0.0  ;;  %v3127_v3 = vadd.f32 %v3035_v55, %v2883_v14  ;;  %v2169_v18 = vsel %vm2134_vm3, %v2166_v10, %v2168_v50  ;;  %v3171_v16 = vmul.f32 %v5729_v7, %v5934_v11 }
 0x218   : > { %v2260_v33 = vadd.f32 %v2169_v18, %v2015_v39  ;;  %v2481_v57 = vsel %vm1889_vm2, %v2478_v21, %v2480_v46  ;;  %v2852_v0 = vmul.f32 %v7123_v6, %v5898_v26  ;;  %v1814_v56 = vmul.f32 %v7135_v41, %v5799_v4 }
 0x219   : > { %3553 = vrot.lane.b32.xlu0 %v3478_v38, %s3916_s24  ;;  %v3371_v9 = vadd.f32 %v3279_v58, %v3127_v3  ;;  %v2725_v31 = vsel %vm2134_vm3, %v2722_v52, %v2724_v34  ;;  %v3036_v40 = vrot.slane %v2927_v62, 1  ;;  %v5981_v10 = vmul.f32 %v7135_v41, %v5806_v43 }
 0x21a   : > { %v2328_v12 = vadd.f32 %v2296_v1, %v2260_v33  ;;  %v1925_v51 = vrot.slane %v1814_v56, 1  ;;  %v2059_v21 = vmul.f32 %v7137_v63, %v5799_v4  ;;  %v5987_v35 = vmul.f32 %v7137_v63, %v5806_v43 }
 0x21b   : > { %v3409_v48 = vmul.f32 %v5943_v13, %v3371_v9  ;;  %v3280_v5 = vrot.slane %v3171_v16, 2  ;;  %v1739_v52 = vmul.f32 %v7136_v15, %v5799_v4  ;;  %v1926_v27 = vrot.slane %v5981_v10, 1 }
 0x21c   : > { %v2572_v2 = vadd.f32 %v2481_v57, %v2328_v12  ;;  %v2170_v17 = vrot.slane %v2059_v21, 2  ;;  %v2171_v22 = vrot.slane %v5987_v35, 2  ;;  %v2372_v54 = vmul.f32 %v7116_v25, %v5891_v53  ;;  %v6038_v12 = vld [vmem:[#allocation2 + $0xe8] sm:$0x3] }
 0x21d   : > { %v3447_v29 = vadd.f32 %v5956_v37, %v3409_v48  ;;  %v1927_v49 = vsel %vm1889_vm2, %v1925_v51, %v1926_v27  ;;  %v2373_v24 = vmul.f32 %v7116_v25, %v5898_v26  ;;  %v2616_v4 = vmul.f32 %v7119_v45, %v5891_v53 }
 0x21e   : > { %v2816_v28 = vadd.f32 %v2725_v31, %v2572_v2  ;;  %v2016_v8 = vadd.f32 %v1927_v49, %v1739_v52  ;;  %v2172_v55 = vsel %vm2134_vm3, %v2170_v17, %v2171_v22  ;;  %v2297_v50 = vmul.f32 %v7120_v61, %v5891_v53 }
 0x21f   : > { %v3479_v46 = vmax.f32 %v3447_v29, 0.0  ;;  %v2482_v60 = vrot.slane %v2372_v54, 1  ;;  %v2483_v23 = vrot.slane %v2373_v24, 1  ;;  %v2617_v14 = vmul.f32 %v7119_v45, %v5898_v26 }
 0x220   : > { %v2884_v36 = vadd.f32 %v2852_v0, %v2816_v28  ;;  %v2261_v62 = vadd.f32 %v2172_v55, %v2016_v8  ;;  %v2726_v58 = vrot.slane %v2616_v4, 2  ;;  %v2928_v39 = vmul.f32 %v7126_v44, %v5997_v32 }
 0x221   : > { %3555 = vrot.lane.b32.xlu1 %v3479_v46, %s3916_s24  ;;  %v3037_v1 = vsel %vm1889_vm2, %v3034_v30, %v3036_v40  ;;  %v2727_v34 = vrot.slane %v2617_v14, 2  ;;  %v6019_v38 = vmul.f32 %v7126_v44, %v6004_v47  ;;  %v3172_v3 = vmul.f32 %v5729_v7, %v5997_v32 }
 0x222   : > { %v3128_v18 = vadd.f32 %v3037_v1, %v2884_v36  ;;  %v3281_v16 = vsel %vm2134_vm3, %v3278_v20, %v3280_v5  ;;  %v2329_v33 = vadd.f32 %v2297_v50, %v2261_v62  ;;  %v6028_v57 = vmul.f32 %v5729_v7, %v6004_v47 }
 0x223   : > { %v2484_v19 = vsel %vm1889_vm2, %v2482_v60, %v2483_v23  ;;  %v2853_v30 = vmul.f32 %v7123_v6, %v5997_v32  ;;  %v3038_v0 = vrot.slane %v2928_v39, 1  ;;  %v3039_v56 = vrot.slane %v6019_v38, 1 }
 0x224   : > { %v3372_v9 = vadd.f32 %v3281_v16, %v3128_v18  ;;  %v2573_v31 = vadd.f32 %v2484_v19, %v2329_v33  ;;  %v2728_v40 = vsel %vm2134_vm3, %v2726_v58, %v2727_v34  ;;  %v1816_v59 = vmul.f32 %v7135_v41, %v5840_v42 }
 0x225   : > { %v3282_v20 = vrot.slane %v3172_v3, 2  ;;  %v3283_v10 = vrot.slane %v6028_v57, 2  ;;  %v2061_v51 = vmul.f32 %v7137_v63, %v5840_v42  ;;  %v2374_v21 = vmul.f32 %v7116_v25, %v5934_v11 }
 0x226   : > { %v3410_v35 = vmul.f32 %v5943_v13, %v3372_v9  ;;  %v2817_v48 = vadd.f32 %v2728_v40, %v2573_v31  ;;  %v1740_v5 = vmul.f32 %v7136_v15, %v5806_v43  ;;  %v1928_v52 = vrot.slane %v1816_v59, 1 }
 0x227   : > { %v3040_v2 = vsel %vm1889_vm2, %v3038_v0, %v3039_v56  ;;  %v2173_v17 = vrot.slane %v2061_v51, 2  ;;  %v2485_v54 = vrot.slane %v2374_v21, 1  ;;  %v2618_v29 = vmul.f32 %v7119_v45, %v5934_v11  ;;  %v6089_v51 = vld [vmem:[#allocation2 + $0xf0] sm:$0xff] }
 0x228   : > { %v3448_v42 = vadd.f32 %v5956_v37, %v3410_v35  ;;  %v2885_v49 = vadd.f32 %v2853_v30, %v2817_v48  ;;  %v1929_v24 = vsel %vm1889_vm2, %v1926_v27, %v1928_v52  ;;  %v2930_v4 = vmul.f32 %v7126_v44, %v6038_v12 }
 0x229   : > { %v3284_v43 = vsel %vm2134_vm3, %v3282_v20, %v3283_v10  ;;  %v2017_v28 = vadd.f32 %v1929_v24, %v1740_v5  ;;  %v2298_v8 = vmul.f32 %v7120_v61, %v5898_v26  ;;  %v2729_v55 = vrot.slane %v2618_v29, 2  ;;  %v6096_v5 = vld [vmem:[#allocation2 + $0xf8] sm:$0xff] }
 0x22a   : > { %v3480_v50 = vmax.f32 %v3448_v42, 0.0  ;;  %v3129_v46 = vadd.f32 %v3040_v2, %v2885_v49  ;;  %v2174_v60 = vsel %vm2134_vm3, %v2171_v22, %v2173_v17  ;;  %v3174_v14 = vmul.f32 %v5729_v7, %v6038_v12 }
 0x22b   : > { %v2262_v27 = vadd.f32 %v2174_v60, %v2017_v28  ;;  %v2486_v36 = vsel %vm1889_vm2, %v2483_v23, %v2485_v54  ;;  %v2854_v62 = vmul.f32 %v7123_v6, %v6004_v47  ;;  %v1817_v58 = vmul.f32 %v7135_v41, %v5891_v53 }
 0x22c   : > { %3557 = vrot.lane.b32.xlu0 %v3480_v50, %s3916_s24  ;;  %v3373_v39 = vadd.f32 %v3284_v43, %v3129_v46  ;;  %v2730_v1 = vsel %vm2134_vm3, %v2727_v34, %v2729_v55  ;;  %v3041_v3 = vrot.slane %v2930_v4, 1  ;;  %v6073_v22 = vmul.f32 %v7135_v41, %v5898_v26 }
 0x22d   : > { %v2330_v18 = vadd.f32 %v2298_v8, %v2262_v27  ;;  %v1930_v16 = vrot.slane %v1817_v58, 1  ;;  %v2062_v23 = vmul.f32 %v7137_v63, %v5891_v53  ;;  %v6079_v33 = vmul.f32 %v7137_v63, %v5898_v26 }
 0x22e   : > { %v3411_v19 = vmul.f32 %v5943_v13, %v3373_v39  ;;  %v3285_v30 = vrot.slane %v3174_v14, 2  ;;  %v1741_v34 = vmul.f32 %v7136_v15, %v5891_v53  ;;  %v1931_v0 = vrot.slane %v6073_v22, 1 }
 0x22f   : > { %v2574_v9 = vadd.f32 %v2486_v36, %v2330_v18  ;;  %v2175_v31 = vrot.slane %v2062_v23, 2  ;;  %v2176_v40 = vrot.slane %v6079_v33, 2  ;;  %v2375_v59 = vmul.f32 %v7116_v25, %v5997_v32  ;;  %v6130_v18 = vld [vmem:[#allocation2 + $0x100] sm:$0x3] }
 0x230   : > { %v3449_v20 = vadd.f32 %v5956_v37, %v3411_v19  ;;  %v1932_v21 = vsel %vm1889_vm2, %v1930_v16, %v1931_v0  ;;  %v2376_v35 = vmul.f32 %v7116_v25, %v6004_v47  ;;  %v2619_v53 = vmul.f32 %v7119_v45, %v5997_v32 }
 0x231   : > { %v2818_v48 = vadd.f32 %v2730_v1, %v2574_v9  ;;  %v2018_v52 = vadd.f32 %v1932_v21, %v1741_v34  ;;  %v2177_v2 = vsel %vm2134_vm3, %v2175_v31, %v2176_v40  ;;  %v2299_v17 = vmul.f32 %v7120_v61, %v5997_v32 }
 0x232   : > { %v3481_v54 = vmax.f32 %v3449_v20, 0.0  ;;  %v2487_v29 = vrot.slane %v2375_v59, 1  ;;  %v2488_v42 = vrot.slane %v2376_v35, 1  ;;  %v2620_v49 = vmul.f32 %v7119_v45, %v6004_v47 }
 0x233   : > { %v2886_v24 = vadd.f32 %v2854_v62, %v2818_v48  ;;  %v2263_v4 = vadd.f32 %v2177_v2, %v2018_v52  ;;  %v2731_v43 = vrot.slane %v2619_v53, 2  ;;  %v2931_v28 = vmul.f32 %v7126_v44, %v6089_v51 }
 0x234   : > { %3559 = vrot.lane.b32.xlu1 %v3481_v54, %s3916_s24  ;;  %v3042_v8 = vsel %vm1889_vm2, %v3039_v56, %v3041_v3  ;;  %v2732_v55 = vrot.slane %v2620_v49, 2  ;;  %v6111_v50 = vmul.f32 %v7126_v44, %v6096_v5  ;;  %v3175_v46 = vmul.f32 %v5729_v7, %v6089_v51 }
 0x235   : > { %v3130_v60 = vadd.f32 %v3042_v8, %v2886_v24  ;;  %v3286_v14 = vsel %vm2134_vm3, %v3283_v10, %v3285_v30  ;;  %v2331_v27 = vadd.f32 %v2299_v17, %v2263_v4  ;;  %v6120_v36 = vmul.f32 %v5729_v7, %v6096_v5 }
 0x236   : > { %v2489_v38 = vsel %vm1889_vm2, %v2487_v29, %v2488_v42  ;;  %v2855_v56 = vmul.f32 %v7123_v6, %v6089_v51  ;;  %v3043_v62 = vrot.slane %v2931_v28, 1  ;;  %v3044_v58 = vrot.slane %v6111_v50, 1 }
 0x237   : > { %v3374_v39 = vadd.f32 %v3286_v14, %v3130_v60  ;;  %v2575_v1 = vadd.f32 %v2489_v38, %v2331_v27  ;;  %v2733_v3 = vsel %vm2134_vm3, %v2731_v43, %v2732_v55  ;;  %v1819_v57 = vmul.f32 %v7135_v41, %v5934_v11 }
 0x238   : > { %v3287_v10 = vrot.slane %v3175_v46, 2  ;;  %v3288_v22 = vrot.slane %v6120_v36, 2  ;;  %v2064_v16 = vmul.f32 %v7137_v63, %v5934_v11  ;;  %v2377_v23 = vmul.f32 %v7116_v25, %v6038_v12 }
 0x239   : > { %v3412_v33 = vmul.f32 %v5943_v13, %v3374_v39  ;;  %v2819_v19 = vadd.f32 %v2733_v3, %v2575_v1  ;;  %v1742_v30 = vmul.f32 %v7136_v15, %v5898_v26  ;;  %v1933_v34 = vrot.slane %v1819_v57, 1 }
 0x23a   : > { %v3045_v9 = vsel %vm1889_vm2, %v3043_v62, %v3044_v58  ;;  %v2178_v31 = vrot.slane %v2064_v16, 2  ;;  %v2490_v59 = vrot.slane %v2377_v23, 1  ;;  %v2621_v20 = vmul.f32 %v7119_v45, %v6038_v12  ;;  %v6181_v16 = vld [vmem:[#allocation2 + $0x108] sm:$0xff] }
 0x23b   : > { %v3450_v11 = vadd.f32 %v5956_v37, %v3412_v33  ;;  %v2887_v21 = vadd.f32 %v2855_v56, %v2819_v19  ;;  %v1934_v35 = vsel %vm1889_vm2, %v1931_v0, %v1933_v34  ;;  %v2933_v53 = vmul.f32 %v7126_v44, %v6130_v18 }
 0x23c   : > { %v3289_v26 = vsel %vm2134_vm3, %v3287_v10, %v3288_v22  ;;  %v2019_v48 = vadd.f32 %v1934_v35, %v1742_v30  ;;  %v2300_v52 = vmul.f32 %v7120_v61, %v6004_v47  ;;  %v2734_v2 = vrot.slane %v2621_v20, 2  ;;  %v6188_v30 = vld [vmem:[#allocation2 + $0x110] sm:$0xff] }
 0x23d   : > { %v3482_v17 = vmax.f32 %v3450_v11, 0.0  ;;  %v3131_v54 = vadd.f32 %v3045_v9, %v2887_v21  ;;  %v2179_v29 = vsel %vm2134_vm3, %v2176_v40, %v2178_v31  ;;  %v3177_v49 = vmul.f32 %v5729_v7, %v6130_v18 }
 0x23e   : > { %v2264_v0 = vadd.f32 %v2179_v29, %v2019_v48  ;;  %v2491_v24 = vsel %vm1889_vm2, %v2488_v42, %v2490_v59  ;;  %v2856_v4 = vmul.f32 %v7123_v6, %v6096_v5  ;;  %v1820_v43 = vmul.f32 %v7135_v41, %v5997_v32 }
 0x23f   : > { %3561 = vrot.lane.b32.xlu0 %v3482_v17, %s3916_s24  ;;  %v3375_v28 = vadd.f32 %v3289_v26, %v3131_v54  ;;  %v2735_v8 = vsel %vm2134_vm3, %v2732_v55, %v2734_v2  ;;  %v3046_v46 = vrot.slane %v2933_v53, 1  ;;  %v6165_v40 = vmul.f32 %v7135_v41, %v6004_v47 }
 0x240   : > { %v2332_v60 = vadd.f32 %v2300_v52, %v2264_v0  ;;  %v1935_v14 = vrot.slane %v1820_v43, 1  ;;  %v2065_v42 = vmul.f32 %v7137_v63, %v5997_v32  ;;  %v6171_v27 = vmul.f32 %v7137_v63, %v6004_v47 }
 0x241   : > { %v3413_v38 = vmul.f32 %v5943_v13, %v3375_v28  ;;  %v3290_v56 = vrot.slane %v3177_v49, 2  ;;  %v1743_v55 = vmul.f32 %v7136_v15, %v5997_v32  ;;  %v1936_v62 = vrot.slane %v6165_v40, 1 }
 0x242   : > { %v2576_v39 = vadd.f32 %v2491_v24, %v2332_v60  ;;  %v2180_v1 = vrot.slane %v2065_v42, 2  ;;  %v2181_v3 = vrot.slane %v6171_v27, 2  ;;  %v2378_v57 = vmul.f32 %v7116_v25, %v6089_v51  ;;  %v6219_v60 = vld [vmem:[#allocation2 + $0x118] sm:$0x3] }
 0x243   : > { %v3451_v10 = vadd.f32 %v5956_v37, %v3413_v38  ;;  %v1937_v23 = vsel %vm1889_vm2, %v1935_v14, %v1936_v62  ;;  %v2379_v33 = vmul.f32 %v7116_v25, %v6096_v5  ;;  %v2622_v32 = vmul.f32 %v7119_v45, %v6089_v51 }
 0x244   : > { %v2820_v19 = vadd.f32 %v2735_v8, %v2576_v39  ;;  %v2020_v34 = vadd.f32 %v1937_v23, %v1743_v55  ;;  %v2182_v9 = vsel %vm2134_vm3, %v2180_v1, %v2181_v3  ;;  %v2301_v31 = vmul.f32 %v7120_v61, %v6089_v51 }
 0x245   : > { %v3483_v59 = vmax.f32 %v3451_v10, 0.0  ;;  %v2492_v20 = vrot.slane %v2378_v57, 1  ;;  %v2493_v11 = vrot.slane %v2379_v33, 1  ;;  %v2623_v21 = vmul.f32 %v7119_v45, %v6096_v5 }
 0x246   : > { %v2888_v35 = vadd.f32 %v2856_v4, %v2820_v19  ;;  %v2265_v53 = vadd.f32 %v2182_v9, %v2020_v34  ;;  %v2736_v26 = vrot.slane %v2622_v32, 2  ;;  %v2934_v48 = vmul.f32 %v7126_v44, %v6181_v16 }
 0x247   : > { %3563 = vrot.lane.b32.xlu1 %v3483_v59, %s3916_s24  ;;  %v3047_v52 = vsel %vm1889_vm2, %v3044_v58, %v3046_v46  ;;  %v2737_v2 = vrot.slane %v2623_v21, 2  ;;  %v2935_v17 = vmul.f32 %v7126_v44, %v6188_v30  ;;  %v3178_v54 = vmul.f32 %v5729_v7, %v6181_v16 }
 0x248   : > { %v3132_v29 = vadd.f32 %v3047_v52, %v2888_v35  ;;  %v3291_v49 = vsel %vm2134_vm3, %v3288_v22, %v3290_v56  ;;  %v2333_v0 = vadd.f32 %v2301_v31, %v2265_v53  ;;  %v6210_v24 = vmul.f32 %v5729_v7, %v6188_v30 }
 0x249   : > { %v2494_v50 = vsel %vm1889_vm2, %v2492_v20, %v2493_v11  ;;  %v2857_v58 = vmul.f32 %v7123_v6, %v6181_v16  ;;  %v3048_v4 = vrot.slane %v2934_v48, 1  ;;  %v3049_v43 = vrot.slane %v2935_v17, 1 }
 0x24a   : > { %v3376_v28 = vadd.f32 %v3291_v49, %v3132_v29  ;;  %v2577_v8 = vadd.f32 %v2494_v50, %v2333_v0  ;;  %v2738_v46 = vsel %vm2134_vm3, %v2736_v26, %v2737_v2  ;;  %v1822_v36 = vmul.f32 %v7135_v41, %v6038_v12 }
 0x24b   : > { %v3292_v22 = vrot.slane %v3178_v54, 2  ;;  %v3293_v40 = vrot.slane %v6210_v24, 2  ;;  %v2067_v14 = vmul.f32 %v7137_v63, %v6038_v12  ;;  %v2380_v42 = vmul.f32 %v7116_v25, %v6130_v18 }
 0x24c   : > { %v3414_v27 = vmul.f32 %v5943_v13, %v3376_v28  ;;  %v2821_v38 = vadd.f32 %v2738_v46, %v2577_v8  ;;  %v1744_v56 = vmul.f32 %v7136_v15, %v6004_v47  ;;  %v1938_v55 = vrot.slane %v1822_v36, 1 }
 0x24d   : > { %v3050_v39 = vsel %vm1889_vm2, %v3048_v4, %v3049_v43  ;;  %v2183_v1 = vrot.slane %v2067_v14, 2  ;;  %v2495_v57 = vrot.slane %v2380_v42, 1  ;;  %v2624_v10 = vmul.f32 %v7119_v45, %v6130_v18  ;;  %v6269_v14 = vld [vmem:[#allocation2 + $0x120] sm:$0xff] }
 0x24e   : > { %v3452_v23 = vadd.f32 %v5956_v37, %v3414_v27  ;;  %v2889_v12 = vadd.f32 %v2857_v58, %v2821_v38  ;;  %v1939_v33 = vsel %vm1889_vm2, %v1936_v62, %v1938_v55  ;;  %v2936_v32 = vmul.f32 %v7126_v44, %v6219_v60  ;;  %v6274_v27 = vld [vmem:[#allocation2 + $0x128] sm:$0xff] }
 0x24f   : > { %v3294_v47 = vsel %vm2134_vm3, %v3292_v22, %v3293_v40  ;;  %v2021_v19 = vadd.f32 %v1939_v33, %v1744_v56  ;;  %v2302_v34 = vmul.f32 %v7120_v61, %v6096_v5  ;;  %v2739_v9 = vrot.slane %v2624_v10, 2 }
 0x250   : > { %v3484_v31 = vmax.f32 %v3452_v23, 0.0  ;;  %v3133_v59 = vadd.f32 %v3050_v39, %v2889_v12  ;;  %v2184_v20 = vsel %vm2134_vm3, %v2181_v3, %v2183_v1  ;;  %v3051_v21 = vrot.slane %v2936_v32, 1 }
 0x251   : > { %v2266_v35 = vadd.f32 %v2184_v20, %v2021_v19  ;;  %v2496_v62 = vsel %vm1889_vm2, %v2493_v11, %v2495_v57  ;;  %v2858_v53 = vmul.f32 %v7123_v6, %v6188_v30  ;;  %v1823_v26 = vmul.f32 %v7135_v41, %v6089_v51 }
 0x252   : > { %3565 = vrot.lane.b32.xlu0 %v3484_v31, %s3916_s24  ;;  %v3377_v48 = vadd.f32 %v3294_v47, %v3133_v59  ;;  %v2740_v52 = vsel %vm2134_vm3, %v2737_v2, %v2739_v9  ;;  %v3180_v17 = vmul.f32 %v5729_v7, %v6219_v60  ;;  %v6252_v3 = vmul.f32 %v7135_v41, %v6096_v5 }
 0x253   : > { %v2334_v54 = vadd.f32 %v2302_v34, %v2266_v35  ;;  %v1940_v11 = vrot.slane %v1823_v26, 1  ;;  %v2068_v29 = vmul.f32 %v7137_v63, %v6089_v51  ;;  %v6258_v49 = vmul.f32 %v7137_v63, %v6096_v5 }
 0x254   : > { %v3415_v0 = vmul.f32 %v5943_v13, %v3377_v48  ;;  %v3052_v2 = vsel %vm1889_vm2, %v3049_v43, %v3051_v21  ;;  %v1745_v50 = vmul.f32 %v7136_v15, %v6089_v51  ;;  %v1941_v58 = vrot.slane %v6252_v3, 1 }
 0x255   : > { %v2578_v4 = vadd.f32 %v2496_v62, %v2334_v54  ;;  %v2185_v28 = vrot.slane %v2068_v29, 2  ;;  %v2186_v8 = vrot.slane %v6258_v49, 2  ;;  %v2381_v46 = vmul.f32 %v7116_v25, %v6181_v16 }
 0x256   : > { %v3453_v36 = vadd.f32 %v5956_v37, %v3415_v0  ;;  %v3295_v22 = vrot.slane %v3180_v17, 2  ;;  %v1942_v42 = vsel %vm1889_vm2, %v1940_v11, %v1941_v58  ;;  %v2382_v43 = vmul.f32 %v7116_v25, %v6188_v30  ;;  %v6306_v17 = vld [vmem:[#allocation2 + $0x130] sm:$0x3] }
 0x257   : > { %v2822_v51 = vadd.f32 %v2740_v52, %v2578_v4  ;;  %v2022_v38 = vadd.f32 %v1942_v42, %v1745_v50  ;;  %v2187_v56 = vsel %vm2134_vm3, %v2185_v28, %v2186_v8  ;;  %v2625_v55 = vmul.f32 %v7119_v45, %v6181_v16 }
 0x258   : > { %v3485_v39 = vmax.f32 %v3453_v36, 0.0  ;;  %v2497_v1 = vrot.slane %v2381_v46, 1  ;;  %v2498_v57 = vrot.slane %v2382_v43, 1  ;;  %v2626_v10 = vmul.f32 %v7119_v45, %v6188_v30 }
 0x259   : > { %v2890_v23 = vadd.f32 %v2858_v53, %v2822_v51  ;;  %v2267_v12 = vadd.f32 %v2187_v56, %v2022_v38  ;;  %v2303_v33 = vmul.f32 %v7120_v61, %v6181_v16  ;;  %v2937_v32 = vmul.f32 %v7126_v44, %v6269_v14 }
 0x25a   : > { %3567 = vrot.lane.b32.xlu1 %v3485_v39, %s3916_s24  ;;  %v2499_v47 = vsel %vm1889_vm2, %v2497_v1, %v2498_v57  ;;  %v2742_v19 = vrot.slane %v2626_v10, 2  ;;  %v6289_v34 = vmul.f32 %v7126_v44, %v6274_v27  ;;  %v3296_v31 = vsel %vm2134_vm3, %v3293_v40, %v3295_v22 }
 0x25b   : > { %v3134_v9 = vadd.f32 %v3052_v2, %v2890_v23  ;;  %v2335_v59 = vadd.f32 %v2303_v33, %v2267_v12  ;;  %v2741_v20 = vrot.slane %v2625_v55, 2  ;;  %v2859_v21 = vmul.f32 %v7123_v6, %v6269_v14 }
 0x25c   : > { %v3181_v35 = vmul.f32 %v5729_v7, %v6269_v14  ;;  %v6300_v62 = vmul.f32 %v5729_v7, %v6274_v27  ;;  %v3053_v48 = vrot.slane %v2937_v32, 1  ;;  %v1825_v24 = vmul.f32 %v7135_v41, %v6130_v18 }
 0x25d   : > { %v3378_v53 = vadd.f32 %v3296_v31, %v3134_v9  ;;  %v2579_v26 = vadd.f32 %v2499_v47, %v2335_v59  ;;  %v2743_v40 = vsel %vm2134_vm3, %v2741_v20, %v2742_v19  ;;  %v3054_v52 = vrot.slane %v6289_v34, 1  ;;  %v6344_v47 = vld [vmem:[%s6977_s4 + $0x8] ss:$0 sm:$0xff] }
 0x25e   : > { %v2070_v3 = vmul.f32 %v7137_v63, %v6130_v18  ;;  %v2383_v54 = vmul.f32 %v7116_v25, %v6219_v60  ;;  %v1746_v29 = vmul.f32 %v7136_v15, %v6096_v5  ;;  %v1943_v49 = vrot.slane %v1825_v24, 1 }
 0x25f   : > { %v3416_v7 = vmul.f32 %v5943_v13, %v3378_v53  ;;  %v2823_v11 = vadd.f32 %v2743_v40, %v2579_v26  ;;  %v3298_v0 = vrot.slane %v6300_v62, 2  ;;  %v2627_v4 = vmul.f32 %v7119_v45, %v6219_v60 }
 0x260   : > { %v2188_v2 = vrot.slane %v2070_v3, 2  ;;  %v2500_v50 = vrot.slane %v2383_v54, 1  ;;  %v1944_v46 = vsel %vm1889_vm2, %v1941_v58, %v1943_v49  ;;  %v2939_v36 = vmul.f32 %v7126_v44, %v6306_v17  ;;  %v6361_v3 = vld [vmem:[#allocation2 + $0x138] sm:$0xff]  ;;  %v6370_v49 = vld [vmem:[#allocation2 + $0x140] sm:$0xff] }
 0x261   : > { %v3454_v28 = vadd.f32 %v5956_v37, %v3416_v7  ;;  %v2891_v18 = vadd.f32 %v2859_v21, %v2823_v11  ;;  %v3055_v5 = vsel %vm1889_vm2, %v3053_v48, %v3054_v52  ;;  %v3297_v22 = vrot.slane %v3181_v35, 2 }
 0x262   : > { %v2023_v42 = vadd.f32 %v1944_v46, %v1746_v29  ;;  %v2304_v43 = vmul.f32 %v7120_v61, %v6188_v30  ;;  %v2189_v56 = vsel %vm2134_vm3, %v2186_v8, %v2188_v2  ;;  %v2744_v55 = vrot.slane %v2627_v4, 2 }
 0x263   : > { %v3486_v51 = vmax.f32 %v3454_v28, 0.0  ;;  %v3135_v38 = vadd.f32 %v3055_v5, %v2891_v18  ;;  %v3299_v58 = vsel %vm2134_vm3, %v3297_v22, %v3298_v0  ;;  %v2860_v1 = vmul.f32 %v7123_v6, %v6274_v27 }
 0x264   : > { %v2268_v39 = vadd.f32 %v2189_v56, %v2023_v42  ;;  %v1826_v10 = vmul.f32 %v7135_v41, %v6181_v16  ;;  %v2501_v12 = vsel %vm1889_vm2, %v2498_v57, %v2500_v50  ;;  %v3056_v33 = vrot.slane %v2939_v36, 1 }
 0x265   : > { %3569 = vrot.lane.b32.xlu0 %v3486_v51, %s3916_s24  ;;  %v3379_v23 = vadd.f32 %v3299_v58, %v3135_v38  ;;  %v6339_v8 = vmul.f32 %v7135_v41, %v6188_v30  ;;  %v3183_v9 = vmul.f32 %v6344_v47, %v6306_v17  ;;  %v2071_v31 = vmul.f32 %v7137_v63, %v6181_v16 }
 0x266   : > { %v2336_v32 = vadd.f32 %v2304_v43, %v2268_v39  ;;  %v6352_v57 = vmul.f32 %v7137_v63, %v6188_v30  ;;  %v2745_v20 = vsel %vm2134_vm3, %v2742_v19, %v2744_v55  ;;  %v1945_v21 = vrot.slane %v1826_v10, 1 }
 0x267   : > { %v3417_v59 = vmul.f32 %v5943_v13, %v3379_v23  ;;  %v1946_v35 = vrot.slane %v6339_v8, 1  ;;  %v1747_v26 = vmul.f32 %v7136_v15, %v6181_v16  ;;  %v2190_v48 = vrot.slane %v2071_v31, 2 }
 0x268   : > { %v2580_v53 = vadd.f32 %v2501_v12, %v2336_v32  ;;  %v2191_v24 = vrot.slane %v6352_v57, 2  ;;  %v2384_v7 = vmul.f32 %v7116_v25, %v6269_v14  ;;  %v6368_v19 = vmul.f32 %v7116_v25, %v6274_v27  ;;  %v6409_v32 = vld [vmem:[#allocation2 + $0x148] sm:$0x3] }
 0x269   : > { %v3455_v40 = vadd.f32 %v5956_v37, %v3417_v59  ;;  %v1947_v54 = vsel %vm1889_vm2, %v1945_v21, %v1946_v35  ;;  %v3300_v29 = vrot.slane %v3183_v9, 2  ;;  %v2628_v2 = vmul.f32 %v7119_v45, %v6269_v14 }
 0x26a   : > { %v2824_v11 = vadd.f32 %v2745_v20, %v2580_v53  ;;  %v2024_v16 = vadd.f32 %v1947_v54, %v1747_v26  ;;  %v2192_v4 = vsel %vm2134_vm3, %v2190_v48, %v2191_v24  ;;  %v2503_v28 = vrot.slane %v6368_v19, 1 }
 0x26b   : > { %v3487_v50 = vmax.f32 %v3455_v40, 0.0  ;;  %v6378_v18 = vmul.f32 %v7119_v45, %v6274_v27  ;;  %v2305_v5 = vmul.f32 %v7120_v61, %v6269_v14  ;;  %v2940_v22 = vmul.f32 %v7126_v44, %v6361_v3 }
 0x26c   : > { %v2892_v46 = vadd.f32 %v2860_v1, %v2824_v11  ;;  %v2269_v36 = vadd.f32 %v2192_v4, %v2024_v16  ;;  %v3057_v42 = vsel %vm1889_vm2, %v3054_v52, %v3056_v33  ;;  %v2502_v43 = vrot.slane %v2384_v7, 1 }
 0x26d   : > { %3571 = vrot.lane.b32.xlu1 %v3487_v50, %s3916_s24  ;;  %v2747_v51 = vrot.slane %v6378_v18, 2  ;;  %v6391_v38 = vmul.f32 %v7126_v44, %v6370_v49  ;;  %v3301_v55 = vsel %vm2134_vm3, %v3298_v0, %v3300_v29  ;;  %v2746_v39 = vrot.slane %v2628_v2, 2 }
 0x26e   : > { %v3136_v56 = vadd.f32 %v3057_v42, %v2892_v46  ;;  %v2337_v58 = vadd.f32 %v2305_v5, %v2269_v36  ;;  %v2504_v1 = vsel %vm1889_vm2, %v2502_v43, %v2503_v28  ;;  %v2861_v34 = vmul.f32 %v7123_v6, %v6361_v3 }
 0x26f   : > { %v3184_v52 = vmul.f32 %v6344_v47, %v6361_v3  ;;  %v6403_v10 = vmul.f32 %v6344_v47, %v6370_v49  ;;  %v3058_v33 = vrot.slane %v2940_v22, 1  ;;  %v1828_v62 = vmul.f32 %v7135_v41, %v6219_v60 }
 0x270   : > { %v3380_v23 = vadd.f32 %v3301_v55, %v3136_v56  ;;  %v2581_v12 = vadd.f32 %v2504_v1, %v2337_v58  ;;  %v2748_v0 = vsel %vm2134_vm3, %v2746_v39, %v2747_v51  ;;  %v3059_v8 = vrot.slane %v6391_v38, 1 }
 0x271   : > { %v2073_v9 = vmul.f32 %v7137_v63, %v6219_v60  ;;  %v2386_v31 = vmul.f32 %v7116_v25, %v6306_v17  ;;  %v1748_v20 = vmul.f32 %v7136_v15, %v6188_v30  ;;  %v1948_v21 = vrot.slane %v1828_v62, 1 }
 0x272   : > { %v3418_v57 = vmul.f32 %v5943_v13, %v3380_v23  ;;  %v2825_v59 = vadd.f32 %v2748_v0, %v2581_v12  ;;  %v3303_v53 = vrot.slane %v6403_v10, 2  ;;  %v2630_v40 = vmul.f32 %v7119_v45, %v6306_v17  ;;  %v6457_v0 = vld [vmem:[#allocation2 + $0x150] sm:$0xff] }
 0x273   : > { %v2193_v26 = vrot.slane %v2073_v9, 2  ;;  %v2505_v48 = vrot.slane %v2386_v31, 1  ;;  %v1949_v7 = vsel %vm1889_vm2, %v1946_v35, %v1948_v21  ;;  %v2942_v19 = vmul.f32 %v7126_v44, %v6409_v32 }
 0x274   : > { %v3456_v54 = vadd.f32 %v5956_v37, %v3418_v57  ;;  %v2893_v60 = vadd.f32 %v2861_v34, %v2825_v59  ;;  %v3060_v30 = vsel %vm1889_vm2, %v3058_v33, %v3059_v8  ;;  %v3302_v11 = vrot.slane %v3184_v52, 2 }
 0x275   : > { %v2025_v29 = vadd.f32 %v1949_v7, %v1748_v20  ;;  %v2306_v16 = vmul.f32 %v7120_v61, %v6274_v27  ;;  %v2194_v4 = vsel %vm2134_vm3, %v2191_v24, %v2193_v26  ;;  %v2749_v18 = vrot.slane %v2630_v40, 2  ;;  %v6466_v20 = vld [vmem:[#allocation2 + $0x158] sm:$0xff] }
 0x276   : > { %v3488_v2 = vmax.f32 %v3456_v54, 0.0  ;;  %v3137_v50 = vadd.f32 %v3060_v30, %v2893_v60  ;;  %v3304_v46 = vsel %vm2134_vm3, %v3302_v11, %v3303_v53  ;;  %v2862_v36 = vmul.f32 %v7123_v6, %v6370_v49 }
 0x277   : > { %v2270_v35 = vadd.f32 %v2194_v4, %v2025_v29  ;;  %v1829_v5 = vmul.f32 %v7135_v41, %v6269_v14  ;;  %v2506_v42 = vsel %vm1889_vm2, %v2503_v28, %v2505_v48  ;;  %v3061_v43 = vrot.slane %v2942_v19, 1 }
 0x278   : > { %3573 = vrot.lane.b32.xlu0 %v3488_v2, %s3916_s24  ;;  %v3381_v22 = vadd.f32 %v3304_v46, %v3137_v50  ;;  %v6440_v56 = vmul.f32 %v7135_v41, %v6274_v27  ;;  %v3186_v55 = vmul.f32 %v6344_v47, %v6409_v32  ;;  %v2074_v58 = vmul.f32 %v7137_v63, %v6269_v14 }
 0x279   : > { %v2338_v24 = vadd.f32 %v2306_v16, %v2270_v35  ;;  %v6448_v39 = vmul.f32 %v7137_v63, %v6274_v27  ;;  %v2750_v28 = vsel %vm2134_vm3, %v2747_v51, %v2749_v18  ;;  %v1950_v34 = vrot.slane %v1829_v5, 1 }
 0x27a   : > { %v3419_v1 = vmul.f32 %v5943_v13, %v3381_v22  ;;  %v1951_v52 = vrot.slane %v6440_v56, 1  ;;  %v1749_v23 = vmul.f32 %v7136_v15, %v6269_v14  ;;  %v2195_v12 = vrot.slane %v2074_v58, 2 }
 0x27b   : > { %v2582_v10 = vadd.f32 %v2506_v42, %v2338_v24  ;;  %v2196_v33 = vrot.slane %v6448_v39, 2  ;;  %v2387_v31 = vmul.f32 %v7116_v25, %v6361_v3  ;;  %v6464_v51 = vmul.f32 %v7116_v25, %v6370_v49  ;;  %v6503_v24 = vld [vmem:[#allocation2 + $0x160] sm:$0x3] }
 0x27c   : > { %v3457_v62 = vadd.f32 %v5956_v37, %v3419_v1  ;;  %v1952_v9 = vsel %vm1889_vm2, %v1950_v34, %v1951_v52  ;;  %v3305_v59 = vrot.slane %v3186_v55, 2  ;;  %v2631_v21 = vmul.f32 %v7119_v45, %v6361_v3 }
 0x27d   : > { %v2826_v57 = vadd.f32 %v2750_v28, %v2582_v10  ;;  %v2026_v14 = vadd.f32 %v1952_v9, %v1749_v23  ;;  %v2197_v48 = vsel %vm2134_vm3, %v2195_v12, %v2196_v33  ;;  %v2508_v40 = vrot.slane %v6464_v51, 1 }
 0x27e   : > { %v3489_v26 = vmax.f32 %v3457_v62, 0.0  ;;  %v6474_v54 = vmul.f32 %v7119_v45, %v6370_v49  ;;  %v2307_v19 = vmul.f32 %v7120_v61, %v6361_v3  ;;  %v2943_v30 = vmul.f32 %v7126_v44, %v6457_v0 }
 0x27f   : > { %v2894_v60 = vadd.f32 %v2862_v36, %v2826_v57  ;;  %v2271_v7 = vadd.f32 %v2197_v48, %v2026_v14  ;;  %v3062_v11 = vsel %vm1889_vm2, %v3059_v8, %v3061_v43  ;;  %v2507_v29 = vrot.slane %v2387_v31, 1 }
 0x280   : > { %3575 = vrot.lane.b32.xlu1 %v3489_v26, %s3916_s24  ;;  %v2752_v16 = vrot.slane %v6474_v54, 2  ;;  %v6487_v2 = vmul.f32 %v7126_v44, %v6466_v20  ;;  %v3306_v4 = vsel %vm2134_vm3, %v3303_v53, %v3305_v59  ;;  %v2751_v46 = vrot.slane %v2631_v21, 2 }
 0x281   : > { %v3138_v50 = vadd.f32 %v3062_v11, %v2894_v60  ;;  %v2339_v18 = vadd.f32 %v2307_v19, %v2271_v7  ;;  %v2509_v35 = vsel %vm1889_vm2, %v2507_v29, %v2508_v40  ;;  %v2863_v36 = vmul.f32 %v7123_v6, %v6457_v0 }
 0x282   : > { %v3187_v38 = vmul.f32 %v6344_v47, %v6457_v0  ;;  %v6497_v8 = vmul.f32 %v6344_v47, %v6466_v20  ;;  %v3063_v42 = vrot.slane %v2943_v30, 1  ;;  %v1831_v53 = vmul.f32 %v7135_v41, %v6306_v17 }
 0x283   : > { %v3382_v5 = vadd.f32 %v3306_v4, %v3138_v50  ;;  %v2583_v22 = vadd.f32 %v2509_v35, %v2339_v18  ;;  %v2753_v43 = vsel %vm2134_vm3, %v2751_v46, %v2752_v16  ;;  %v3064_v56 = vrot.slane %v6487_v2, 1 }
 0x284   : > { %v2076_v55 = vmul.f32 %v7137_v63, %v6306_v17  ;;  %v2389_v58 = vmul.f32 %v7116_v25, %v6409_v32  ;;  %v1750_v28 = vmul.f32 %v7136_v15, %v6274_v27  ;;  %v1953_v34 = vrot.slane %v1831_v53, 1  ;;  %v6560_v53 = vld [vmem:[%s6981_s8] ss:$0 sm:$0xff] }
 0x285   : > { %v3420_v39 = vmul.f32 %v5943_v13, %v3382_v5  ;;  %v2827_v1 = vadd.f32 %v2753_v43, %v2583_v22  ;;  %v3308_v10 = vrot.slane %v6497_v8, 2  ;;  %v2633_v62 = vmul.f32 %v7119_v45, %v6409_v32 }
 0x286   : > { %v2198_v23 = vrot.slane %v2076_v55, 2  ;;  %v2510_v12 = vrot.slane %v2389_v58, 1  ;;  %v1954_v31 = vsel %vm1889_vm2, %v1951_v52, %v1953_v34  ;;  %v2945_v13 = vmul.f32 %v7126_v44, %v6503_v24  ;;  %v6563_v55 = vld [vmem:[#allocation2 + $0x168] sm:$0xff] }
 0x287   : > { %v3458_v9 = vadd.f32 %v5956_v37, %v3420_v39  ;;  %v2895_v17 = vadd.f32 %v2863_v36, %v2827_v1  ;;  %v3065_v27 = vsel %vm1889_vm2, %v3063_v42, %v3064_v56  ;;  %v3307_v51 = vrot.slane %v3187_v38, 2 }
 0x288   : > { %v2027_v57 = vadd.f32 %v1954_v31, %v1750_v28  ;;  %v2308_v59 = vmul.f32 %v7120_v61, %v6370_v49  ;;  %v2199_v26 = vsel %vm2134_vm3, %v2196_v33, %v2198_v23  ;;  %v2754_v37 = vrot.slane %v2633_v62, 2  ;;  %v6572_v28 = vld [vmem:[#allocation2 + $0x170] sm:$0xff]  ;;  %v6584_v31 = vpop.permute.xlu1 %3531 }
 0x289   : > { %v3490_v14 = vmax.f32 %v3458_v9, 0.0  ;;  %v3139_v21 = vadd.f32 %v3065_v27, %v2895_v17  ;;  %v3309_v52 = vsel %vm2134_vm3, %v3307_v51, %v3308_v10  ;;  %v2864_v54 = vmul.f32 %v7123_v6, %v6466_v20  ;;  %3628 = vst.msk [vmem:[%s4634_s23] sm:$0xff] %vm3627_vm4, %v6584_v31 }
 0x28a   : > { %v2272_v48 = vadd.f32 %v2199_v26, %v2027_v57  ;;  %v1832_v60 = vmul.f32 %v7135_v41, %v6361_v3  ;;  %v2511_v19 = vsel %vm1889_vm2, %v2508_v40, %v2510_v12  ;;  %v3066_v30 = vrot.slane %v2945_v13, 1  ;;  %v6549_v40 = vld [vmem:[%s6980_s7] ss:$0 sm:$0xff] }
 0x28b   : > { %3577 = vrot.lane.b32.xlu0 %v3490_v14, %s3916_s24  ;;  %v3383_v7 = vadd.f32 %v3309_v52, %v3139_v21  ;;  %v6536_v33 = vmul.f32 %v7135_v41, %v6370_v49  ;;  %v3189_v29 = vmul.f32 %v6344_v47, %v6503_v24  ;;  %v2077_v50 = vmul.f32 %v7137_v63, %v6361_v3 }
 0x28c   : > { %v2340_v11 = vadd.f32 %v2308_v59, %v2272_v48  ;;  %v6544_v4 = vmul.f32 %v7137_v63, %v6370_v49  ;;  %v2755_v46 = vsel %vm2134_vm3, %v2752_v16, %v2754_v37  ;;  %v1955_v35 = vrot.slane %v1832_v60, 1  ;;  %v6602_v60 = vpop.permute.xlu0 %3533 }
 0x28d   : > { %v3421_v18 = vmul.f32 %v6549_v40, %v3383_v7  ;;  %v1956_v36 = vrot.slane %v6536_v33, 1  ;;  %v1751_v5 = vmul.f32 %v7136_v15, %v6361_v3  ;;  %v2200_v22 = vrot.slane %v2077_v50, 2  ;;  %v6617_v50 = vld [vmem:[#allocation2 + $0x178] sm:$0x3]  ;;  %3629 = vst.msk [vmem:[%s4634_s23 + $0x8] sm:$0xff] %vm3627_vm4, %v6602_v60 }
 0x28e   : > { %v2584_v38 = vadd.f32 %v2511_v19, %v2340_v11  ;;  %v2201_v42 = vrot.slane %v6544_v4, 2  ;;  %v2390_v58 = vmul.f32 %v7116_v25, %v6457_v0  ;;  %v6570_v3 = vmul.f32 %v7116_v25, %v6466_v20 }
 0x28f   : > { %v3459_v43 = vadd.f32 %v6560_v53, %v3421_v18  ;;  %v1957_v16 = vsel %vm1889_vm2, %v1955_v35, %v1956_v36  ;;  %v3310_v1 = vrot.slane %v3189_v29, 2  ;;  %v2634_v23 = vmul.f32 %v7119_v45, %v6457_v0  ;;  %v6623_v35 = vpop.permute.xlu1 %3535 }
 0x290   : > { %v2828_v39 = vadd.f32 %v2755_v46, %v2584_v38  ;;  %v2028_v34 = vadd.f32 %v1957_v16, %v1751_v5  ;;  %v2202_v62 = vsel %vm2134_vm3, %v2200_v22, %v2201_v42  ;;  %v2513_v9 = vrot.slane %v6570_v3, 1  ;;  %3630 = vst.msk [vmem:[%s4634_s23 + $0x10] sm:$0xff] %vm3627_vm4, %v6623_v35 }
 0x291   : > { %v3491_v12 = vmax.f32 %v3459_v43, 0.0  ;;  %v6582_v17 = vmul.f32 %v7119_v45, %v6466_v20  ;;  %v2309_v51 = vmul.f32 %v7120_v61, %v6457_v0  ;;  %v2946_v57 = vmul.f32 %v7126_v44, %v6563_v55 }
 0x292   : > { %v2896_v13 = vadd.f32 %v2864_v54, %v2828_v39  ;;  %v2273_v27 = vadd.f32 %v2202_v62, %v2028_v34  ;;  %v3067_v59 = vsel %vm1889_vm2, %v3064_v56, %v3066_v30  ;;  %v2512_v14 = vrot.slane %v2390_v58, 1 }
 0x293   : > { %3579 = vrot.lane.b32.xlu1 %v3491_v12, %s3916_s24  ;;  %v2757_v21 = vrot.slane %v6582_v17, 2  ;;  %v6597_v26 = vmul.f32 %v7126_v44, %v6572_v28  ;;  %v3311_v52 = vsel %vm2134_vm3, %v3308_v10, %v3310_v1  ;;  %v2756_v54 = vrot.slane %v2634_v23, 2  ;;  %v6635_v12 = vpop.permute.xlu0 %3537 }
 0x294   : > { %v3140_v37 = vadd.f32 %v3067_v59, %v2896_v13  ;;  %v2341_v48 = vadd.f32 %v2309_v51, %v2273_v27  ;;  %v2514_v2 = vsel %vm1889_vm2, %v2512_v14, %v2513_v9  ;;  %v2865_v56 = vmul.f32 %v7123_v6, %v6563_v55  ;;  %3631 = vst.msk [vmem:[%s4634_s23 + $0x18] sm:$0xff] %vm3627_vm4, %v6635_v12 }
 0x295   : > { %v3190_v7 = vmul.f32 %v6344_v47, %v6563_v55  ;;  %v6611_v19 = vmul.f32 %v6344_v47, %v6572_v28  ;;  %v3068_v33 = vrot.slane %v2946_v57, 1  ;;  %v1834_v10 = vmul.f32 %v7135_v41, %v6409_v32 }
 0x296   : > { %v3384_v30 = vadd.f32 %v3311_v52, %v3140_v37  ;;  %v2585_v8 = vadd.f32 %v2514_v2, %v2341_v48  ;;  %v2758_v11 = vsel %vm2134_vm3, %v2756_v54, %v2757_v21  ;;  %v3069_v29 = vrot.slane %v6597_v26, 1  ;;  %v6652_v48 = vpop.permute.xlu1 %3539 }
 0x297   : > { %v2079_v18 = vmul.f32 %v7137_v63, %v6409_v32  ;;  %v2392_v46 = vmul.f32 %v7116_v25, %v6503_v24  ;;  %v1752_v22 = vmul.f32 %v7136_v15, %v6370_v49  ;;  %v1958_v43 = vrot.slane %v1834_v10, 1  ;;  %3632 = vst.msk [vmem:[%s4634_s23 + $0x20] sm:$0xff] %vm3627_vm4, %v6652_v48 }
 0x298   : > { %v3422_v38 = vmul.f32 %v6549_v40, %v3384_v30  ;;  %v2829_v5 = vadd.f32 %v2758_v11, %v2585_v8  ;;  %v3313_v16 = vrot.slane %v6611_v19, 2  ;;  %v2636_v39 = vmul.f32 %v7119_v45, %v6503_v24 }
 0x299   : > { %v2203_v58 = vrot.slane %v2079_v18, 2  ;;  %v2515_v3 = vrot.slane %v2392_v46, 1  ;;  %v1959_v34 = vsel %vm1889_vm2, %v1956_v36, %v1958_v43  ;;  %v2948_v23 = vmul.f32 %v7126_v44, %v6617_v50  ;;  %v6671_v18 = vpop.permute.xlu0 %3541 }
 0x29a   : > { %v3460_v32 = vadd.f32 %v6560_v53, %v3422_v38  ;;  %v2897_v1 = vadd.f32 %v2865_v56, %v2829_v5  ;;  %v3070_v49 = vsel %vm1889_vm2, %v3068_v33, %v3069_v29  ;;  %v3312_v62 = vrot.slane %v3190_v7, 2  ;;  %3633 = vst.msk [vmem:[%s4634_s23 + $0x28] sm:$0xff] %vm3627_vm4, %v6671_v18 }
 0x29b   : > { %v2029_v17 = vadd.f32 %v1959_v34, %v1752_v22  ;;  %v2310_v13 = vmul.f32 %v7120_v61, %v6466_v20  ;;  %v2204_v36 = vsel %vm2134_vm3, %v2201_v42, %v2203_v58  ;;  %v2759_v57 = vrot.slane %v2636_v39, 2  ;;  %v6677_v58 = vld [vmem:[#allocation2 + $0x180] sm:$0xff]  ;;  %v6686_v34 = vld [vmem:[#allocation2 + $0x188] sm:$0xff] }
 0x29c   : > { %v3492_v27 = vmax.f32 %v3460_v32, 0.0  ;;  %v3141_v51 = vadd.f32 %v3070_v49, %v2897_v1  ;;  %v3314_v59 = vsel %vm2134_vm3, %v3312_v62, %v3313_v16  ;;  %v2866_v37 = vmul.f32 %v7123_v6, %v6572_v28  ;;  %v6690_v49 = vpop.permute.xlu1 %3543 }
 0x29d   : > { %v2274_v14 = vadd.f32 %v2204_v36, %v2029_v17  ;;  %v1835_v52 = vmul.f32 %v7135_v41, %v6457_v0  ;;  %v2516_v4 = vsel %vm1889_vm2, %v2513_v9, %v2515_v3  ;;  %v3071_v42 = vrot.slane %v2948_v23, 1  ;;  %3634 = vst.msk [vmem:[%s4634_s23 + $0x30] sm:$0xff] %vm3627_vm4, %v6690_v49 }
 0x29e   : > { %3581 = vrot.lane.b32.xlu0 %v3492_v27, %s3916_s24  ;;  %v3385_v54 = vadd.f32 %v3314_v59, %v3141_v51  ;;  %v6658_v2 = vmul.f32 %v7135_v41, %v6466_v20  ;;  %v3192_v7 = vmul.f32 %v6344_v47, %v6617_v50  ;;  %v2080_v30 = vmul.f32 %v7137_v63, %v6457_v0 }
 0x29f   : > { %v2342_v56 = vadd.f32 %v2310_v13, %v2274_v14  ;;  %v6666_v8 = vmul.f32 %v7137_v63, %v6466_v20  ;;  %v2760_v9 = vsel %vm2134_vm3, %v2757_v21, %v2759_v57  ;;  %v1960_v10 = vrot.slane %v1835_v52, 1 }
 0x2a0   : > { %v3423_v33 = vmul.f32 %v6549_v40, %v3385_v54  ;;  %v1961_v11 = vrot.slane %v6658_v2, 1  ;;  %v1753_v38 = vmul.f32 %v7136_v15, %v6457_v0  ;;  %v2205_v5 = vrot.slane %v2080_v30, 2 }
 0x2a1   : > { %v2586_v46 = vadd.f32 %v2516_v4, %v2342_v56  ;;  %v2206_v22 = vrot.slane %v6666_v8, 2  ;;  %v2393_v21 = vmul.f32 %v7116_v25, %v6563_v55  ;;  %v6684_v39 = vmul.f32 %v7116_v25, %v6572_v28 }
 0x2a2   : > { %v3461_v43 = vadd.f32 %v6560_v53, %v3423_v33  ;;  %v1962_v3 = vsel %vm1889_vm2, %v1960_v10, %v1961_v11  ;;  %v3315_v1 = vrot.slane %v3192_v7, 2  ;;  %v2637_v23 = vmul.f32 %v7119_v45, %v6563_v55 }
 0x2a3   : > { %v2830_v32 = vadd.f32 %v2760_v9, %v2586_v46  ;;  %v2030_v0 = vadd.f32 %v1962_v3, %v1753_v38  ;;  %v2207_v17 = vsel %vm2134_vm3, %v2205_v5, %v2206_v22  ;;  %v2518_v13 = vrot.slane %v6684_v39, 1 }
 0x2a4   : > { %v3493_v62 = vmax.f32 %v3461_v43, 0.0  ;;  %v6698_v27 = vmul.f32 %v7119_v45, %v6572_v28  ;;  %v2311_v57 = vmul.f32 %v7120_v61, %v6563_v55  ;;  %v2949_v59 = vmul.f32 %v7126_v44, %v6677_v58  ;;  %v6733_v43 = vld [vmem:[#allocation2 + $0x190] sm:$0x3] }
 0x2a5   : > { %v2898_v51 = vadd.f32 %v2866_v37, %v2830_v32  ;;  %v2275_v36 = vadd.f32 %v2207_v17, %v2030_v0  ;;  %v3072_v14 = vsel %vm1889_vm2, %v3069_v29, %v3071_v42  ;;  %v2517_v52 = vrot.slane %v2393_v21, 1  ;;  %v6713_v37 = vpop.permute.xlu0 %3545 }
 0x2a6   : > { %3583 = vrot.lane.b32.xlu1 %v3493_v62, %s3916_s24  ;;  %v2762_v54 = vrot.slane %v6698_v27, 2  ;;  %v6711_v4 = vmul.f32 %v7126_v44, %v6686_v34  ;;  %v3316_v56 = vsel %vm2134_vm3, %v3313_v16, %v3315_v1  ;;  %v2761_v30 = vrot.slane %v2637_v23, 2  ;;  %v6729_v16 = vpop.permute.xlu1 %3547  ;;  %3635 = vst.msk [vmem:[%s4634_s23 + $0x38] sm:$0xff] %vm3627_vm4, %v6713_v37 }
 0x2a7   : > { %v3142_v2 = vadd.f32 %v3072_v14, %v2898_v51  ;;  %v2343_v7 = vadd.f32 %v2311_v57, %v2275_v36  ;;  %v2519_v26 = vsel %vm1889_vm2, %v2517_v52, %v2518_v13  ;;  %v2867_v29 = vmul.f32 %v7123_v6, %v6677_v58  ;;  %3636 = vst.msk [vmem:[%s4634_s23 + $0x40] sm:$0xff] %vm3627_vm4, %v6729_v16 }
 0x2a8   : > { %v3193_v42 = vmul.f32 %v6344_v47, %v6677_v58  ;;  %v6725_v33 = vmul.f32 %v6344_v47, %v6686_v34  ;;  %v3073_v46 = vrot.slane %v2949_v59, 1  ;;  %v1837_v19 = vmul.f32 %v7135_v41, %v6503_v24 }
 0x2a9   : > { %v3386_v9 = vadd.f32 %v3316_v56, %v3142_v2  ;;  %v2587_v10 = vadd.f32 %v2519_v26, %v2343_v7  ;;  %v2763_v38 = vsel %vm2134_vm3, %v2761_v30, %v2762_v54  ;;  %v3074_v5 = vrot.slane %v6711_v4, 1  ;;  %v6745_v51 = vpop.permute.xlu0 %3549 }
 0x2aa   : > { %v2082_v3 = vmul.f32 %v7137_v63, %v6503_v24  ;;  %v2395_v21 = vmul.f32 %v7116_v25, %v6617_v50  ;;  %v1754_v1 = vmul.f32 %v7136_v15, %v6466_v20  ;;  %v1963_v0 = vrot.slane %v1837_v19, 1  ;;  %3637 = vst.msk [vmem:[%s4634_s23 + $0x48] sm:$0xff] %vm3627_vm4, %v6745_v51 }
 0x2ab   : > { %v3424_v39 = vmul.f32 %v6549_v40, %v3386_v9  ;;  %v2831_v32 = vadd.f32 %v2763_v38, %v2587_v10  ;;  %v3318_v23 = vrot.slane %v6725_v33, 2  ;;  %v2639_v27 = vmul.f32 %v7119_v45, %v6617_v50 }
 0x2ac   : > { %v2208_v62 = vrot.slane %v2082_v3, 2  ;;  %v2520_v17 = vrot.slane %v2395_v21, 1  ;;  %v1964_v57 = vsel %vm1889_vm2, %v1961_v11, %v1963_v0  ;;  %v2951_v59 = vmul.f32 %v7126_v44, %v6733_v43  ;;  %v6759_v11 = vpop.permute.xlu1 %3551 }
 0x2ad   : > { %v3462_v24 = vadd.f32 %v6560_v53, %v3424_v39  ;;  %v2899_v36 = vadd.f32 %v2867_v29, %v2831_v32  ;;  %v3075_v20 = vsel %vm1889_vm2, %v3073_v46, %v3074_v5  ;;  %v3317_v14 = vrot.slane %v3193_v42, 2  ;;  %v6782_v32 = vpop.permute.xlu0 %3553  ;;  %3638 = vst.msk [vmem:[%s4634_s23 + $0x50] sm:$0xff] %vm3627_vm4, %v6759_v11 }
 0x2ae   : > { %v2031_v52 = vadd.f32 %v1964_v57, %v1754_v1  ;;  %v2312_v2 = vmul.f32 %v7120_v61, %v6572_v28  ;;  %v2209_v30 = vsel %vm2134_vm3, %v2206_v22, %v2208_v62  ;;  %v2764_v26 = vrot.slane %v2639_v27, 2  ;;  %3639 = vst.msk [vmem:[%s4634_s23 + $0x58] sm:$0xff] %vm3627_vm4, %v6782_v32 }
 0x2af   : > { %v3494_v56 = vmax.f32 %v3462_v24, 0.0  ;;  %v3143_v7 = vadd.f32 %v3075_v20, %v2899_v36  ;;  %v3319_v29 = vsel %vm2134_vm3, %v3317_v14, %v3318_v23  ;;  %v2868_v42 = vmul.f32 %v7123_v6, %v6686_v34 }
 0x2b0   : > { %v2276_v9 = vadd.f32 %v2209_v30, %v2031_v52  ;;  %v1838_v10 = vmul.f32 %v7135_v41, %v6563_v55  ;;  %v2521_v8 = vsel %vm1889_vm2, %v2518_v13, %v2520_v17  ;;  %v3076_v22 = vrot.slane %v2951_v59, 1  ;;  %v6798_v14 = vpop.permute.xlu1 %3555 }
 0x2b1   : > { %3585 = vrot.lane.b32.xlu0 %v3494_v56, %s3916_s24  ;;  %v3387_v46 = vadd.f32 %v3319_v29, %v3143_v7  ;;  %v6772_v19 = vmul.f32 %v7135_v41, %v6572_v28  ;;  %v3195_v3 = vmul.f32 %v6344_v47, %v6733_v43  ;;  %v2083_v21 = vmul.f32 %v7137_v63, %v6563_v55  ;;  %v1718_v56 = vld [vmem:[#allocation2 + $0x198] sm:$0xff] }
 0x2b2   : > { %v2344_v38 = vadd.f32 %v2312_v2, %v2276_v9  ;;  %v6780_v39 = vmul.f32 %v7137_v63, %v6572_v28  ;;  %v2765_v1 = vsel %vm2134_vm3, %v2762_v54, %v2764_v26  ;;  %v1965_v0 = vrot.slane %v1838_v10, 1  ;;  %3640 = vst.msk [vmem:[%s4634_s23 + $0x60] sm:$0xff] %vm3627_vm4, %v6798_v14 }
 0x2b3   : > { %v3425_v13 = vmul.f32 %v6549_v40, %v3387_v46  ;;  %v1966_v62 = vrot.slane %v6772_v19, 1  ;;  %v1755_v27 = vmul.f32 %v7136_v15, %v6563_v55  ;;  %v2210_v24 = vrot.slane %v2083_v21, 2  ;;  %v6800_v55 = vld [vmem:[#allocation2 + $0x1a0] sm:$0xff] }
 0x2b4   : > { %v2588_v17 = vadd.f32 %v2521_v8, %v2344_v38  ;;  %v2211_v36 = vrot.slane %v6780_v39, 2  ;;  %v2396_v20 = vmul.f32 %v7116_v25, %v6677_v58  ;;  %v6796_v54 = vmul.f32 %v7116_v25, %v6686_v34 }
 0x2b5   : > { %v3463_v57 = vadd.f32 %v6560_v53, %v3425_v13  ;;  %v1967_v59 = vsel %vm1889_vm2, %v1965_v0, %v1966_v62  ;;  %v3320_v2 = vrot.slane %v3195_v3, 2  ;;  %v2640_v30 = vmul.f32 %v7119_v45, %v6677_v58  ;;  %v6817_v3 = vpop.permute.xlu0 %3557 }
 0x2b6   : > { %v2832_v52 = vadd.f32 %v2765_v1, %v2588_v17  ;;  %v2032_v7 = vadd.f32 %v1967_v59, %v1755_v27  ;;  %v2212_v29 = vsel %vm2134_vm3, %v2210_v24, %v2211_v36  ;;  %v2523_v9 = vrot.slane %v6796_v54, 1  ;;  %3641 = vst.msk [vmem:[%s4634_s23 + $0x68] sm:$0xff] %vm3627_vm4, %v6817_v3 }
 0x2b7   : > { %v3495_v26 = vmax.f32 %v3463_v57, 0.0  ;;  %v6810_v10 = vmul.f32 %v7119_v45, %v6686_v34  ;;  %v3077_v8 = vsel %vm1889_vm2, %v3074_v5, %v3076_v22  ;;  %v2313_v38 = vmul.f32 %v7120_v61, %v6677_v58  ;;  %v3560_v57 = vpop.permute.xlu1 %3559 }
 0x2b8   : > { %v2900_v46 = vadd.f32 %v2868_v42, %v2832_v52  ;;  %v2277_v19 = vadd.f32 %v2212_v29, %v2032_v7  ;;  %v2522_v21 = vrot.slane %v2396_v20, 1  ;;  %v2952_v1 = vmul.f32 %v7126_v44, %v1718_v56  ;;  %3642 = vst.msk [vmem:[%s4634_s23 + $0x70] sm:$0xff] %vm3627_vm4, %v3560_v57 }
 0x2b9   : > { %3587 = vrot.lane.b32.xlu1 %v3495_v26, %s3916_s24  ;;  %v2767_v13 = vrot.slane %v6810_v10, 2  ;;  %v6824_v42 = vmul.f32 %v7126_v44, %v6800_v55  ;;  %v3321_v5 = vsel %vm2134_vm3, %v3318_v23, %v3320_v2  ;;  %v2766_v58 = vrot.slane %v2640_v30, 2 }
 0x2ba   : > { %v3144_v4 = vadd.f32 %v3077_v8, %v2900_v46  ;;  %v2345_v22 = vadd.f32 %v2313_v38, %v2277_v19  ;;  %v2524_v0 = vsel %vm1889_vm2, %v2522_v21, %v2523_v9  ;;  %v2869_v17 = vmul.f32 %v7123_v6, %v1718_v56  ;;  %v3562_v8 = vpop.permute.xlu0 %3561  ;;  %v1720_v19 = vld [vmem:[#allocation2 + $0x1a8] sm:$0x3] }
 0x2bb   : > { %v3079_v27 = vrot.slane %v6824_v42, 1  ;;  %v6836_v24 = vmul.f32 %v6344_v47, %v6800_v55  ;;  %v3196_v33 = vmul.f32 %v6344_v47, %v1718_v56  ;;  %v1840_v23 = vmul.f32 %v7135_v41, %v6617_v50  ;;  %3643 = vst.msk [vmem:[%s4634_s23 + $0x78] sm:$0xff] %vm3627_vm4, %v3562_v8 }
 0x2bc   : > { %v3388_v59 = vadd.f32 %v3321_v5, %v3144_v4  ;;  %v2589_v20 = vadd.f32 %v2524_v0, %v2345_v22  ;;  %v2768_v52 = vsel %vm2134_vm3, %v2766_v58, %v2767_v13  ;;  %v3078_v2 = vrot.slane %v2952_v1, 1  ;;  %v3564_v58 = vpop.permute.xlu1 %3563 }
 0x2bd   : > { %v2085_v7 = vmul.f32 %v7137_v63, %v6617_v50  ;;  %v2398_v30 = vmul.f32 %v7116_v25, %v6733_v43  ;;  %v1968_v46 = vrot.slane %v1840_v23, 1  ;;  %v3323_v56 = vrot.slane %v6836_v24, 2  ;;  %3644 = vst.msk [vmem:[%s4634_s23 + $0x80] sm:$0xff] %vm3627_vm4, %v3564_v58 }
 0x2be   : > { %v3426_v26 = vmul.f32 %v6549_v40, %v3388_v59  ;;  %v2833_v29 = vadd.f32 %v2768_v52, %v2589_v20  ;;  %v3080_v41 = vsel %vm1889_vm2, %v3078_v2, %v3079_v27  ;;  %v1756_v38 = vmul.f32 %v7136_v15, %v6572_v28 }
 0x2bf   : > { %v2213_v21 = vrot.slane %v2085_v7, 2  ;;  %v1969_v25 = vsel %vm1889_vm2, %v1966_v62, %v1968_v46  ;;  %v2642_v1 = vmul.f32 %v7119_v45, %v6733_v43  ;;  %v3322_v4 = vrot.slane %v3196_v33, 2 }
 0x2c0   : > { %v3464_v63 = vadd.f32 %v6560_v53, %v3426_v26  ;;  %v2901_v50 = vadd.f32 %v2869_v17, %v2833_v29  ;;  %v2033_v5 = vadd.f32 %v1969_v25, %v1756_v38  ;;  %v2525_v22 = vrot.slane %v2398_v30, 1 }
 0x2c1   : > { %v2214_v28 = vsel %vm2134_vm3, %v2211_v36, %v2213_v21  ;;  %v2954_v45 = vmul.f32 %v7126_v44, %v1720_v19  ;;  %v3324_v43 = vsel %vm2134_vm3, %v3322_v4, %v3323_v56  ;;  %v2314_v17 = vmul.f32 %v7120_v61, %v6686_v34 }
 0x2c2   : > { %v3496_v0 = vmax.f32 %v3464_v63, 0.0  ;;  %v3145_v15 = vadd.f32 %v3080_v41, %v2901_v50  ;;  %v2278_v62 = vadd.f32 %v2214_v28, %v2033_v5  ;;  %v2769_v36 = vrot.slane %v2642_v1, 2 }
 0x2c3   : > { %v2526_v60 = vsel %vm1889_vm2, %v2523_v9, %v2525_v22  ;;  %v3081_v35 = vrot.slane %v2954_v45, 1  ;;  %v3198_v12 = vmul.f32 %v6344_v47, %v1720_v19  ;;  %v2870_v18 = vmul.f32 %v7123_v6, %v6800_v55 }
 0x2c4   : > { %3589 = vrot.lane.b32.xlu0 %v3496_v0, %s3916_s24  ;;  %v3389_v39 = vadd.f32 %v3324_v43, %v3145_v15  ;;  %v3566_v61 = vpop.permute.xlu0 %3565  ;;  %v2346_v44 = vadd.f32 %v2314_v17, %v2278_v62  ;;  %v2770_v49 = vsel %vm2134_vm3, %v2767_v13, %v2769_v36 }
 0x2c5   : > { %3645 = vst.msk [vmem:[%s4634_s23 + $0x88] sm:$0xff] %vm3627_vm4, %v3566_v61  ;;  %v3082_v51 = vsel %vm1889_vm2, %v3079_v27, %v3081_v35  ;;  %v3325_v11 = vrot.slane %v3198_v12, 2 }
 0x2c6   : > { %v3427_v31 = vmul.f32 %v6549_v40, %v3389_v39  ;;  %v2590_v48 = vadd.f32 %v2526_v60, %v2346_v44 }
 0x2c7   : > { %v3326_v54 = vsel %vm2134_vm3, %v3323_v56, %v3325_v11 }
 0x2c8   : > { %v3465_v34 = vadd.f32 %v6560_v53, %v3427_v31  ;;  %v2834_v37 = vadd.f32 %v2770_v49, %v2590_v48 }
 0x2ca   : > { %v3497_v16 = vmax.f32 %v3465_v34, 0.0  ;;  %v2902_v47 = vadd.f32 %v2870_v18, %v2834_v37 }
 0x2cc   : > { %3591 = vrot.lane.b32.xlu1 %v3497_v16, %s3916_s24  ;;  %v3568_v6 = vpop.permute.xlu1 %3567  ;;  %v3146_v32 = vadd.f32 %v3082_v51, %v2902_v47 }
 0x2cd   : > { %3646 = vst.msk [vmem:[%s4634_s23 + $0x90] sm:$0xff] %vm3627_vm4, %v3568_v6 }
 0x2ce   : > { %v3390_v14 = vadd.f32 %v3326_v54, %v3146_v32 }
 0x2d0   : > { %v3428_v55 = vmul.f32 %v6549_v40, %v3390_v14 }
 0x2d2   : > { %v3466_v9 = vadd.f32 %v6560_v53, %v3428_v55 }
 0x2d4   : > { %v3498_v10 = vmax.f32 %v3466_v9, 0.0 }
 0x2d6   : > { %3593 = vrot.lane.b32.xlu0 %v3498_v10, %s3916_s24 }
 0x2d7   : > { %v3570_v3 = vpop.permute.xlu0 %3569 }
 0x2d8   : > { %3647 = vst.msk [vmem:[%s4634_s23 + $0x98] sm:$0xff] %vm3627_vm4, %v3570_v3 }
 0x2df   : > { %v3572_v13 = vpop.permute.xlu1 %3571 }
 0x2e0   : > { %3648 = vst.msk [vmem:[%s4634_s23 + $0xa0] sm:$0xff] %vm3627_vm4, %v3572_v13 }
 0x2ea   : > { %v3574_v42 = vpop.permute.xlu0 %3573 }
 0x2eb   : > { %3649 = vst.msk [vmem:[%s4634_s23 + $0xa8] sm:$0xff] %vm3627_vm4, %v3574_v42 }
 0x2f2   : > { %v3576_v40 = vpop.permute.xlu1 %3575 }
 0x2f3   : > { %3650 = vst.msk [vmem:[%s4634_s23 + $0xb0] sm:$0xff] %vm3627_vm4, %v3576_v40 }
 0x2fd   : > { %v3578_v53 = vpop.permute.xlu0 %3577 }
 0x2fe   : > { %3651 = vst.msk [vmem:[%s4634_s23 + $0xb8] sm:$0xff] %vm3627_vm4, %v3578_v53 }
 0x305   : > { %v3580_v27 = vpop.permute.xlu1 %3579 }
 0x306   : > { %3652 = vst.msk [vmem:[%s4634_s23 + $0xc0] sm:$0xff] %vm3627_vm4, %v3580_v27 }
 0x310   : > { %v3582_v24 = vpop.permute.xlu0 %3581 }
 0x311   : > { %3653 = vst.msk [vmem:[%s4634_s23 + $0xc8] sm:$0xff] %vm3627_vm4, %v3582_v24 }
 0x318   : > { %v3584_v57 = vpop.permute.xlu1 %3583 }
 0x319   : > { %3654 = vst.msk [vmem:[%s4634_s23 + $0xd0] sm:$0xff] %vm3627_vm4, %v3584_v57 }
 0x323   : > { %v3586_v59 = vpop.permute.xlu0 %3585 }
 0x324   : > { %3655 = vst.msk [vmem:[%s4634_s23 + $0xd8] sm:$0xff] %vm3627_vm4, %v3586_v59 }
 0x32b   : > { %v3588_v20 = vpop.permute.xlu1 %3587 }
 0x32c   : > { %3656 = vst.msk [vmem:[%s4634_s23 + $0xe0] sm:$0xff] %vm3627_vm4, %v3588_v20 }
 0x336   : > { %v3590_v33 = vpop.permute.xlu0 %3589 }
 0x337   : > { %3657 = vst.msk [vmem:[%s4634_s23 + $0xe8] sm:$0xff] %vm3627_vm4, %v3590_v33 }
 0x33e   : > { %v3592_v23 = vpop.permute.xlu1 %3591 }
 0x33f   : > { %3658 = vst.msk [vmem:[%s4634_s23 + $0xf0] sm:$0xff] %vm3627_vm4, %v3592_v23 }
 0x348   : > { %v3594_v52 = vpop.permute.xlu0 %3593 }
 0x349   : > { %3659 = vst.msk [vmem:[%s4634_s23 + $0xf8] sm:$0xff] %vm3627_vm4, %v3594_v52 }
 0x34a PF: > { %s19_s11 = sadd.s32 1, %s3909_s11   ;;  %s7166_s30 = smov %s3905_s10 }
 0x34b   : > { %p16_p5 = scmp.ge.s32.totalorder %s19_s11, 4   ;;  %s7167_s10 = smov %s7169_s12 }
 0x34d   :  { %18 = sbr.rel (!%p16_p5) target bundleno = 2 (0x2), region = 94 }

</bundles_post_ra>
